<compile_context>
chip_gen: v6e
topology: v6e:2x2x1
jax: 0.10.0
libtpu: 0.0.40
codegen_flags: <defaults>
</compile_context>

<pallas_src>
import functools

import jax
import jax.numpy as jnp
from jax.experimental import pallas as pl
from jax.experimental.pallas import tpu as pltpu

EPS_BN = 1e-5


def _mm(a, b):     # (M, C) @ (C, N) -> f32
    return jax.lax.dot_general(a, b, (((1,), (0,)), ((), ())),
                               preferred_element_type=jnp.float32)


def _mm_nt(a, b):  # (M, C) @ b.T, b (N, C) -> f32 (M, N)
    return jax.lax.dot_general(a, b, (((1,), (1,)), ((), ())),
                               preferred_element_type=jnp.float32)


def _mm_tn(a, b):  # a.T @ b, a (N, C), b (N, D) -> f32 (C, D)
    return jax.lax.dot_general(a, b, (((0,), (0,)), ((), ())),
                               preferred_element_type=jnp.float32)


def _softplus(x):
    # matches F.softplus: log(1 + exp(x)), numerically stable
    return jnp.maximum(x, 0.0) + jnp.log(1.0 + jnp.exp(-jnp.abs(x)))


def _batchnorm_train(x):
    # BatchNorm1d training mode, weight=1 (frozen), bias=0, biased batch variance
    mu = jnp.mean(x, axis=0, keepdims=True)
    xc = x - mu
    var = jnp.mean(xc * xc, axis=0, keepdims=True)
    return xc * jax.lax.rsqrt(var + EPS_BN)


def _softmax_rows(x):
    m = jnp.max(x, axis=1, keepdims=True)
    e = jnp.exp(x - m)
    return e / jnp.sum(e, axis=1, keepdims=True)   # exact divide (review fix)


def tsctm_kernel(x_ref, w11_ref, b11_ref, w12_ref, b12_ref, w21_ref, b21_ref, wd_ref,
                 loss_ref, closs_ref,
                 h1_acc, q_scr, cnt_scr, m_scr, s_scr, xs_scr, dot_scr, base_scr, cl_scr,
                 *, temperature, weight_contrast, commitment_cost, row_block):
    phase = pl.program_id(0)     # 0: encoder V contraction, 1: decoder V sweep
    vstep = pl.program_id(1)
    n_vt = pl.num_programs(1)

    n = x_ref.shape[0]
    k = q_scr.shape[1]
    inv_temp = 1.0 / temperature
    inv_n = 1.0 / n

    # -------- phase 0, step 0: zero the encoder layer-1 accumulator ------------------
    @pl.when(jnp.logical_and(phase == 0, vstep == 0))
    def _():
        h1_acc[...] = jnp.zeros(h1_acc.shape, jnp.float32)

    # -------- phase 0: accumulate h1 = x @ w11^T over V tiles ------------------------
    @pl.when(phase == 0)
    def _():
        x_t = x_ref[...]                               # (N, TV) f32 — counts stay exact
        w_t = w11_ref[...].astype(jnp.float32)         # (E, TV), stored bf16 in HBM
        h1_acc[...] += _mm_nt(x_t, w_t)                # (N, E) f32 accumulate

    # -------- phase transition (phase 1, step 0): encode tail / quantize / TSC -------
    @pl.when(jnp.logical_and(phase == 1, vstep == 0))
    def _():
        e1 = _softplus(h1_acc[...] + b11_ref[...])
        e1 = _softplus(_mm(e1, w12_ref[...]) + b12_ref[...])
        theta = _batchnorm_train(_mm(e1, w21_ref[...]) + b21_ref[...])      # (N, K)
        softmax_theta = _softmax_rows(theta)

        # TopicDistQuant with identity codebook: nearest code == first argmax(theta)
        iota_k = jax.lax.broadcasted_iota(jnp.int32, (n, k), 1)
        row_max = jnp.max(theta, axis=1, keepdims=True)
        enc_idx = jnp.min(jnp.where(theta == row_max, iota_k, k), axis=1, keepdims=True)
        quantized = (iota_k == enc_idx).astype(jnp.float32)                 # one-hot (N, K)
        qd = quantized - softmax_theta
        quant_loss = (1.0 + commitment_cost) * jnp.sum(qd * qd, keepdims=True) / (n * k)

        q_scr[...] = quantized
        cnt_scr[...] = jnp.sum(quantized, axis=0, keepdims=True)            # (1, K) counts

        # TSC / SupCon (contrast_count = 1), strip-mined over row blocks so the only
        # O(N^2) temporary is one (row_block, N) strip at a time.
        sumsq = jnp.sum(theta * theta, axis=1, keepdims=True)
        feat = theta * jax.lax.rsqrt(jnp.maximum(sumsq, 1e-24))             # F.normalize
        feat_s = feat * inv_temp                                            # fold 1/T
        closs_acc = jnp.zeros((1, 1), jnp.float32)
        for r0 in range(0, n, row_block):
            f_rows = feat_s[r0:r0 + row_block, :]
            q_rows = quantized[r0:r0 + row_block, :]
            # stabilize with the exact per-row constant 1/T (the diagonal of the normalized
            # similarity matrix); any per-row constant cancels exactly in log_prob.
            logits = _mm_nt(f_rows, feat) - inv_temp                        # (RB, N)
            row_i = jax.lax.broadcasted_iota(jnp.int32, (row_block, n), 0) + r0
            col_i = jax.lax.broadcasted_iota(jnp.int32, (row_block, n), 1)
            off_diag = row_i != col_i
            pos = jnp.where(off_diag, _mm_nt(q_rows, quantized), 0.0)       # same code, no self
            exp_l = jnp.where(off_diag, jnp.exp(logits), 0.0)               # diag masked (ref)
            log_denom = jnp.log(jnp.maximum(jnp.sum(exp_l, axis=1, keepdims=True), 1e-30))
            pos_cnt = jnp.sum(pos, axis=1, keepdims=True)
            pos_sum = jnp.sum(pos * logits, axis=1, keepdims=True)
            # pos_cnt == 0: reference SupCon yields 0/0 = NaN; contribute 0 instead (documented).
            mlpp = (pos_sum - pos_cnt * log_denom) / jnp.maximum(pos_cnt, 1.0)
            closs_acc = closs_acc - jnp.sum(mlpp, keepdims=True)
        # temperature / base_temperature == 1 in the reference implementation
        closs = weight_contrast * closs_acc * inv_n

        base_scr[...] = quant_loss + closs
        cl_scr[...] = closs

        # init decoder accumulators for the phase-1 V sweep
        m_scr[...] = jnp.full(m_scr.shape, -jnp.inf, jnp.float32)
        s_scr[...] = jnp.zeros(s_scr.shape, jnp.float32)
        xs_scr[...] = jnp.zeros(xs_scr.shape, jnp.float32)
        dot_scr[...] = jnp.zeros(dot_scr.shape, jnp.float32)

    # -------- phase 1: decoder in (K, V) space, accumulated per V tile ----------------
    @pl.when(phase == 1)
    def _():
        x_t = x_ref[...]                                # (N, TV) f32
        wd_t = wd_ref[...].astype(jnp.float32)          # (K, TV), stored bf16 in HBM
        cn = cnt_scr[...] * inv_n                       # (1, K)  code frequencies
        mean = _mm(cn, wd_t)                            # (1, TV) BN batch mean per column
        wc = wd_t - mean
        var = _mm(cn, wc * wc)                          # (1, TV) biased batch variance
        wdbn = wc * jax.lax.rsqrt(var + EPS_BN)         # (K, TV) BN'd codebook rows
        xq = _mm_tn(q_scr[...], x_t)                    # (K, TV) per-code sums of x (f32 exact)
        dot_scr[...] += jnp.sum(xq * wdbn, keepdims=True)
        xs_scr[...] += jnp.sum(xq, axis=1, keepdims=True)
        # per-code online log-sum-exp over V (robust even for huge V)
        tmax = jnp.max(wdbn, axis=1, keepdims=True)     # (K, 1)
        mnew = jnp.maximum(m_scr[...], tmax)
        s_scr[...] = (s_scr[...] * jnp.exp(m_scr[...] - mnew)
                      + jnp.sum(jnp.exp(wdbn - mnew), axis=1, keepdims=True))
        m_scr[...] = mnew

    # -------- finalize on the last grid step ------------------------------------------
    @pl.when(jnp.logical_and(phase == 1, vstep == n_vt - 1))
    def _():
        lse = m_scr[...] + jnp.log(s_scr[...])          # (K, 1) per-code logsumexp over V
        # recon = mean_i( -sum_v x[i,v] * log_softmax(d)[i,v] )
        #       = (sum_k XS_k * lse_k - sum_{k,v} xq * wd_bn) / N
        recon_loss = (jnp.sum(xs_scr[...] * lse, keepdims=True) - dot_scr[...]) * inv_n
        loss_ref[...] = recon_loss + base_scr[...]
        closs_ref[...] = cl_scr[...]


def tsctm_forward(x, params, temperature=0.5, weight_contrast=1.0,
                  tile_v=256, row_block=256, vmem_limit_mb=48):
    """x: (N, V) f32 bag-of-words counts.
    params: w11 (E, V) torch-native orientation (lane-dense), b11 (1, E), w12 (E, E),
            b12 (1, E), w21 (E, K), b21 (1, K), wd (K, V) == fcd1.weight.T.
    vmem_limit_mb: keep <= ~56 on v7x; raise toward ~100 (with bigger tile_v) on v5e/v6e."""
    x = x.astype(jnp.float32)
    n, v = x.shape
    w11 = params["w11"]
    e = w11.shape[0]
    wd = params["wd"]
    k = wd.shape[0]
    assert v % tile_v == 0, "vocab must be a multiple of tile_v"
    n_vt = v // tile_v
    rb = min(row_block, n)
    assert n % rb == 0, "batch must be a multiple of row_block"

    kernel = functools.partial(tsctm_kernel,
                               temperature=temperature,
                               weight_contrast=weight_contrast,
                               commitment_cost=0.25,
                               row_block=rb)

    grid = (2, n_vt)
    in_specs = [
        # x: V-tiled, fetched in both phases
        pl.BlockSpec((n, tile_v), lambda p, s: (0, s)),
        # w11: V-tiled in phase 0; in phase 1 the index freezes at the last tile -> no refetch
        pl.BlockSpec((e, tile_v), lambda p, s: (0, s * (1 - p) + (n_vt - 1) * p)),
        pl.BlockSpec((1, e), lambda p, s: (0, 0)),      # b11 (resident)
        pl.BlockSpec((e, e), lambda p, s: (0, 0)),      # w12 (resident)
        pl.BlockSpec((1, e), lambda p, s: (0, 0)),      # b12 (resident)
        pl.BlockSpec((e, k), lambda p, s: (0, 0)),      # w21 (resident)
        pl.BlockSpec((1, k), lambda p, s: (0, 0)),      # b21 (resident)
        # wd: index 0 during phase 0 (one tile), V-tiled sweep in phase 1
        pl.BlockSpec((k, tile_v), lambda p, s: (0, s * p)),
    ]
    out_specs = (pl.BlockSpec((1, 1), lambda p, s: (0, 0)),
                 pl.BlockSpec((1, 1), lambda p, s: (0, 0)))
    scratch_shapes = [
        pltpu.VMEM((n, e), jnp.float32),   # h1_acc  : x @ w11^T accumulator
        pltpu.VMEM((n, k), jnp.float32),   # q_scr   : one-hot quantization
        pltpu.VMEM((1, k), jnp.float32),   # cnt_scr : per-code counts
        pltpu.VMEM((k, 1), jnp.float32),   # m_scr   : online LSE running max
        pltpu.VMEM((k, 1), jnp.float32),   # s_scr   : online LSE running sum
        pltpu.VMEM((k, 1), jnp.float32),   # xs_scr  : per-code sum of x
        pltpu.VMEM((1, 1), jnp.float32),   # dot_scr : sum(xq * wd_bn)
        pltpu.VMEM((1, 1), jnp.float32),   # base_scr: quant_loss + closs
        pltpu.VMEM((1, 1), jnp.float32),   # cl_scr  : closs
    ]

    loss, closs = pl.pallas_call(
        kernel,
        out_shape=(jax.ShapeDtypeStruct((1, 1), jnp.float32),
                   jax.ShapeDtypeStruct((1, 1), jnp.float32)),
        grid=grid,
        in_specs=in_specs,
        out_specs=out_specs,
        scratch_shapes=scratch_shapes,
        compiler_params=pltpu.CompilerParams(
            dimension_semantics=("arbitrary", "arbitrary"),
            vmem_limit_bytes=vmem_limit_mb * 1024 * 1024),
    )(x,
      w11.astype(jnp.bfloat16), params["b11"].astype(jnp.float32),
      params["w12"].astype(jnp.float32), params["b12"].astype(jnp.float32),
      params["w21"].astype(jnp.float32), params["b21"].astype(jnp.float32),
      wd.astype(jnp.bfloat16))
    return {"loss": loss[0, 0], "contrastive_loss": closs[0, 0]}


def xavier_uniform(key, shape):
    # same bound as torch.nn.init.xavier_uniform_ (symmetric in fan_in/fan_out)
    bound = (6.0 / (shape[0] + shape[1])) ** 0.5
    return jax.random.uniform(key, shape, jnp.float32, -bound, bound)


if __name__ == "__main__":
    # small shapes consistent with the module: vocab=1024, en_units=64, topics=16, batch=64
    V, E, K, N = 1024, 64, 16, 64
    key = jax.random.PRNGKey(0)
    k0, k1, k2, k3, kx = jax.random.split(key, 5)

    params = {
        # fc11.weight in torch is (E, V): kept in that lane-dense orientation.
        "w11": xavier_uniform(k0, (E, V)),
        "b11": jnp.zeros((1, E), jnp.float32),
        # fc12 / fc21 passed pre-transposed as (in, out); tiny, resident in VMEM.
        "w12": xavier_uniform(k1, (E, E)),
        "b12": jnp.zeros((1, E), jnp.float32),
        "w21": xavier_uniform(k2, (E, K)),
        "b21": jnp.zeros((1, K), jnp.float32),
        # fcd1.weight in torch is (V, K), no bias; kernel consumes beta = weight.T (K, V).
        "wd":  xavier_uniform(k3, (K, V)),
    }

    # bag-of-words counts; duplicate rows so every sample has a contrastive positive
    # (same quantization index), as happens with realistic batch sizes.
    x_half = jnp.floor(jax.random.uniform(kx, (N // 2, V), jnp.float32, 0.0, 3.0))
    x = jnp.concatenate([x_half, x_half], axis=0)

    # tile_v=256 -> grid (2, 4); row_block=32 exercises the strip-mined contrastive loop.
    out = tsctm_forward(x, params, tile_v=256, row_block=32)
    jax.block_until_ready(out["loss"])
    print("KERNEL_OK")
</pallas_src>

<mosaic_0001>
module attributes {stable_mosaic.version = 11 : i64} {
  func.func @tsctm_kernel(%arg0: i32, %arg1: i32, %arg2: memref<64x256xf32, #tpu.memory_space<vmem>>, %arg3: memref<64x256xbf16, #tpu.memory_space<vmem>>, %arg4: memref<1x64xf32, #tpu.memory_space<vmem>>, %arg5: memref<64x64xf32, #tpu.memory_space<vmem>>, %arg6: memref<1x64xf32, #tpu.memory_space<vmem>>, %arg7: memref<64x16xf32, #tpu.memory_space<vmem>>, %arg8: memref<1x16xf32, #tpu.memory_space<vmem>>, %arg9: memref<16x256xbf16, #tpu.memory_space<vmem>>, %arg10: memref<1x1xf32, #tpu.memory_space<vmem>>, %arg11: memref<1x1xf32, #tpu.memory_space<vmem>>, %arg12: memref<64x64xf32, #tpu.memory_space<vmem>>, %arg13: memref<64x16xf32, #tpu.memory_space<vmem>>, %arg14: memref<1x16xf32, #tpu.memory_space<vmem>>, %arg15: memref<16x1xf32, #tpu.memory_space<vmem>>, %arg16: memref<16x1xf32, #tpu.memory_space<vmem>>, %arg17: memref<16x1xf32, #tpu.memory_space<vmem>>, %arg18: memref<1x1xf32, #tpu.memory_space<vmem>>, %arg19: memref<1x1xf32, #tpu.memory_space<vmem>>, %arg20: memref<1x1xf32, #tpu.memory_space<vmem>>) attributes {dimension_semantics = [#tpu.dimension_semantics<arbitrary>, #tpu.dimension_semantics<arbitrary>], iteration_bounds = array<i64: 2, 4>, scalar_prefetch = 0 : i64, scratch_operands = 9 : i64, tpu.core_type = #tpu.core_type<tc>, window_params = [{transform_indices = @transform_0, window_bounds = array<i64: 64, 256>}, {transform_indices = @transform_1, window_bounds = array<i64: 64, 256>}, {pipeline_mode = #tpu.pipeline_mode<synchronous>, transform_indices = @transform_2, window_bounds = array<i64: 1, 64>}, {pipeline_mode = #tpu.pipeline_mode<synchronous>, transform_indices = @transform_3, window_bounds = array<i64: 64, 64>}, {pipeline_mode = #tpu.pipeline_mode<synchronous>, transform_indices = @transform_4, window_bounds = array<i64: 1, 64>}, {pipeline_mode = #tpu.pipeline_mode<synchronous>, transform_indices = @transform_5, window_bounds = array<i64: 64, 16>}, {pipeline_mode = #tpu.pipeline_mode<synchronous>, transform_indices = @transform_6, window_bounds = array<i64: 1, 16>}, {transform_indices = @transform_7, window_bounds = array<i64: 16, 256>}, {pipeline_mode = #tpu.pipeline_mode<synchronous>, transform_indices = @transform_8, window_bounds = array<i64: 1, 1>}, {pipeline_mode = #tpu.pipeline_mode<synchronous>, transform_indices = @transform_9, window_bounds = array<i64: 1, 1>}]} {
    %c0_i32 = arith.constant 0 : i32
    %0 = arith.cmpi eq, %arg0, %c0_i32 : i32
    %c0_i32_0 = arith.constant 0 : i32
    %1 = arith.cmpi eq, %arg1, %c0_i32_0 : i32
    %2 = arith.andi %0, %1 : i1
    %3 = arith.extui %2 : i1 to i32
    %c0_i32_1 = arith.constant 0 : i32
    %4 = arith.cmpi ne, %3, %c0_i32_1 : i32
    scf.if %4 {
      %cst = arith.constant 0.000000e+00 : f32
      %21 = vector.broadcast %cst : f32 to vector<64x64xf32>
      %c0 = arith.constant 0 : index
      %c0_10 = arith.constant 0 : index
      %22 = vector.load %arg12[%c0, %c0_10] : memref<64x64xf32, #tpu.memory_space<vmem>>, vector<64x64xf32>
      tpu.vector_store %arg12[%c0, %c0_10], %21 {strides = array<i32>} : memref<64x64xf32, #tpu.memory_space<vmem>>, vector<64x64xf32>,
    } else {
    }
    %c0_i32_2 = arith.constant 0 : i32
    %5 = arith.cmpi eq, %arg0, %c0_i32_2 : i32
    %6 = arith.extui %5 : i1 to i32
    %c0_i32_3 = arith.constant 0 : i32
    %7 = arith.cmpi ne, %6, %c0_i32_3 : i32
    scf.if %7 {
      %c0 = arith.constant 0 : index
      %c0_10 = arith.constant 0 : index
      %21 = vector.load %arg2[%c0, %c0_10] : memref<64x256xf32, #tpu.memory_space<vmem>>, vector<64x256xf32>
      %c0_11 = arith.constant 0 : index
      %c0_12 = arith.constant 0 : index
      %22 = vector.load %arg3[%c0_11, %c0_12] : memref<64x256xbf16, #tpu.memory_space<vmem>>, vector<64x256xbf16>
      %23 = arith.extf %22 : vector<64x256xbf16> to vector<64x256xf32>
      %c0_13 = arith.constant 0 : index
      %c0_14 = arith.constant 0 : index
      %24 = vector.load %arg12[%c0_13, %c0_14] : memref<64x64xf32, #tpu.memory_space<vmem>>, vector<64x64xf32>
      %cst = arith.constant dense<0.000000e+00> : vector<64x64xf32>
      %25 = tpu.matmul %21, %23, %cst {dimension_numbers = #tpu.dot_dimension_numbers<[1], [1], [0], [0], [0, 0, 1, 0], [], []>} : vector<64x256xf32>, vector<64x256xf32>, vector<64x64xf32> -> vector<64x64xf32>
      %26 = arith.addf %24, %25 : vector<64x64xf32>
      %c0_15 = arith.constant 0 : index
      %c0_16 = arith.constant 0 : index
      %27 = vector.load %arg12[%c0_15, %c0_16] : memref<64x64xf32, #tpu.memory_space<vmem>>, vector<64x64xf32>
      tpu.vector_store %arg12[%c0_15, %c0_16], %26 {strides = array<i32>} : memref<64x64xf32, #tpu.memory_space<vmem>>, vector<64x64xf32>,
    } else {
    }
    %c1_i32 = arith.constant 1 : i32
    %8 = arith.cmpi eq, %arg0, %c1_i32 : i32
    %c0_i32_4 = arith.constant 0 : i32
    %9 = arith.cmpi eq, %arg1, %c0_i32_4 : i32
    %10 = arith.andi %8, %9 : i1
    %11 = arith.extui %10 : i1 to i32
    %c0_i32_5 = arith.constant 0 : i32
    %12 = arith.cmpi ne, %11, %c0_i32_5 : i32
    scf.if %12 {
      %c0 = arith.constant 0 : index
      %c0_10 = arith.constant 0 : index
      %21 = vector.load %arg12[%c0, %c0_10] : memref<64x64xf32, #tpu.memory_space<vmem>>, vector<64x64xf32>
      %c0_11 = arith.constant 0 : index
      %c0_12 = arith.constant 0 : index
      %22 = vector.load %arg4[%c0_11, %c0_12] : memref<1x64xf32, #tpu.memory_space<vmem>>, vector<1x64xf32>
      %23 = vector.broadcast %22 : vector<1x64xf32> to vector<64x64xf32>
      %24 = arith.addf %21, %23 : vector<64x64xf32>
      %cst = arith.constant 0.000000e+00 : f32
      %25 = vector.broadcast %cst : f32 to vector<64x64xf32>
      %26 = arith.maximumf %24, %25 : vector<64x64xf32>
      %27 = math.absf %24 : vector<64x64xf32>
      %cst_13 = arith.constant 0.000000e+00 : f32
      %28 = vector.broadcast %cst_13 : f32 to vector<64x64xf32>
      %29 = arith.subf %28, %27 : vector<64x64xf32>
      %30 = math.exp %29 : vector<64x64xf32>
      %cst_14 = arith.constant 1.000000e+00 : f32
      %31 = vector.broadcast %cst_14 : f32 to vector<64x64xf32>
      %32 = arith.addf %31, %30 : vector<64x64xf32>
      %33 = math.log %32 : vector<64x64xf32>
      %34 = arith.addf %26, %33 : vector<64x64xf32>
      %c0_15 = arith.constant 0 : index
      %c0_16 = arith.constant 0 : index
      %35 = vector.load %arg5[%c0_15, %c0_16] : memref<64x64xf32, #tpu.memory_space<vmem>>, vector<64x64xf32>
      %cst_17 = arith.constant dense<0.000000e+00> : vector<64x64xf32>
      %36 = tpu.matmul %34, %35, %cst_17 {dimension_numbers = #tpu.dot_dimension_numbers<[1], [0], [0], [1], [0, 0, 1, 1], [], []>} : vector<64x64xf32>, vector<64x64xf32>, vector<64x64xf32> -> vector<64x64xf32>
      %c0_18 = arith.constant 0 : index
      %c0_19 = arith.constant 0 : index
      %37 = vector.load %arg6[%c0_18, %c0_19] : memref<1x64xf32, #tpu.memory_space<vmem>>, vector<1x64xf32>
      %38 = vector.broadcast %37 : vector<1x64xf32> to vector<64x64xf32>
      %39 = arith.addf %36, %38 : vector<64x64xf32>
      %cst_20 = arith.constant 0.000000e+00 : f32
      %40 = vector.broadcast %cst_20 : f32 to vector<64x64xf32>
      %41 = arith.maximumf %39, %40 : vector<64x64xf32>
      %42 = math.absf %39 : vector<64x64xf32>
      %cst_21 = arith.constant 0.000000e+00 : f32
      %43 = vector.broadcast %cst_21 : f32 to vector<64x64xf32>
      %44 = arith.subf %43, %42 : vector<64x64xf32>
      %45 = math.exp %44 : vector<64x64xf32>
      %cst_22 = arith.constant 1.000000e+00 : f32
      %46 = vector.broadcast %cst_22 : f32 to vector<64x64xf32>
      %47 = arith.addf %46, %45 : vector<64x64xf32>
      %48 = math.log %47 : vector<64x64xf32>
      %49 = arith.addf %41, %48 : vector<64x64xf32>
      %c0_23 = arith.constant 0 : index
      %c0_24 = arith.constant 0 : index
      %50 = vector.load %arg7[%c0_23, %c0_24] : memref<64x16xf32, #tpu.memory_space<vmem>>, vector<64x16xf32>
      %cst_25 = arith.constant dense<0.000000e+00> : vector<64x16xf32>
      %51 = tpu.matmul %49, %50, %cst_25 {dimension_numbers = #tpu.dot_dimension_numbers<[1], [0], [0], [1], [0, 0, 1, 1], [], []>} : vector<64x64xf32>, vector<64x16xf32>, vector<64x16xf32> -> vector<64x16xf32>
      %c0_26 = arith.constant 0 : index
      %c0_27 = arith.constant 0 : index
      %52 = vector.load %arg8[%c0_26, %c0_27] : memref<1x16xf32, #tpu.memory_space<vmem>>, vector<1x16xf32>
      %53 = vector.broadcast %52 : vector<1x16xf32> to vector<64x16xf32>
      %54 = arith.addf %51, %53 : vector<64x16xf32>
      %cst_28 = arith.constant dense<0.000000e+00> : vector<16xf32>
      %55 = vector.multi_reduction <add>, %54, %cst_28 [0] : vector<64x16xf32> to vector<16xf32>
      %56 = vector.shape_cast %55 : vector<16xf32> to vector<1x16xf32>
      %cst_29 = arith.constant 6.400000e+01 : f32
      %57 = vector.broadcast %cst_29 : f32 to vector<1x16xf32>
      %58 = arith.divf %56, %57 : vector<1x16xf32>
      %59 = vector.broadcast %58 : vector<1x16xf32> to vector<64x16xf32>
      %60 = arith.subf %54, %59 : vector<64x16xf32>
      %61 = arith.mulf %60, %60 : vector<64x16xf32>
      %cst_30 = arith.constant dense<0.000000e+00> : vector<16xf32>
      %62 = vector.multi_reduction <add>, %61, %cst_30 [0] : vector<64x16xf32> to vector<16xf32>
      %63 = vector.shape_cast %62 : vector<16xf32> to vector<1x16xf32>
      %cst_31 = arith.constant 6.400000e+01 : f32
      %64 = vector.broadcast %cst_31 : f32 to vector<1x16xf32>
      %65 = arith.divf %63, %64 : vector<1x16xf32>
      %cst_32 = arith.constant 9.99999974E-6 : f32
      %66 = vector.broadcast %cst_32 : f32 to vector<1x16xf32>
      %67 = arith.addf %65, %66 : vector<1x16xf32>
      %68 = math.rsqrt %67 : vector<1x16xf32>
      %69 = vector.broadcast %68 : vector<1x16xf32> to vector<64x16xf32>
      %70 = arith.mulf %60, %69 : vector<64x16xf32>
      %cst_33 = arith.constant dense<0xFF800000> : vector<64xf32>
      %71 = vector.multi_reduction <maximumf>, %70, %cst_33 [1] : vector<64x16xf32> to vector<64xf32>
      %72 = vector.shape_cast %71 : vector<64xf32> to vector<64x1xf32>
      %73 = vector.broadcast %72 : vector<64x1xf32> to vector<64x16xf32>
      %74 = arith.subf %70, %73 : vector<64x16xf32>
      %75 = math.exp %74 : vector<64x16xf32>
      %cst_34 = arith.constant dense<0.000000e+00> : vector<64xf32>
      %76 = vector.multi_reduction <add>, %75, %cst_34 [1] : vector<64x16xf32> to vector<64xf32>
      %77 = vector.shape_cast %76 : vector<64xf32> to vector<64x1xf32>
      %78 = vector.broadcast %77 : vector<64x1xf32> to vector<64x16xf32>
      %79 = arith.divf %75, %78 : vector<64x16xf32>
      %80 = tpu.iota {dimensions = array<i32: 1>} : vector<64x16xi32>
      %cst_35 = arith.constant dense<0xFF800000> : vector<64xf32>
      %81 = vector.multi_reduction <maximumf>, %70, %cst_35 [1] : vector<64x16xf32> to vector<64xf32>
      %82 = vector.shape_cast %81 : vector<64xf32> to vector<64x1xf32>
      %83 = vector.broadcast %82 : vector<64x1xf32> to vector<64x16xf32>
      %84 = arith.cmpf oeq, %70, %83 : vector<64x16xf32>
      %c16_i32 = arith.constant 16 : i32
      %85 = vector.broadcast %c16_i32 : i32 to vector<64x16xi32>
      %86 = arith.select %84, %80, %85 : vector<64x16xi1>, vector<64x16xi32>
      %cst_36 = arith.constant dense<2147483647> : vector<64xi32>
      %87 = vector.multi_reduction <minsi>, %86, %cst_36 [1] : vector<64x16xi32> to vector<64xi32>
      %88 = vector.shape_cast %87 : vector<64xi32> to vector<64x1xi32>
      %89 = vector.broadcast %88 : vector<64x1xi32> to vector<64x16xi32>
      %90 = arith.cmpi eq, %80, %89 : vector<64x16xi32>
      %91 = arith.extui %90 : vector<64x16xi1> to vector<64x16xi32>
      %92 = arith.sitofp %91 : vector<64x16xi32> to vector<64x16xf32>
      %93 = arith.subf %92, %79 : vector<64x16xf32>
      %94 = arith.mulf %93, %93 : vector<64x16xf32>
      %95 = vector.shape_cast %94 : vector<64x16xf32> to vector<1x64x16xf32>
      %cst_37 = arith.constant dense<0.000000e+00> : vector<1xf32>
      %96 = vector.multi_reduction <add>, %95, %cst_37 [1, 2] : vector<1x64x16xf32> to vector<1xf32>
      %97 = vector.shape_cast %96 : vector<1xf32> to vector<1x1x1xf32>
      %98 = vector.extract %97[0, 0, 0] : f32 from vector<1x1x1xf32>
      %99 = vector.broadcast %98 : f32 to vector<1x1xf32>
      %cst_38 = arith.constant 1.250000e+00 : f32
      %100 = vector.broadcast %cst_38 : f32 to vector<1x1xf32>
      %101 = arith.mulf %100, %99 : vector<1x1xf32>
      %cst_39 = arith.constant 1.024000e+03 : f32
      %102 = vector.broadcast %cst_39 : f32 to vector<1x1xf32>
      %103 = arith.divf %101, %102 : vector<1x1xf32>
      %c0_40 = arith.constant 0 : index
      %c0_41 = arith.constant 0 : index
      %104 = vector.load %arg13[%c0_40, %c0_41] : memref<64x16xf32, #tpu.memory_space<vmem>>, vector<64x16xf32>
      tpu.vector_store %arg13[%c0_40, %c0_41], %92 {strides = array<i32>} : memref<64x16xf32, #tpu.memory_space<vmem>>, vector<64x16xf32>,
      %cst_42 = arith.constant dense<0.000000e+00> : vector<16xf32>
      %105 = vector.multi_reduction <add>, %92, %cst_42 [0] : vector<64x16xf32> to vector<16xf32>
      %106 = vector.shape_cast %105 : vector<16xf32> to vector<1x16xf32>
      %c0_43 = arith.constant 0 : index
      %c0_44 = arith.constant 0 : index
      %107 = vector.load %arg14[%c0_43, %c0_44] : memref<1x16xf32, #tpu.memory_space<vmem>>, vector<1x16xf32>
      tpu.vector_store %arg14[%c0_43, %c0_44], %106 {strides = array<i32>} : memref<1x16xf32, #tpu.memory_space<vmem>>, vector<1x16xf32>,
      %108 = arith.mulf %70, %70 : vector<64x16xf32>
      %cst_45 = arith.constant dense<0.000000e+00> : vector<64xf32>
      %109 = vector.multi_reduction <add>, %108, %cst_45 [1] : vector<64x16xf32> to vector<64xf32>
      %110 = vector.shape_cast %109 : vector<64xf32> to vector<64x1xf32>
      %cst_46 = arith.constant 1.000000e-24 : f32
      %111 = vector.broadcast %cst_46 : f32 to vector<64x1xf32>
      %112 = arith.maximumf %110, %111 : vector<64x1xf32>
      %113 = math.rsqrt %112 : vector<64x1xf32>
      %114 = vector.broadcast %113 : vector<64x1xf32> to vector<64x16xf32>
      %115 = arith.mulf %70, %114 : vector<64x16xf32>
      %cst_47 = arith.constant 2.000000e+00 : f32
      %116 = vector.broadcast %cst_47 : f32 to vector<64x16xf32>
      %117 = arith.mulf %115, %116 : vector<64x16xf32>
      %cst_48 = arith.constant 0.000000e+00 : f32
      %118 = vector.broadcast %cst_48 : f32 to vector<1x1xf32>
      %119 = vector.extract_strided_slice %117 {offsets = [0, 0], sizes = [32, 16], strides = [1, 1]} : vector<64x16xf32> to vector<32x16xf32>
      %120 = vector.extract_strided_slice %92 {offsets = [0, 0], sizes = [32, 16], strides = [1, 1]} : vector<64x16xf32> to vector<32x16xf32>
      %cst_49 = arith.constant dense<0.000000e+00> : vector<32x64xf32>
      %121 = tpu.matmul %119, %115, %cst_49 {dimension_numbers = #tpu.dot_dimension_numbers<[1], [1], [0], [0], [0, 0, 1, 0], [], []>} : vector<32x16xf32>, vector<64x16xf32>, vector<32x64xf32> -> vector<32x64xf32>
      %cst_50 = arith.constant 2.000000e+00 : f32
      %122 = vector.broadcast %cst_50 : f32 to vector<32x64xf32>
      %123 = arith.subf %121, %122 : vector<32x64xf32>
      %124 = tpu.iota {dimensions = array<i32: 0>} : vector<32x64xi32>
      %c0_i32_51 = arith.constant 0 : i32
      %125 = vector.broadcast %c0_i32_51 : i32 to vector<32x64xi32>
      %126 = arith.addi %124, %125 : vector<32x64xi32>
      %127 = tpu.iota {dimensions = array<i32: 1>} : vector<32x64xi32>
      %128 = arith.cmpi ne, %126, %127 : vector<32x64xi32>
      %cst_52 = arith.constant dense<0.000000e+00> : vector<32x64xf32>
      %129 = tpu.matmul %120, %92, %cst_52 {dimension_numbers = #tpu.dot_dimension_numbers<[1], [1], [0], [0], [0, 0, 1, 0], [], []>} : vector<32x16xf32>, vector<64x16xf32>, vector<32x64xf32> -> vector<32x64xf32>
      %cst_53 = arith.constant 0.000000e+00 : f32
      %130 = vector.broadcast %cst_53 : f32 to vector<32x64xf32>
      %131 = arith.select %128, %129, %130 : vector<32x64xi1>, vector<32x64xf32>
      %132 = math.exp %123 : vector<32x64xf32>
      %cst_54 = arith.constant 0.000000e+00 : f32
      %133 = vector.broadcast %cst_54 : f32 to vector<32x64xf32>
      %134 = arith.select %128, %132, %133 : vector<32x64xi1>, vector<32x64xf32>
      %cst_55 = arith.constant dense<0.000000e+00> : vector<32xf32>
      %135 = vector.multi_reduction <add>, %134, %cst_55 [1] : vector<32x64xf32> to vector<32xf32>
      %136 = vector.shape_cast %135 : vector<32xf32> to vector<32x1xf32>
      %cst_56 = arith.constant 1.000000e-30 : f32
      %137 = vector.broadcast %cst_56 : f32 to vector<32x1xf32>
      %138 = arith.maximumf %136, %137 : vector<32x1xf32>
      %139 = math.log %138 : vector<32x1xf32>
      %cst_57 = arith.constant dense<0.000000e+00> : vector<32xf32>
      %140 = vector.multi_reduction <add>, %131, %cst_57 [1] : vector<32x64xf32> to vector<32xf32>
      %141 = vector.shape_cast %140 : vector<32xf32> to vector<32x1xf32>
      %142 = arith.mulf %131, %123 : vector<32x64xf32>
      %cst_58 = arith.constant dense<0.000000e+00> : vector<32xf32>
      %143 = vector.multi_reduction <add>, %142, %cst_58 [1] : vector<32x64xf32> to vector<32xf32>
      %144 = vector.shape_cast %143 : vector<32xf32> to vector<32x1xf32>
      %145 = arith.mulf %141, %139 : vector<32x1xf32>
      %146 = arith.subf %144, %145 : vector<32x1xf32>
      %cst_59 = arith.constant 1.000000e+00 : f32
      %147 = vector.broadcast %cst_59 : f32 to vector<32x1xf32>
      %148 = arith.maximumf %141, %147 : vector<32x1xf32>
      %149 = arith.divf %146, %148 : vector<32x1xf32>
      %150 = vector.shape_cast %149 : vector<32x1xf32> to vector<1x32x1xf32>
      %cst_60 = arith.constant dense<0.000000e+00> : vector<1xf32>
      %151 = vector.multi_reduction <add>, %150, %cst_60 [1, 2] : vector<1x32x1xf32> to vector<1xf32>
      %152 = vector.shape_cast %151 : vector<1xf32> to vector<1x1x1xf32>
      %153 = vector.extract %152[0, 0, 0] : f32 from vector<1x1x1xf32>
      %154 = vector.broadcast %153 : f32 to vector<1x1xf32>
      %155 = arith.subf %118, %154 : vector<1x1xf32>
      %156 = vector.extract_strided_slice %117 {offsets = [32, 0], sizes = [32, 16], strides = [1, 1]} : vector<64x16xf32> to vector<32x16xf32>
      %157 = vector.extract_strided_slice %92 {offsets = [32, 0], sizes = [32, 16], strides = [1, 1]} : vector<64x16xf32> to vector<32x16xf32>
      %cst_61 = arith.constant dense<0.000000e+00> : vector<32x64xf32>
      %158 = tpu.matmul %156, %115, %cst_61 {dimension_numbers = #tpu.dot_dimension_numbers<[1], [1], [0], [0], [0, 0, 1, 0], [], []>} : vector<32x16xf32>, vector<64x16xf32>, vector<32x64xf32> -> vector<32x64xf32>
      %cst_62 = arith.constant 2.000000e+00 : f32
      %159 = vector.broadcast %cst_62 : f32 to vector<32x64xf32>
      %160 = arith.subf %158, %159 : vector<32x64xf32>
      %161 = tpu.iota {dimensions = array<i32: 0>} : vector<32x64xi32>
      %c32_i32 = arith.constant 32 : i32
      %162 = vector.broadcast %c32_i32 : i32 to vector<32x64xi32>
      %163 = arith.addi %161, %162 : vector<32x64xi32>
      %164 = tpu.iota {dimensions = array<i32: 1>} : vector<32x64xi32>
      %165 = arith.cmpi ne, %163, %164 : vector<32x64xi32>
      %cst_63 = arith.constant dense<0.000000e+00> : vector<32x64xf32>
      %166 = tpu.matmul %157, %92, %cst_63 {dimension_numbers = #tpu.dot_dimension_numbers<[1], [1], [0], [0], [0, 0, 1, 0], [], []>} : vector<32x16xf32>, vector<64x16xf32>, vector<32x64xf32> -> vector<32x64xf32>
      %cst_64 = arith.constant 0.000000e+00 : f32
      %167 = vector.broadcast %cst_64 : f32 to vector<32x64xf32>
      %168 = arith.select %165, %166, %167 : vector<32x64xi1>, vector<32x64xf32>
      %169 = math.exp %160 : vector<32x64xf32>
      %cst_65 = arith.constant 0.000000e+00 : f32
      %170 = vector.broadcast %cst_65 : f32 to vector<32x64xf32>
      %171 = arith.select %165, %169, %170 : vector<32x64xi1>, vector<32x64xf32>
      %cst_66 = arith.constant dense<0.000000e+00> : vector<32xf32>
      %172 = vector.multi_reduction <add>, %171, %cst_66 [1] : vector<32x64xf32> to vector<32xf32>
      %173 = vector.shape_cast %172 : vector<32xf32> to vector<32x1xf32>
      %cst_67 = arith.constant 1.000000e-30 : f32
      %174 = vector.broadcast %cst_67 : f32 to vector<32x1xf32>
      %175 = arith.maximumf %173, %174 : vector<32x1xf32>
      %176 = math.log %175 : vector<32x1xf32>
      %cst_68 = arith.constant dense<0.000000e+00> : vector<32xf32>
      %177 = vector.multi_reduction <add>, %168, %cst_68 [1] : vector<32x64xf32> to vector<32xf32>
      %178 = vector.shape_cast %177 : vector<32xf32> to vector<32x1xf32>
      %179 = arith.mulf %168, %160 : vector<32x64xf32>
      %cst_69 = arith.constant dense<0.000000e+00> : vector<32xf32>
      %180 = vector.multi_reduction <add>, %179, %cst_69 [1] : vector<32x64xf32> to vector<32xf32>
      %181 = vector.shape_cast %180 : vector<32xf32> to vector<32x1xf32>
      %182 = arith.mulf %178, %176 : vector<32x1xf32>
      %183 = arith.subf %181, %182 : vector<32x1xf32>
      %cst_70 = arith.constant 1.000000e+00 : f32
      %184 = vector.broadcast %cst_70 : f32 to vector<32x1xf32>
      %185 = arith.maximumf %178, %184 : vector<32x1xf32>
      %186 = arith.divf %183, %185 : vector<32x1xf32>
      %187 = vector.shape_cast %186 : vector<32x1xf32> to vector<1x32x1xf32>
      %cst_71 = arith.constant dense<0.000000e+00> : vector<1xf32>
      %188 = vector.multi_reduction <add>, %187, %cst_71 [1, 2] : vector<1x32x1xf32> to vector<1xf32>
      %189 = vector.shape_cast %188 : vector<1xf32> to vector<1x1x1xf32>
      %190 = vector.extract %189[0, 0, 0] : f32 from vector<1x1x1xf32>
      %191 = vector.broadcast %190 : f32 to vector<1x1xf32>
      %192 = arith.subf %155, %191 : vector<1x1xf32>
      %cst_72 = arith.constant 1.000000e+00 : f32
      %193 = vector.broadcast %cst_72 : f32 to vector<1x1xf32>
      %194 = arith.mulf %193, %192 : vector<1x1xf32>
      %cst_73 = arith.constant 1.562500e-02 : f32
      %195 = vector.broadcast %cst_73 : f32 to vector<1x1xf32>
      %196 = arith.mulf %194, %195 : vector<1x1xf32>
      %197 = arith.addf %103, %196 : vector<1x1xf32>
      %c0_74 = arith.constant 0 : index
      %c0_75 = arith.constant 0 : index
      %198 = vector.load %arg19[%c0_74, %c0_75] : memref<1x1xf32, #tpu.memory_space<vmem>>, vector<1x1xf32>
      tpu.vector_store %arg19[%c0_74, %c0_75], %197 {strides = array<i32>} : memref<1x1xf32, #tpu.memory_space<vmem>>, vector<1x1xf32>,
      %c0_76 = arith.constant 0 : index
      %c0_77 = arith.constant 0 : index
      %199 = vector.load %arg20[%c0_76, %c0_77] : memref<1x1xf32, #tpu.memory_space<vmem>>, vector<1x1xf32>
      tpu.vector_store %arg20[%c0_76, %c0_77], %196 {strides = array<i32>} : memref<1x1xf32, #tpu.memory_space<vmem>>, vector<1x1xf32>,
      %cst_78 = arith.constant 0xFF800000 : f32
      %200 = vector.broadcast %cst_78 : f32 to vector<16x1xf32>
      %c0_79 = arith.constant 0 : index
      %c0_80 = arith.constant 0 : index
      %201 = vector.load %arg15[%c0_79, %c0_80] : memref<16x1xf32, #tpu.memory_space<vmem>>, vector<16x1xf32>
      tpu.vector_store %arg15[%c0_79, %c0_80], %200 {strides = array<i32>} : memref<16x1xf32, #tpu.memory_space<vmem>>, vector<16x1xf32>,
      %cst_81 = arith.constant 0.000000e+00 : f32
      %202 = vector.broadcast %cst_81 : f32 to vector<16x1xf32>
      %c0_82 = arith.constant 0 : index
      %c0_83 = arith.constant 0 : index
      %203 = vector.load %arg16[%c0_82, %c0_83] : memref<16x1xf32, #tpu.memory_space<vmem>>, vector<16x1xf32>
      tpu.vector_store %arg16[%c0_82, %c0_83], %202 {strides = array<i32>} : memref<16x1xf32, #tpu.memory_space<vmem>>, vector<16x1xf32>,
      %cst_84 = arith.constant 0.000000e+00 : f32
      %204 = vector.broadcast %cst_84 : f32 to vector<16x1xf32>
      %c0_85 = arith.constant 0 : index
      %c0_86 = arith.constant 0 : index
      %205 = vector.load %arg17[%c0_85, %c0_86] : memref<16x1xf32, #tpu.memory_space<vmem>>, vector<16x1xf32>
      tpu.vector_store %arg17[%c0_85, %c0_86], %204 {strides = array<i32>} : memref<16x1xf32, #tpu.memory_space<vmem>>, vector<16x1xf32>,
      %cst_87 = arith.constant 0.000000e+00 : f32
      %206 = vector.broadcast %cst_87 : f32 to vector<1x1xf32>
      %c0_88 = arith.constant 0 : index
      %c0_89 = arith.constant 0 : index
      %207 = vector.load %arg18[%c0_88, %c0_89] : memref<1x1xf32, #tpu.memory_space<vmem>>, vector<1x1xf32>
      tpu.vector_store %arg18[%c0_88, %c0_89], %206 {strides = array<i32>} : memref<1x1xf32, #tpu.memory_space<vmem>>, vector<1x1xf32>,
    } else {
    }
    %c1_i32_6 = arith.constant 1 : i32
    %13 = arith.cmpi eq, %arg0, %c1_i32_6 : i32
    %14 = arith.extui %13 : i1 to i32
    %c0_i32_7 = arith.constant 0 : i32
    %15 = arith.cmpi ne, %14, %c0_i32_7 : i32
    scf.if %15 {
      %c0 = arith.constant 0 : index
      %c0_10 = arith.constant 0 : index
      %21 = vector.load %arg2[%c0, %c0_10] : memref<64x256xf32, #tpu.memory_space<vmem>>, vector<64x256xf32>
      %c0_11 = arith.constant 0 : index
      %c0_12 = arith.constant 0 : index
      %22 = vector.load %arg9[%c0_11, %c0_12] : memref<16x256xbf16, #tpu.memory_space<vmem>>, vector<16x256xbf16>
      %23 = arith.extf %22 : vector<16x256xbf16> to vector<16x256xf32>
      %c0_13 = arith.constant 0 : index
      %c0_14 = arith.constant 0 : index
      %24 = vector.load %arg14[%c0_13, %c0_14] : memref<1x16xf32, #tpu.memory_space<vmem>>, vector<1x16xf32>
      %cst = arith.constant 1.562500e-02 : f32
      %25 = vector.broadcast %cst : f32 to vector<1x16xf32>
      %26 = arith.mulf %24, %25 : vector<1x16xf32>
      %cst_15 = arith.constant dense<0.000000e+00> : vector<1x256xf32>
      %27 = tpu.matmul %26, %23, %cst_15 {dimension_numbers = #tpu.dot_dimension_numbers<[1], [0], [0], [1], [0, 0, 1, 1], [], []>} : vector<1x16xf32>, vector<16x256xf32>, vector<1x256xf32> -> vector<1x256xf32>
      %28 = vector.broadcast %27 : vector<1x256xf32> to vector<16x256xf32>
      %29 = arith.subf %23, %28 : vector<16x256xf32>
      %30 = arith.mulf %29, %29 : vector<16x256xf32>
      %cst_16 = arith.constant dense<0.000000e+00> : vector<1x256xf32>
      %31 = tpu.matmul %26, %30, %cst_16 {dimension_numbers = #tpu.dot_dimension_numbers<[1], [0], [0], [1], [0, 0, 1, 1], [], []>} : vector<1x16xf32>, vector<16x256xf32>, vector<1x256xf32> -> vector<1x256xf32>
      %cst_17 = arith.constant 9.99999974E-6 : f32
      %32 = vector.broadcast %cst_17 : f32 to vector<1x256xf32>
      %33 = arith.addf %31, %32 : vector<1x256xf32>
      %34 = math.rsqrt %33 : vector<1x256xf32>
      %35 = vector.broadcast %34 : vector<1x256xf32> to vector<16x256xf32>
      %36 = arith.mulf %29, %35 : vector<16x256xf32>
      %c0_18 = arith.constant 0 : index
      %c0_19 = arith.constant 0 : index
      %37 = vector.load %arg13[%c0_18, %c0_19] : memref<64x16xf32, #tpu.memory_space<vmem>>, vector<64x16xf32>
      %cst_20 = arith.constant dense<0.000000e+00> : vector<16x256xf32>
      %38 = tpu.matmul %37, %21, %cst_20 {dimension_numbers = #tpu.dot_dimension_numbers<[0], [0], [1], [1], [0, 1, 1, 1], [], []>} : vector<64x16xf32>, vector<64x256xf32>, vector<16x256xf32> -> vector<16x256xf32>
      %c0_21 = arith.constant 0 : index
      %c0_22 = arith.constant 0 : index
      %39 = vector.load %arg18[%c0_21, %c0_22] : memref<1x1xf32, #tpu.memory_space<vmem>>, vector<1x1xf32>
      %40 = arith.mulf %38, %36 : vector<16x256xf32>
      %41 = vector.shape_cast %40 : vector<16x256xf32> to vector<1x16x256xf32>
      %cst_23 = arith.constant dense<0.000000e+00> : vector<1xf32>
      %42 = vector.multi_reduction <add>, %41, %cst_23 [1, 2] : vector<1x16x256xf32> to vector<1xf32>
      %43 = vector.shape_cast %42 : vector<1xf32> to vector<1x1x1xf32>
      %44 = vector.extract %43[0, 0, 0] : f32 from vector<1x1x1xf32>
      %45 = vector.broadcast %44 : f32 to vector<1x1xf32>
      %46 = arith.addf %39, %45 : vector<1x1xf32>
      %c0_24 = arith.constant 0 : index
      %c0_25 = arith.constant 0 : index
      %47 = vector.load %arg18[%c0_24, %c0_25] : memref<1x1xf32, #tpu.memory_space<vmem>>, vector<1x1xf32>
      tpu.vector_store %arg18[%c0_24, %c0_25], %46 {strides = array<i32>} : memref<1x1xf32, #tpu.memory_space<vmem>>, vector<1x1xf32>,
      %c0_26 = arith.constant 0 : index
      %c0_27 = arith.constant 0 : index
      %48 = vector.load %arg17[%c0_26, %c0_27] : memref<16x1xf32, #tpu.memory_space<vmem>>, vector<16x1xf32>
      %cst_28 = arith.constant dense<0.000000e+00> : vector<16xf32>
      %49 = vector.multi_reduction <add>, %38, %cst_28 [1] : vector<16x256xf32> to vector<16xf32>
      %50 = vector.shape_cast %49 : vector<16xf32> to vector<16x1xf32>
      %51 = arith.addf %48, %50 : vector<16x1xf32>
      %c0_29 = arith.constant 0 : index
      %c0_30 = arith.constant 0 : index
      %52 = vector.load %arg17[%c0_29, %c0_30] : memref<16x1xf32, #tpu.memory_space<vmem>>, vector<16x1xf32>
      tpu.vector_store %arg17[%c0_29, %c0_30], %51 {strides = array<i32>} : memref<16x1xf32, #tpu.memory_space<vmem>>, vector<16x1xf32>,
      %cst_31 = arith.constant dense<0xFF800000> : vector<16xf32>
      %53 = vector.multi_reduction <maximumf>, %36, %cst_31 [1] : vector<16x256xf32> to vector<16xf32>
      %54 = vector.shape_cast %53 : vector<16xf32> to vector<16x1xf32>
      %c0_32 = arith.constant 0 : index
      %c0_33 = arith.constant 0 : index
      %55 = vector.load %arg15[%c0_32, %c0_33] : memref<16x1xf32, #tpu.memory_space<vmem>>, vector<16x1xf32>
      %56 = arith.maximumf %55, %54 : vector<16x1xf32>
      %c0_34 = arith.constant 0 : index
      %c0_35 = arith.constant 0 : index
      %57 = vector.load %arg16[%c0_34, %c0_35] : memref<16x1xf32, #tpu.memory_space<vmem>>, vector<16x1xf32>
      %c0_36 = arith.constant 0 : index
      %c0_37 = arith.constant 0 : index
      %58 = vector.load %arg15[%c0_36, %c0_37] : memref<16x1xf32, #tpu.memory_space<vmem>>, vector<16x1xf32>
      %59 = arith.subf %58, %56 : vector<16x1xf32>
      %60 = math.exp %59 : vector<16x1xf32>
      %61 = arith.mulf %57, %60 : vector<16x1xf32>
      %62 = vector.broadcast %56 : vector<16x1xf32> to vector<16x256xf32>
      %63 = arith.subf %36, %62 : vector<16x256xf32>
      %64 = math.exp %63 : vector<16x256xf32>
      %cst_38 = arith.constant dense<0.000000e+00> : vector<16xf32>
      %65 = vector.multi_reduction <add>, %64, %cst_38 [1] : vector<16x256xf32> to vector<16xf32>
      %66 = vector.shape_cast %65 : vector<16xf32> to vector<16x1xf32>
      %67 = arith.addf %61, %66 : vector<16x1xf32>
      %c0_39 = arith.constant 0 : index
      %c0_40 = arith.constant 0 : index
      %68 = vector.load %arg16[%c0_39, %c0_40] : memref<16x1xf32, #tpu.memory_space<vmem>>, vector<16x1xf32>
      tpu.vector_store %arg16[%c0_39, %c0_40], %67 {strides = array<i32>} : memref<16x1xf32, #tpu.memory_space<vmem>>, vector<16x1xf32>,
      %c0_41 = arith.constant 0 : index
      %c0_42 = arith.constant 0 : index
      %69 = vector.load %arg15[%c0_41, %c0_42] : memref<16x1xf32, #tpu.memory_space<vmem>>, vector<16x1xf32>
      tpu.vector_store %arg15[%c0_41, %c0_42], %56 {strides = array<i32>} : memref<16x1xf32, #tpu.memory_space<vmem>>, vector<16x1xf32>,
    } else {
    }
    %c1_i32_8 = arith.constant 1 : i32
    %16 = arith.cmpi eq, %arg0, %c1_i32_8 : i32
    %c3_i32 = arith.constant 3 : i32
    %17 = arith.cmpi eq, %arg1, %c3_i32 : i32
    %18 = arith.andi %16, %17 : i1
    %19 = arith.extui %18 : i1 to i32
    %c0_i32_9 = arith.constant 0 : i32
    %20 = arith.cmpi ne, %19, %c0_i32_9 : i32
    scf.if %20 {
      %c0 = arith.constant 0 : index
      %c0_10 = arith.constant 0 : index
      %21 = vector.load %arg15[%c0, %c0_10] : memref<16x1xf32, #tpu.memory_space<vmem>>, vector<16x1xf32>
      %c0_11 = arith.constant 0 : index
      %c0_12 = arith.constant 0 : index
      %22 = vector.load %arg16[%c0_11, %c0_12] : memref<16x1xf32, #tpu.memory_space<vmem>>, vector<16x1xf32>
      %23 = math.log %22 : vector<16x1xf32>
      %24 = arith.addf %21, %23 : vector<16x1xf32>
      %c0_13 = arith.constant 0 : index
      %c0_14 = arith.constant 0 : index
      %25 = vector.load %arg17[%c0_13, %c0_14] : memref<16x1xf32, #tpu.memory_space<vmem>>, vector<16x1xf32>
      %26 = arith.mulf %25, %24 : vector<16x1xf32>
      %27 = vector.shape_cast %26 : vector<16x1xf32> to vector<1x16x1xf32>
      %cst = arith.constant dense<0.000000e+00> : vector<1xf32>
      %28 = vector.multi_reduction <add>, %27, %cst [1, 2] : vector<1x16x1xf32> to vector<1xf32>
      %29 = vector.shape_cast %28 : vector<1xf32> to vector<1x1x1xf32>
      %30 = vector.extract %29[0, 0, 0] : f32 from vector<1x1x1xf32>
      %31 = vector.broadcast %30 : f32 to vector<1x1xf32>
      %c0_15 = arith.constant 0 : index
      %c0_16 = arith.constant 0 : index
      %32 = vector.load %arg18[%c0_15, %c0_16] : memref<1x1xf32, #tpu.memory_space<vmem>>, vector<1x1xf32>
      %33 = arith.subf %31, %32 : vector<1x1xf32>
      %cst_17 = arith.constant 1.562500e-02 : f32
      %34 = vector.broadcast %cst_17 : f32 to vector<1x1xf32>
      %35 = arith.mulf %33, %34 : vector<1x1xf32>
      %c0_18 = arith.constant 0 : index
      %c0_19 = arith.constant 0 : index
      %36 = vector.load %arg19[%c0_18, %c0_19] : memref<1x1xf32, #tpu.memory_space<vmem>>, vector<1x1xf32>
      %37 = arith.addf %35, %36 : vector<1x1xf32>
      %c0_20 = arith.constant 0 : index
      %c0_21 = arith.constant 0 : index
      %38 = vector.load %arg10[%c0_20, %c0_21] : memref<1x1xf32, #tpu.memory_space<vmem>>, vector<1x1xf32>
      tpu.vector_store %arg10[%c0_20, %c0_21], %37 {strides = array<i32>} : memref<1x1xf32, #tpu.memory_space<vmem>>, vector<1x1xf32>,
      %c0_22 = arith.constant 0 : index
      %c0_23 = arith.constant 0 : index
      %39 = vector.load %arg20[%c0_22, %c0_23] : memref<1x1xf32, #tpu.memory_space<vmem>>, vector<1x1xf32>
      %c0_24 = arith.constant 0 : index
      %c0_25 = arith.constant 0 : index
      %40 = vector.load %arg11[%c0_24, %c0_25] : memref<1x1xf32, #tpu.memory_space<vmem>>, vector<1x1xf32>
      tpu.vector_store %arg11[%c0_24, %c0_25], %39 {strides = array<i32>} : memref<1x1xf32, #tpu.memory_space<vmem>>, vector<1x1xf32>,
    } else {
    }
    return
  }
  func.func @transform_0(%arg0: i32, %arg1: i32) -> (i32, i32) {
    %c0_i32 = arith.constant 0 : i32
    %c0_i32_0 = arith.constant 0 : i32
    return %c0_i32, %arg1 : i32, i32
  }
  func.func @transform_1(%arg0: i32, %arg1: i32) -> (i32, i32) {
    %c1_i32 = arith.constant 1 : i32
    %0 = arith.subi %c1_i32, %arg0 : i32
    %1 = arith.muli %arg1, %0 : i32
    %c3_i32 = arith.constant 3 : i32
    %2 = arith.muli %c3_i32, %arg0 : i32
    %3 = arith.addi %1, %2 : i32
    %c0_i32 = arith.constant 0 : i32
    %c0_i32_0 = arith.constant 0 : i32
    return %c0_i32, %3 : i32, i32
  }
  func.func @transform_2(%arg0: i32, %arg1: i32) -> (i32, i32) {
    %c0_i32 = arith.constant 0 : i32
    %c0_i32_0 = arith.constant 0 : i32
    %c0_i32_1 = arith.constant 0 : i32
    return %c0_i32, %c0_i32_0 : i32, i32
  }
  func.func @transform_3(%arg0: i32, %arg1: i32) -> (i32, i32) {
    %c0_i32 = arith.constant 0 : i32
    %c0_i32_0 = arith.constant 0 : i32
    %c0_i32_1 = arith.constant 0 : i32
    return %c0_i32, %c0_i32_0 : i32, i32
  }
  func.func @transform_4(%arg0: i32, %arg1: i32) -> (i32, i32) {
    %c0_i32 = arith.constant 0 : i32
    %c0_i32_0 = arith.constant 0 : i32
    %c0_i32_1 = arith.constant 0 : i32
    return %c0_i32, %c0_i32_0 : i32, i32
  }
  func.func @transform_5(%arg0: i32, %arg1: i32) -> (i32, i32) {
    %c0_i32 = arith.constant 0 : i32
    %c0_i32_0 = arith.constant 0 : i32
    %c0_i32_1 = arith.constant 0 : i32
    return %c0_i32, %c0_i32_0 : i32, i32
  }
  func.func @transform_6(%arg0: i32, %arg1: i32) -> (i32, i32) {
    %c0_i32 = arith.constant 0 : i32
    %c0_i32_0 = arith.constant 0 : i32
    %c0_i32_1 = arith.constant 0 : i32
    return %c0_i32, %c0_i32_0 : i32, i32
  }
  func.func @transform_7(%arg0: i32, %arg1: i32) -> (i32, i32) {
    %0 = arith.muli %arg1, %arg0 : i32
    %c0_i32 = arith.constant 0 : i32
    %c0_i32_0 = arith.constant 0 : i32
    return %c0_i32, %0 : i32, i32
  }
  func.func @transform_8(%arg0: i32, %arg1: i32) -> (i32, i32) {
    %c0_i32 = arith.constant 0 : i32
    %c0_i32_0 = arith.constant 0 : i32
    %c0_i32_1 = arith.constant 0 : i32
    return %c0_i32, %c0_i32_0 : i32, i32
  }
  func.func @transform_9(%arg0: i32, %arg1: i32) -> (i32, i32) {
    %c0_i32 = arith.constant 0 : i32
    %c0_i32_0 = arith.constant 0 : i32
    %c0_i32_1 = arith.constant 0 : i32
    return %c0_i32, %c0_i32_0 : i32, i32
  }
}

</mosaic_0001>

<bundles_post_ra>
// kernel: tpu_custom_call.1
= control target key start
LH: loop header
LB: loop body
LE: loop exit
PB: predicated region body
PF: predicated region fallthrough
CT: control target
= control target key end

     0   :  { %s5048_s0 = inlined_call_operand.hbm [shape: f32[64,1024], index: 0, kind: input, shape index: {}]   ;;  %s5049_s1 = inlined_call_operand.hbm [shape: bf16[64,1024], index: 1, kind: input, shape index: {}]   ;;  %s5050_s2 = inlined_call_operand.vmem [shape: f32[1,64], index: 2, kind: input, shape index: {}]   ;;  %s5051_s3 = inlined_call_operand.vmem [shape: f32[64,64], index: 3, kind: input, shape index: {}]   ;;  %s5052_s4 = inlined_call_operand.vmem [shape: f32[1,64], index: 4, kind: input, shape index: {}]   ;;  %s5053_s5 = inlined_call_operand.vmem [shape: f32[64,16], index: 5, kind: input, shape index: {}]   ;;  %s5054_s6 = inlined_call_operand.vmem [shape: f32[1,16], index: 6, kind: input, shape index: {}]   ;;  %s5055_s7 = inlined_call_operand.hbm [shape: bf16[16,1024], index: 7, kind: input, shape index: {}]   ;;  %s5056_s8 = inlined_call_operand.hbm [shape: f32[1,1], index: 8, kind: output, shape index: {0}]   ;;  %s5057_s9 = inlined_call_operand.hbm [shape: f32[1,1], index: 9, kind: output, shape index: {1}]  }
   0x1   :  { %5069 = sst [smem:[#allocation32_spill]] %s5048_s0 }
   0x2   :  { %5070 = sst [smem:[#allocation33_spill]] %s5049_s1 }
   0x3   :  { %5071 = sst [smem:[#allocation34_spill]] %s5050_s2 }
   0x4   :  { %5072 = sst [smem:[#allocation35_spill]] %s5051_s3 }
   0x5   :  { %5073 = sst [smem:[#allocation36_spill]] %s5052_s4 }
   0x6   :  { %5074 = sst [smem:[#allocation37_spill]] %s5053_s5 }
   0x7   :  { %5075 = sst [smem:[#allocation38_spill]] %s5054_s6 }
   0x8   :  { %5076 = sst [smem:[#allocation39_spill]] %s5055_s7 }
   0x9   :  { %5077 = sst [smem:[#allocation40_spill]] %s5056_s8 }
   0xa   :  { %5078 = sst [smem:[#allocation41_spill]] %s5057_s9 }
   0xb   :  { %15 = vsyncpa [#allocation12], 0 }
   0xc   :  { %17 = vsyncpa [#allocation12 + $0x1], 0 }
   0xd   :  { %18 = vsyncpa [#allocation15], 0 }
   0xe   :  { %20 = vsyncpa [#allocation15 + $0x1], 0 }
   0xf   :  { %21 = vsyncpa [#allocation13], 0 }
  0x10   :  { %22 = vsyncpa [#allocation19], 0  ;;  %s3847_s30 = smov 0   ;;  %s3849_s10 = smov 0  }
  0x11   :  { %s3851_s11 = smov 0   ;;  %s3853_s12 = smov 0  }
  0x12   :  { %s3855_s13 = smov 0   ;;  %s3857_s14 = smov 0  }
  0x13   :  { %s3859_s15 = smov 0   ;;  %s3861_s16 = smov 0  }
  0x14   :  { %s3863_s17 = smov 0   ;;  %s3865_s18 = smov 0  }
  0x15   :  { %s3867_s19 = smov 0   ;;  %s3869_s20 = smov 0  }
  0x16   :  { %s3871_s21 = smov 0   ;;  %s3873_s22 = smov 0  }
  0x17 LB: > { %5079 = sst [smem:[#allocation25_spill]] %s3727_s30  ;;  %s3918_s23 = sadd.s32 4294967295, %s3779_s22   ;;  %s3779_s22 = sphi %s3873_s22, %s28_s22   ;;  %s3775_s21 = sphi %s3871_s21, %s5135_s21   ;;  %s3771_s20 = sphi %s3869_s20, %s5134_s20   ;;  %s3767_s19 = sphi %s3867_s19, %s5133_s19   ;;  %s3763_s18 = sphi %s3865_s18, %s5132_s18   ;;  %s3759_s17 = sphi %s3863_s17, %s5124_s17   ;;  %s3755_s16 = sphi %s3861_s16, %s5131_s16   ;;  %s3751_s15 = sphi %s3859_s15, %s5130_s15   ;;  %s3747_s14 = sphi %s3857_s14, %s5129_s14   ;;  %s3743_s13 = sphi %s3855_s13, %s5128_s13   ;;  %s3739_s12 = sphi %s3853_s12, %s5127_s12   ;;  %s3735_s11 = sphi %s3851_s11, %s5126_s11   ;;  %s3731_s10 = sphi %s3849_s10, %s5125_s10   ;;  %s3727_s30 = sphi %s3847_s30, %s5121_s30  }
  0x18   : > { %5080 = sst [smem:[#allocation26_spill]] %s3731_s10  ;;  %s37_s24 = sadd.s32 1, %s3771_s20 }
  0x19   : > { %5081 = sst [smem:[#allocation27_spill]] %s3759_s17  ;;  %p38_p0 = scmp.ge.s32.totalorder %s37_s24, 4 }
  0x1a   : > { %5082 = sst [smem:[#allocation28_spill]] %s3763_s18  ;;  %s40_s25 = sadd.s32 1, %s3775_s21 }
  0x1b   : > { %5083 = sst [smem:[#allocation29_spill]] %s3767_s19  ;;  %p55_p1 = scmp.eq.s32.totalorder %s3779_s22, 0 }
  0x1c   : > { %p5066_p2 = scmp.eq.s32.totalorder %s3918_s23, 0  ;;  %s5137_s24 = smov (%p38_p0, %s37_s24), 0 }
  0x1d   : > { %s5139_s25 = smov (!%p38_p0, %s40_s25), %s3775_s21  ;;  %s70_s26 = ssub.s32 1, %s3775_s21 }
  0x1e   : > { %s72_s27 = smul.u32 3, %s3775_s21  ;;  %p42_p3 = scmp.ge.s32.totalorder %s5139_s25, 2 }
  0x1f   : > { %s71_s28 = smul.u32 %s3771_s20, %s70_s26  ;;  %s81_s29 = sadd.s32 1, %s3747_s14 }
  0x20   : > { %p88_p4 = scmp.ne.s32.totalorder %s3747_s14, %s3743_s13  ;;  %s5141_s25 = smov (%p42_p3, %s5139_s25), 0 }
  0x21   : > { %s73_s9 = sadd.s32 %s72_s27, %s71_s28  ;;  %s74_s6 = ssub.s32 1, %s5141_s25 }
  0x22   : > { %p3937_p5 = por %p88_p4, %p55_p1  ;;  %s76_s4 = smul.u32 3, %s5141_s25 }
  0x23   : > { %s75_s5 = smul.u32 %s74_s6, %s5137_s24  ;;  %p94_p6 = scmp.ne.s32.totalorder %s3743_s13, %s3739_s12 }
  0x24   : > { %p3203_p7 = scmp.lt.s32.totalorder %s3779_s22, 8  ;;  %s329_s27 = sand.u32 1, %s3779_s22  }
  0x25   : > { %s77_s26 = sadd.s32 %s76_s4, %s75_s5  ;;  %p3949_p8 = por %p94_p6, %p5066_p2 }
  0x26   : > { %s78_s3 = ssub.s32 %s73_s9, %s77_s26  ;;  %s331_s28 = sand.u32 1, %s3747_s14  }
  0x27   : > { %p79_p9 = scmp.eq.s32.totalorder %s78_s3, 0  ;;  %s2927_s18 = sshll.u32 %s73_s9, 7 }
  0x28   : > { %s2821_s7 = sshll.u32 %s331_s28, 6  ;;  %s5087_s1 = sld [smem:[#allocation33_spill]] }
  0x29   : > { %s3956_s19 = scalar_select %p79_p9, %s3747_s14, %s81_s29  }
  0x2a   : > { %p3965_p10 = pnand %p3203_p7, %p3937_p5  ;;  %s333_s5 = scalar_lea.vmem [#allocation14], %s2821_s7 }
  0x2b   : > { %5086 = sst [smem:[#allocation30_spill]] %s3956_s19  ;;  %s344_s12 = sshll.u32 %s333_s5, 4  ;;  %s345_s12 = int_to_ptr.vmem [resolvable:$true] %s344_s12 }
  0x2c   : > { %s3969_s3 = scalar_lea.sflag [#allocation15], %s329_s27  ;;  %p3519_p11 = pneg %p3965_p10 }
  0x2d   : > { %s3530_s9 = scalar_lea.vmem %s345_s12, 1024  ;;  %s3781_s30 = smov [#allocation14]  }
  0x2e   : > { %s343_s6 = scalar_lea.hbm %s5087_s1, %s2927_s18  ;;  %p3531_p12 = scmp.ne.s32.totalorder %s345_s12, %s3530_s9 }
  0x2f   : > { %s3535_s10 = sshll.u32 %s3781_s30, 4  ;;  %s3536_s10 = int_to_ptr.vmem [resolvable:$false] %s3535_s10 }
  0x30   : > { %p3533_p13 = pnand %p3531_p12, %p3519_p11  ;;  %s3537_s8 = scalar_lea.vmem %s3536_s10, 2048 }
  0x31   : > { %p3538_p3 = scmp.lt.s32.totalorder %s345_s12, %s3536_s10  ;;  %p3539_p4 = scmp.lt.s32.totalorder %s3537_s8, %s3530_s9 }
  0x32   : > { %p3534_p0 = pneg %p3533_p13 }
  0x33   : > { %p3540_p5 = por %p3539_p4, %p3538_p3 }
  0x35   : > { %p3541_p6 = pnand %p3540_p5, %p3534_p0 }
  0x37   : > { %3544 = shalt.err (!%p3541_p6)
}
  0x38   : > { %s5063_s7 = smov 512   ;;  %s5064_s18 = smov 128  }
  0x39   : > { %s5065_s29 = smov 8   ;;  %p2827_p9 = scmp.ge.s32.totalorder %s3779_s22, 1 }
  0x3a   : > { %3199 = dma.hbm_to_vmem [thread:$0]  (!%p3965_p10), %s343_s6, 1024, %s345_s12, %s3969_s3, %s5063_s7, %s5064_s18, %s5065_s29  }
  0x3b   : > { %p374_p11 = scmp.lt.s32.totalorder %s3779_s22, 9  ;;  %s44_s27 = ssub.s32 %s3771_s20, %s5137_s24 }
  0x3c   : > { %p45_p13 = scmp.eq.s32.totalorder %s44_s27, 0  ;;  %s47_s28 = sadd.s32 1, %s3759_s17 }
  0x3d   : > { %p3981_p12 = pnand %p2827_p9, %p374_p11  ;;  %p54_p0 = scmp.ne.s32.totalorder %s3759_s17, %s3755_s16 }
  0x3e   : > { %p60_p3 = scmp.ne.s32.totalorder %s3755_s16, %s3751_s15  ;;  %s308_s6 = sand.u32 1, %s3759_s17  }
  0x3f   : > { %s3993_s5 = scalar_select %p45_p13, %s3759_s17, %s47_s28  }
  0x40   : > { %p56_p4 = por %p55_p1, %p54_p0  ;;  %p3999_p5 = por %p5066_p2, %p60_p3 }
  0x41   : > { %5090 = sst [smem:[#allocation31_spill]] %s3993_s5  ;;  %s2926_s12 = sshll.u32 %s3771_s20, 8 }
  0x42   : > { %s2818_s9 = sshll.u32 %s308_s6, 7  ;;  %s5092_s0 = sld [smem:[#allocation32_spill]] }
  0x43   : > { %s312_s27 = scalar_lea.vmem [#allocation11], %s2818_s9  ;;  %p4010_p10 = pnand %p3203_p7, %p56_p4 }
  0x44   : > { %s319_s7 = sshll.u32 %s312_s27, 4  ;;  %s309_s28 = scalar_lea.sflag [#allocation12], %s308_s6  ;;  %s320_s7 = int_to_ptr.vmem [resolvable:$true] %s319_s7 }
  0x45   : > { %p3547_p6 = pneg %p4010_p10  ;;  %s3558_s18 = scalar_lea.vmem %s320_s7, 2048 }
  0x46   : > { %p3559_p9 = scmp.ne.s32.totalorder %s320_s7, %s3558_s18  ;;  %s3785_s29 = smov [#allocation11]  }
  0x47   : > { %s3563_s1 = sshll.u32 %s3785_s29, 4  ;;  %s3564_s1 = int_to_ptr.vmem [resolvable:$false] %s3563_s1 }
  0x48   : > { %s318_s8 = scalar_lea.hbm %s5092_s0, %s2926_s12  ;;  %p3561_p11 = pnand %p3559_p9, %p3547_p6 }
  0x49   : > { %s3565_s12 = scalar_lea.vmem %s3564_s1, 4096  ;;  %p3566_p0 = scmp.lt.s32.totalorder %s320_s7, %s3564_s1 }
  0x4a   : > { %p3562_p13 = pneg %p3561_p11  ;;  %p3567_p3 = scmp.lt.s32.totalorder %s3565_s12, %s3558_s18 }
  0x4c   : > { %p3568_p2 = por %p3567_p3, %p3566_p0 }
  0x4e   : > { %p3569_p4 = pnand %p3568_p2, %p3562_p13 }
  0x50   : > { %3572 = shalt.err (!%p3569_p4)
}
  0x51   : > { %s3786_s9 = smov 1024   ;;  %s5094_s6 = sld [smem:[#allocation26_spill]] }
  0x52   : > { %s5095_s30 = sld [smem:[#allocation25_spill]]  ;;  %s3787_s1 = smov 256  }
  0x53   : > { %s3788_s18 = smov 16   ;;  %s209_s29 = smul.u32 %s3771_s20, %s3775_s21 }
  0x54   : > { %3196 = dma.hbm_to_vmem [thread:$0]  (!%p4010_p10), %s318_s8, 2048, %s320_s7, %s309_s28, %s3786_s9, %s3787_s1, %s3788_s18  }
  0x55   : > { %s210_s10 = smul.u32 %s5141_s25, %s5137_s24  ;;  %s214_s27 = sadd.s32 1, %s3735_s11 }
  0x56   : > { %s356_s0 = sand.u32 1, %s3735_s11   ;;  %p5096_p13 = scmp.eq.s32.totalorder %s3918_s23, 0 }
  0x57   : > { %p221_p2 = scmp.ne.s32.totalorder %s3735_s11, %s5094_s6  ;;  %s211_s12 = ssub.s32 %s209_s29, %s210_s10 }
  0x58   : > { %p227_p6 = scmp.ne.s32.totalorder %s5094_s6, %s5095_s30  ;;  %p212_p9 = scmp.eq.s32.totalorder %s211_s12, 0 }
  0x59   : > { %p223_p11 = por %p221_p2, %p55_p1  ;;  %s2824_s17 = sshll.u32 %s356_s0, 4 }
  0x5a   : > { %p4032_p0 = por %p227_p6, %p5096_p13  ;;  %s2928_s7 = sshll.u32 %s209_s29, 7 }
  0x5b   : > { %s4037_s19 = scalar_select %p212_p9, %s3735_s11, %s214_s27  }
  0x5c   : > { %s5097_s5 = scalar_select %p4032_p0, 1, 0 }
  0x5d   : > { %s5098_s28 = sld [smem:[#allocation39_spill]]  ;;  %s358_s1 = scalar_lea.vmem [#allocation16], %s2824_s17 }
  0x5e   : > { %s366_s6 = sshll.u32 %s358_s1, 4  ;;  %p4044_p10 = pnand %p3203_p7, %p223_p11  ;;  %s367_s6 = int_to_ptr.vmem [resolvable:$true] %s366_s6 }
  0x5f   : > { %s3586_s18 = scalar_lea.vmem %s367_s6, 256  ;;  %s3789_s0 = smov [#allocation16]  }
  0x60   : > { %p3575_p1 = pneg %p4044_p10  ;;  %p3587_p3 = scmp.ne.s32.totalorder %s367_s6, %s3586_s18 }
  0x61   : > { %s3591_s29 = sshll.u32 %s3789_s0, 4  ;;  %s3592_s29 = int_to_ptr.vmem [resolvable:$false] %s3591_s29 }
  0x62   : > { %p3589_p4 = pnand %p3587_p3, %p3575_p1  ;;  %s3593_s10 = scalar_lea.vmem %s3592_s29, 512 }
  0x63   : > { %s365_s9 = scalar_lea.hbm %s5098_s28, %s2928_s7  ;;  %p3594_p6 = scmp.lt.s32.totalorder %s367_s6, %s3592_s29 }
  0x64   : > { %p3590_p2 = pneg %p3589_p4  ;;  %p3595_p9 = scmp.lt.s32.totalorder %s3593_s10, %s3586_s18 }
  0x66   : > { %p3596_p13 = por %p3595_p9, %p3594_p6 }
  0x68   : > { %p3597_p0 = pnand %p3596_p13, %p3590_p2 }
  0x6a   : > { %3600 = shalt.err (!%p3597_p0)
}
  0x6b   : > { %s5100_s17 = smov 8   ;;  %s5101_s27 = smov 128  }
  0x6c   : > { %s5102_s12 = smov 512   ;;  %378 = sbr.rel (%p3981_p12) target bundleno = 3204 (0xc84), region = 52 }
  0x6d   : > { %3202 = dma.hbm_to_vmem [thread:$0]  (!%p4044_p10), %s365_s9, 256, %s367_s6, %s3969_s3, %s5102_s12, %s5101_s27, %s5100_s17  }
  0x6e   : > { %s380_s7 = sand.u32 (!%p3981_p12), 1, %s3755_s16  }
  0x6f   : > { %s2828_s8 = sshll.u32 (!%p3981_p12), %s380_s7, 7  ;;  %s381_s15 = scalar_lea.sflag (!%p3981_p12), [#allocation12], %s380_s7 }
  0x70   : > { %s4059_s28 = scalar_lea.vmem (!%p3981_p12), [#allocation11], %s2828_s8 }
  0x71   : > { %3706 = dma.done.wait (%p3999_p5), %s381_s15, 2048  }
  0x72   : > { %3708 = vsyncadd (%p3999_p5), %s381_s15, 4294965248  ;;  %s389_s1 = sand.u32 1, %s3918_s23   ;;  %s391_s3 = sand.u32 1, %s3743_s13  }
  0x73   : > { %s2829_s9 = sshll.u32 %s391_s3, 6  ;;  %s390_s26 = scalar_lea.sflag [#allocation15], %s389_s1 }
  0x74   : > { %s4067_s6 = scalar_lea.vmem [#allocation14], %s2829_s9 }
  0x75   : > { %3710 = dma.done.wait (%p3949_p8), %s390_s26, 1024  }
  0x76   : > { %3712 = vsyncadd (%p3949_p8), %s390_s26, 4294966272  ;;  %s5103_s30 = sld [smem:[#allocation26_spill]]  ;;  %p5104_p7 = scmp.ne.s32.totalorder %s5097_s5, 0 }
  0x7c   : > { %s400_s18 = sand.u32 1, %s5103_s30  }
  0x7d   : > { %s4074_s0 = sshll.u32 %s400_s18, 4 }
  0x7e   : > { %s402_s4 = scalar_lea.vmem [#allocation16], %s4074_s0 }
  0x7f   : > { %3714 = dma.done.wait (%p5104_p7), %s390_s26, 256  }
  0x80   : > { %3716 = vsyncadd (%p5104_p7), %s390_s26, 4294967040  ;;  %s5105_s29 = sld [smem:[#allocation29_spill]] }
  0x81   : > { %s5106_s10 = sld [smem:[#allocation28_spill]] }
  0x86   : > { %p450_p12 = scmp.eq.s32.totalorder %s5105_s29, 0 }
  0x87   : > { %p451_p5 = scmp.eq.s32.totalorder %s5106_s10, 0 }
  0x89   : > { %p452_p11 = pnand %p451_p5, %p450_p12 }
  0x8b   : > { %455 = sbr.rel (%p452_p11) target bundleno = 149 (0x95), region = 68 }
  0x90   : > { %vm456_vm0 = vcmask 523264   ;;  %v3790_v0 = vmov 0.0  }
  0x91   : > { %457 = vst.msk [vmem:[#allocation2] sm:$0xff] %vm456_vm0, %v3790_v0  ;;  %458 = vst.msk [vmem:[#allocation2 + $0x8] sm:$0xff] %vm456_vm0, %v3790_v0 }
  0x92   : > { %459 = vst.msk [vmem:[#allocation2 + $0x10] sm:$0xff] %vm456_vm0, %v3790_v0  ;;  %460 = vst.msk [vmem:[#allocation2 + $0x18] sm:$0xff] %vm456_vm0, %v3790_v0 }
  0x93   : > { %461 = vst.msk [vmem:[#allocation2 + $0x20] sm:$0xff] %vm456_vm0, %v3790_v0  ;;  %462 = vst.msk [vmem:[#allocation2 + $0x28] sm:$0xff] %vm456_vm0, %v3790_v0 }
  0x94   : > { %463 = vst.msk [vmem:[#allocation2 + $0x30] sm:$0xff] %vm456_vm0, %v3790_v0  ;;  %464 = vst.msk [vmem:[#allocation2 + $0x38] sm:$0xff] %vm456_vm0, %v3790_v0 }
  0x95 PF: > { %s5107_s2 = sld [smem:[#allocation29_spill]] }
  0x9b   : > { %p2831_p8 = scmp.ne.s32.totalorder %s5107_s2, 0 }
  0x9d   : > { %467 = sbr.rel (%p2831_p8) target bundleno = 405 (0x195), region = 72 }
  0xa2   : > { %v491_v1 = vld [vmem:[%s4067_s6 + $0x38] sm:$0xff]  ;;  %v490_v2 = vld [vmem:[%s4067_s6 + $0x30] sm:$0xff]  ;;  %v489_v6 = vld [vmem:[%s4067_s6 + $0x28] sm:$0xff]  ;;  %vm629_vm1 = vcmask 523264  }
  0xa3   : > { %v507_v3 = vunpack.c.h.bf16 %v491_v1  ;;  %v506_v4 = vunpack.c.l.bf16 %v491_v1  ;;  %v505_v5 = vunpack.c.h.bf16 %v490_v2  ;;  %v469_v7 = vld [vmem:[%s4059_s28 + $0x8] sm:$0xff]  ;;  %v504_v9 = vunpack.c.l.bf16 %v490_v2  ;;  %v488_v11 = vld [vmem:[%s4067_s6 + $0x20] sm:$0xff]  ;;  %v487_v14 = vld [vmem:[%s4067_s6 + $0x18] sm:$0xff] }
  0xa4   : > { %v477_v8 = vld [vmem:[%s4059_s28 + $0x48] sm:$0xff]  ;;  %v503_v10 = vunpack.c.h.bf16 %v489_v6  ;;  %580 = vmatprep.mubr.f32.mxu0 %v469_v7  ;;  %v502_v12 = vunpack.c.l.bf16 %v489_v6  ;;  %v501_v13 = vunpack.c.h.bf16 %v488_v11  ;;  %v500_v15 = vunpack.c.l.bf16 %v488_v11  ;;  %v486_v17 = vld [vmem:[%s4067_s6 + $0x10] sm:$0xff]  ;;  %v484_v23 = vld [vmem:[%s4067_s6] sm:$0xff] }
  0xa5   : > { %532 = vmatprep.subr.mxu0 %v507_v3  ;;  %3153 = vmatprep.subr.mxu1 %v507_v3  ;;  %v499_v16 = vunpack.c.h.bf16 %v487_v14  ;;  %v498_v18 = vunpack.c.l.bf16 %v487_v14  ;;  %v497_v19 = vunpack.c.h.bf16 %v486_v17  ;;  %v485_v20 = vld [vmem:[%s4067_s6 + $0x8] sm:$0xff]  ;;  %v496_v21 = vunpack.c.l.bf16 %v486_v17  ;;  %v468_v27 = vld [vmem:[%s4059_s28] sm:$0xff]  ;;  %v471_v29 = vld [vmem:[%s4059_s28 + $0x18] sm:$0xff] }
  0xa6   : > { %533 = vmatpush1.xpose.msra.mxu0 %v506_v4  ;;  %3161 = vmatpush1.xpose.msra.mxu1 %v506_v4  ;;  %v495_v22 = vunpack.c.h.bf16 %v485_v20  ;;  %v494_v24 = vunpack.c.l.bf16 %v485_v20  ;;  %v493_v25 = vunpack.c.h.bf16 %v484_v23  ;;  %v492_v26 = vunpack.c.l.bf16 %v484_v23  ;;  %v476_v28 = vld [vmem:[%s4059_s28 + $0x40] sm:$0xff]  ;;  %v479_v30 = vld [vmem:[%s4059_s28 + $0x58] sm:$0xff]  ;;  %v470_v31 = vld [vmem:[%s4059_s28 + $0x10] sm:$0xff] }
  0xa7   : > { %534 = vmatprep.subr.mxu0 %v505_v5  ;;  %3154 = vmatprep.subr.mxu1 %v505_v5  ;;  %v478_v32 = vld [vmem:[%s4059_s28 + $0x50] sm:$0xff]  ;;  %v473_v33 = vld [vmem:[%s4059_s28 + $0x28] sm:$0xff]  ;;  %v472_v35 = vld [vmem:[%s4059_s28 + $0x20] sm:$0xff] }
  0xa8   : > { %600 = vmatprep.mubr.f32.mxu1 %v477_v8  ;;  %v481_v34 = vld [vmem:[%s4059_s28 + $0x68] sm:$0xff]  ;;  %v480_v36 = vld [vmem:[%s4059_s28 + $0x60] sm:$0xff]  ;;  %v475_v37 = vld [vmem:[%s4059_s28 + $0x38] sm:$0xff] }
  0xa9   : > { %v483_v38 = vld [vmem:[%s4059_s28 + $0x78] sm:$0xff]  ;;  %v474_v39 = vld [vmem:[%s4059_s28 + $0x30] sm:$0xff]  ;;  %v511_v1 = vld [vmem:[#allocation2 + $0x18] sm:$0xff] }
  0xaa   : > { %535 = vmatpush1.xpose.msra.mxu0 %v504_v9  ;;  %3162 = vmatpush1.xpose.msra.mxu1 %v504_v9  ;;  %v482_v40 = vld [vmem:[%s4059_s28 + $0x70] sm:$0xff]  ;;  %v510_v57 = vld [vmem:[#allocation2 + $0x10] sm:$0xff]  ;;  %v515_v2 = vld [vmem:[#allocation2 + $0x38] sm:$0xff] }
  0xab   : > { %536 = vmatprep.subr.mxu0 %v503_v10  ;;  %3155 = vmatprep.subr.mxu1 %v503_v10  ;;  %v508_v41 = vld [vmem:[#allocation2] sm:$0xff]  ;;  %v509_v49 = vld [vmem:[#allocation2 + $0x8] sm:$0xff]  ;;  %v514_v58 = vld [vmem:[#allocation2 + $0x30] sm:$0xff] }
  0xac   : > { %v512_v42 = vld [vmem:[#allocation2 + $0x20] sm:$0xff]  ;;  %v513_v50 = vld [vmem:[#allocation2 + $0x28] sm:$0xff] }
  0xae   : > { %537 = vmatpush1.xpose.msra.mxu0 %v502_v12  ;;  %3163 = vmatpush1.xpose.msra.mxu1 %v502_v12 }
  0xaf   : > { %538 = vmatprep.subr.mxu0 %v501_v13  ;;  %3156 = vmatprep.subr.mxu1 %v501_v13 }
  0xb2   : > { %539 = vmatpush1.xpose.msra.mxu0 %v500_v15  ;;  %3164 = vmatpush1.xpose.msra.mxu1 %v500_v15 }
  0xb3   : > { %540 = vmatprep.subr.mxu0 %v499_v16  ;;  %3157 = vmatprep.subr.mxu1 %v499_v16 }
  0xb6   : > { %541 = vmatpush1.xpose.msra.mxu0 %v498_v18  ;;  %3165 = vmatpush1.xpose.msra.mxu1 %v498_v18 }
  0xb7   : > { %542 = vmatprep.subr.mxu0 %v497_v19  ;;  %3158 = vmatprep.subr.mxu1 %v497_v19 }
  0xba   : > { %543 = vmatpush1.xpose.msra.mxu0 %v496_v21  ;;  %3166 = vmatpush1.xpose.msra.mxu1 %v496_v21 }
  0xbb   : > { %544 = vmatprep.subr.mxu0 %v495_v22  ;;  %3159 = vmatprep.subr.mxu1 %v495_v22 }
  0xbe   : > { %545 = vmatpush1.xpose.msra.mxu0 %v494_v24  ;;  %3167 = vmatpush1.xpose.msra.mxu1 %v494_v24 }
  0xbf   : > { %546 = vmatprep.subr.mxu0 %v493_v25  ;;  %3160 = vmatprep.subr.mxu1 %v493_v25 }
  0xc2   : > { %547 = vmatpush1.xpose.msra.mxu0 %v492_v26  ;;  %3168 = vmatpush1.xpose.msra.mxu1 %v492_v26 }
  0xc5   : > { %581 = vmatmul.mubr.f32.vlgmr.msra.gmra.mxu0 %v468_v27  ;;  %601 = vmatmul.mubr.f32.vlgmr.msra.gmra.mxu1 %v476_v28 }
  0xc6   : > { %585 = vmatprep.mubr.f32.mxu0 %v471_v29  ;;  %605 = vmatprep.mubr.f32.mxu1 %v479_v30 }
  0xc9   : > { %586 = vmatmul.mubr.f32.gmra.mxu0 %v470_v31  ;;  %606 = vmatmul.mubr.f32.gmra.mxu1 %v478_v32 }
  0xca   : > { %590 = vmatprep.mubr.f32.mxu0 %v473_v33  ;;  %610 = vmatprep.mubr.f32.mxu1 %v481_v34 }
  0xcd   : > { %591 = vmatmul.mubr.f32.gmra.mxu0 %v472_v35  ;;  %611 = vmatmul.mubr.f32.gmra.mxu1 %v480_v36 }
  0xce   : > { %595 = vmatprep.mubr.f32.mxu0 %v475_v37  ;;  %615 = vmatprep.mubr.f32.mxu1 %v483_v38 }
  0xd1   : > { %596 = vmatmul.mubr.f32.gmra.mxu0 %v474_v39  ;;  %616 = vmatmul.mubr.f32.gmra.mxu1 %v482_v40 }
 0x185   : > { %v582_v43 = vpop.f32.mrf.mxu0  ;;  %v602_v44 = vpop.f32.mrf.mxu1 }
 0x186   : > { %v621_v45 = vadd.f32 %v582_v43, %v508_v41  ;;  %v625_v46 = vadd.f32 %v602_v44, %v512_v42 }
 0x187   : > { %v584_v47 = vpop.f32.mrf.mxu0  ;;  %v604_v48 = vpop.f32.mrf.mxu1 }
 0x188   : > { %630 = vst.msk [vmem:[#allocation2] sm:$0xff] %vm629_vm1, %v621_v45  ;;  %634 = vst.msk [vmem:[#allocation2 + $0x20] sm:$0xff] %vm629_vm1, %v625_v46 }
 0x189   : > { %v587_v51 = vpop.f32.mrf.mxu0  ;;  %v607_v52 = vpop.f32.mrf.mxu1 }
 0x18a   : > { %v622_v53 = vadd.f32 %v587_v51, %v509_v49  ;;  %v626_v54 = vadd.f32 %v607_v52, %v513_v50 }
 0x18b   : > { %v589_v55 = vpop.f32.mrf.mxu0  ;;  %v609_v56 = vpop.f32.mrf.mxu1 }
 0x18c   : > { %631 = vst.msk [vmem:[#allocation2 + $0x8] sm:$0xff] %vm629_vm1, %v622_v53  ;;  %635 = vst.msk [vmem:[#allocation2 + $0x28] sm:$0xff] %vm629_vm1, %v626_v54 }
 0x18d   : > { %v592_v59 = vpop.f32.mrf.mxu0  ;;  %v612_v60 = vpop.f32.mrf.mxu1 }
 0x18e   : > { %v623_v61 = vadd.f32 %v592_v59, %v510_v57  ;;  %v627_v62 = vadd.f32 %v612_v60, %v514_v58 }
 0x18f   : > { %v594_v63 = vpop.f32.mrf.mxu0  ;;  %v614_v0 = vpop.f32.mrf.mxu1 }
 0x190   : > { %632 = vst.msk [vmem:[#allocation2 + $0x10] sm:$0xff] %vm629_vm1, %v623_v61  ;;  %636 = vst.msk [vmem:[#allocation2 + $0x30] sm:$0xff] %vm629_vm1, %v627_v62 }
 0x191   : > { %v597_v3 = vpop.f32.mrf.mxu0  ;;  %v617_v4 = vpop.f32.mrf.mxu1 }
 0x192   : > { %v624_v5 = vadd.f32 %v597_v3, %v511_v1  ;;  %v628_v6 = vadd.f32 %v617_v4, %v515_v2 }
 0x193   : > { %v599_v7 = vpop.f32.mrf.mxu0  ;;  %v619_v8 = vpop.f32.mrf.mxu1 }
 0x194   : > { %633 = vst.msk [vmem:[#allocation2 + $0x18] sm:$0xff] %vm629_vm1, %v624_v5  ;;  %637 = vst.msk [vmem:[#allocation2 + $0x38] sm:$0xff] %vm629_vm1, %v628_v6 }
 0x195 PF: > { %s5108_s5 = sld [smem:[#allocation29_spill]] }
 0x19b   : > { %p638_p0 = scmp.eq.s32.totalorder %s5108_s5, 1 }
 0x19d   : > { %p639_p10 = pnand %p638_p0, %p451_p5 }
 0x19e   : > { %s5110_s7 = sld [smem:[#allocation35_spill]] (!%p639_p10) }
 0x19f   : > { %642 = sbr.rel (%p639_p10) target bundleno = 2051 (0x803), region = 76  ;;  %s5111_s18 = sld [smem:[#allocation34_spill]] (!%p639_p10) }
 0x1a0   : > { %s5112_s3 = sld [smem:[#allocation37_spill]] (!%p639_p10) }
 0x1a1   : > { %s5113_s26 = sld [smem:[#allocation36_spill]] (!%p639_p10) }
 0x1a4   : > { %v745_v9 = vld [vmem:[%s5110_s7 + $0x38] sm:$0xff]  ;;  %v744_v10 = vld [vmem:[%s5110_s7 + $0x30] sm:$0xff]  ;;  %v743_v11 = vld [vmem:[%s5110_s7 + $0x28] sm:$0xff]  ;;  %vm753_vm2 = vcmask 523264   ;;  %vm1099_vm3 = vcmask 130048  }
 0x1a5   : > { %3009 = vmatprep.subr.mxu0 %v745_v9  ;;  %v742_v12 = vld [vmem:[%s5110_s7 + $0x20] sm:$0xff]  ;;  %v644_v15 = vld [vmem:[#allocation2 + $0x8] sm:$0xff]  ;;  %v645_v16 = vld [vmem:[#allocation2 + $0x10] sm:$0xff] }
 0x1a6   : > { %3010 = vmatpush3.msra.mxu0 %v745_v9  ;;  %v643_v13 = vld [vmem:[#allocation2] sm:$0xff]  ;;  %v646_v20 = vld [vmem:[#allocation2 + $0x18] sm:$0xff]  ;;  %v648_v22 = vld [vmem:[#allocation2 + $0x28] sm:$0xff] }
 0x1a7   : > { %3011 = vmatprep.subr.mxu0 %v744_v10  ;;  %v2832_v14 = vld [vmem:[%s5111_s18] ss:$0 sm:$0xff]  ;;  %v741_v26 = vld [vmem:[%s5110_s7 + $0x18] sm:$0xff]  ;;  %v649_v31 = vld [vmem:[#allocation2 + $0x30] sm:$0xff]  ;;  %s5114_s18 = sld [smem:[#allocation38_spill]] }
 0x1a8   : > { %3012 = vmatpush3.msra.mxu0 %v744_v10  ;;  %v4138_v17 = vadd.f32 %v2832_v14, %v643_v13  ;;  %v4140_v18 = vadd.f32 %v2832_v14, %v644_v15  ;;  %v4142_v19 = vadd.f32 %v2832_v14, %v645_v16  ;;  %v647_v21 = vld [vmem:[#allocation2 + $0x20] sm:$0xff]  ;;  %v4144_v23 = vadd.f32 %v2832_v14, %v646_v20  ;;  %v740_v32 = vld [vmem:[%s5110_s7 + $0x10] sm:$0xff]  ;;  %v650_v36 = vld [vmem:[#allocation2 + $0x38] sm:$0xff] }
 0x1a9   : > { %3013 = vmatprep.subr.mxu0 %v743_v11  ;;  %v4146_v24 = vadd.f32 %v2832_v14, %v647_v21  ;;  %v4148_v25 = vadd.f32 %v2832_v14, %v648_v22  ;;  %v739_v40 = vld [vmem:[%s5110_s7 + $0x8] sm:$0xff]  ;;  %v4165_v44 = vadd.f32 %v2832_v14, %v649_v31  ;;  %v4167_v48 = vadd.f32 %v2832_v14, %v650_v36  ;;  %v738_v49 = vld [vmem:[%s5110_s7] sm:$0xff] }
 0x1aa   : > { %3014 = vmatpush3.msra.mxu0 %v743_v11  ;;  %v674_v27 = vand.u32 2147483647, %v4138_v17  ;;  %v675_v28 = vand.u32 2147483647, %v4140_v18  ;;  %v676_v29 = vand.u32 2147483647, %v4142_v19 }
 0x1ab   : > { %3015 = vmatprep.subr.mxu0 %v742_v12  ;;  %v677_v30 = vand.u32 2147483647, %v4144_v23  ;;  %v678_v35 = vand.u32 2147483647, %v4146_v24  ;;  %v679_v39 = vand.u32 2147483647, %v4148_v25 }
 0x1ac   : > { %3016 = vmatpush3.msra.mxu0 %v742_v12  ;;  %v682_v33 = vsub.f32 0.0, %v674_v27  ;;  %v683_v34 = vsub.f32 0.0, %v675_v28  ;;  %v684_v37 = vsub.f32 0.0, %v676_v29  ;;  %v680_v51 = vand.u32 2147483647, %v4165_v44 }
 0x1ad   : > { %3017 = vmatprep.subr.mxu0 %v741_v26  ;;  %v685_v38 = vsub.f32 0.0, %v677_v30  ;;  %v686_v43 = vsub.f32 0.0, %v678_v35  ;;  %v687_v47 = vsub.f32 0.0, %v679_v39  ;;  %v681_v53 = vand.u32 2147483647, %v4167_v48 }
 0x1ae   : > { %3018 = vmatpush3.msra.mxu0 %v741_v26  ;;  %v690_v41 = vmul.f32 1.442695, %v682_v33  ;;  %v692_v42 = vmul.f32 1.442695, %v683_v34  ;;  %v694_v45 = vmul.f32 1.442695, %v684_v37 }
 0x1af   : > { %3019 = vmatprep.subr.mxu0 %v740_v32  ;;  %v696_v46 = vmul.f32 1.442695, %v685_v38  ;;  %v698_v50 = vmul.f32 1.442695, %v686_v43  ;;  %v700_v52 = vmul.f32 1.442695, %v687_v47 }
 0x1b0   : > { %3020 = vmatpush3.msra.mxu0 %v740_v32  ;;  %3333 = vpow2.f32 %v690_v41  ;;  %v688_v54 = vsub.f32 0.0, %v680_v51  ;;  %v689_v55 = vsub.f32 0.0, %v681_v53  ;;  %v666_v10 = vmax.f32 %v4138_v17, 0.0  ;;  %v961_v43 = vld [vmem:[%s5112_s3 + $0x30] sm:$0xff] }
 0x1b1   : > { %3021 = vmatprep.subr.mxu0 %v739_v40  ;;  %3335 = vpow2.f32 %v692_v42  ;;  %v667_v12 = vmax.f32 %v4140_v18, 0.0  ;;  %v668_v15 = vmax.f32 %v4142_v19, 0.0  ;;  %v669_v21 = vmax.f32 %v4144_v23, 0.0  ;;  %v962_v42 = vld [vmem:[%s5112_s3 + $0x38] sm:$0xff]  ;;  %v957_v47 = vld [vmem:[%s5112_s3 + $0x10] sm:$0xff] }
 0x1b2   : > { %3022 = vmatpush3.msra.mxu0 %v739_v40  ;;  %3337 = vpow2.f32 %v694_v45  ;;  %v702_v56 = vmul.f32 1.442695, %v688_v54  ;;  %v704_v57 = vmul.f32 1.442695, %v689_v55  ;;  %v670_v28 = vmax.f32 %v4146_v24, 0.0  ;;  %3037 = vmatprep.subr.mxu1 %v962_v42  ;;  %v959_v45 = vld [vmem:[%s5112_s3 + $0x20] sm:$0xff] }
 0x1b3   : > { %3023 = vmatprep.subr.mxu0 %v738_v49  ;;  %3339 = vpow2.f32 %v696_v46  ;;  %v671_v34 = vmax.f32 %v4148_v25, 0.0  ;;  %v672_v24 = vmax.f32 %v4165_v44, 0.0  ;;  %v673_v39 = vmax.f32 %v4167_v48, 0.0  ;;  %3038 = vmatpush3.msra.mxu1 %v962_v42  ;;  %v960_v44 = vld [vmem:[%s5112_s3 + $0x28] sm:$0xff]  ;;  %v958_v46 = vld [vmem:[%s5112_s3 + $0x18] sm:$0xff] }
 0x1b4   : > { %3024 = vmatpush3.msra.mxu0 %v738_v49  ;;  %3341 = vpow2.f32 %v698_v50  ;;  %3039 = vmatprep.subr.mxu1 %v961_v43  ;;  %v956_v48 = vld [vmem:[%s5112_s3 + $0x8] sm:$0xff]  ;;  %v955_v49 = vld [vmem:[%s5112_s3] sm:$0xff] }
 0x1b5   : > { %3343 = vpow2.f32 %v700_v52  ;;  %3040 = vmatpush3.msra.mxu1 %v961_v43  ;;  %v2833_v50 = vld [vmem:[%s5113_s26] ss:$0 sm:$0xff] }
 0x1b6   : > { %3345 = vpow2.f32 %v702_v56  ;;  %3041 = vmatprep.subr.mxu1 %v960_v44 }
 0x1b7   : > { %3347 = vpow2.f32 %v704_v57  ;;  %3042 = vmatpush3.msra.mxu1 %v960_v44 }
 0x1b8   : > { %3043 = vmatprep.subr.mxu1 %v959_v45 }
 0x1b9   : > { %3044 = vmatpush3.msra.mxu1 %v959_v45 }
 0x1ba   : > { %3045 = vmatprep.subr.mxu1 %v958_v46 }
 0x1bb   : > { %3046 = vmatpush3.msra.mxu1 %v958_v46 }
 0x1bc   : > { %3047 = vmatprep.subr.mxu1 %v957_v47 }
 0x1bd   : > { %v3334_v58 = vpop.eup %3333  ;;  %3048 = vmatpush3.msra.mxu1 %v957_v47 }
 0x1be   : > { %v3336_v59 = vpop.eup %3335  ;;  %v706_v60 = vadd.f32 1.0, %v3334_v58  ;;  %3049 = vmatprep.subr.mxu1 %v956_v48 }
 0x1bf   : > { %v3338_v61 = vpop.eup %3337  ;;  %v707_v62 = vadd.f32 1.0, %v3336_v59  ;;  %3050 = vmatpush3.msra.mxu1 %v956_v48 }
 0x1c0   : > { %v3340_v63 = vpop.eup %3339  ;;  %3349 = vlog2.f32 %v706_v60  ;;  %v708_v0 = vadd.f32 1.0, %v3338_v61  ;;  %3051 = vmatprep.subr.mxu1 %v955_v49 }
 0x1c1   : > { %v3342_v1 = vpop.eup %3341  ;;  %3351 = vlog2.f32 %v707_v62  ;;  %v709_v2 = vadd.f32 1.0, %v3340_v63  ;;  %3052 = vmatpush3.msra.mxu1 %v955_v49 }
 0x1c2   : > { %v3344_v3 = vpop.eup %3343  ;;  %3353 = vlog2.f32 %v708_v0  ;;  %v710_v4 = vadd.f32 1.0, %v3342_v1 }
 0x1c3   : > { %v3346_v5 = vpop.eup %3345  ;;  %3355 = vlog2.f32 %v709_v2  ;;  %v711_v6 = vadd.f32 1.0, %v3344_v3 }
 0x1c4   : > { %v3348_v7 = vpop.eup %3347  ;;  %3357 = vlog2.f32 %v710_v4  ;;  %v712_v8 = vadd.f32 1.0, %v3346_v5 }
 0x1c5   : > { %3359 = vlog2.f32 %v711_v6  ;;  %v713_v9 = vadd.f32 1.0, %v3348_v7 }
 0x1c6   : > { %3361 = vlog2.f32 %v712_v8 }
 0x1c7   : > { %3363 = vlog2.f32 %v713_v9 }
 0x1cd   : > { %v3350_v11 = vpop.eup %3349 }
 0x1ce   : > { %v3352_v13 = vpop.eup %3351  ;;  %v715_v14 = vmul.f32 0.6931472, %v3350_v11 }
 0x1cf   : > { %v3354_v16 = vpop.eup %3353  ;;  %v717_v20 = vmul.f32 0.6931472, %v3352_v13 }
 0x1d0   : > { %v3356_v22 = vpop.eup %3355  ;;  %v730_v26 = vadd.f32 %v715_v14, %v666_v10  ;;  %v719_v27 = vmul.f32 0.6931472, %v3354_v16 }
 0x1d1   : > { %v3358_v29 = vpop.eup %3357  ;;  %v731_v30 = vadd.f32 %v717_v20, %v667_v12  ;;  %v721_v17 = vmul.f32 0.6931472, %v3356_v22 }
 0x1d2   : > { %v3360_v31 = vpop.eup %3359  ;;  %3025 = vmatprep.mubr.msk.f32.mxu0 %vm753_vm2, %v730_v26  ;;  %v732_v18 = vadd.f32 %v719_v27, %v668_v15  ;;  %v723_v32 = vmul.f32 0.6931472, %v3358_v29 }
 0x1d3   : > { %v3362_v33 = vpop.eup %3361  ;;  %3026 = vmatmul.mubr.msk.f32.vlgmr.msra.gmra.mxu0 %vm753_vm2, %v731_v30  ;;  %v733_v19 = vadd.f32 %v721_v17, %v669_v21  ;;  %v725_v23 = vmul.f32 0.6931472, %v3360_v31 }
 0x1d4   : > { %v3364_v35 = vpop.eup %3363  ;;  %3028 = vmatprep.mubr.msk.f32.mxu0 %vm753_vm2, %v732_v18  ;;  %v734_v36 = vadd.f32 %v723_v32, %v670_v28  ;;  %v727_v37 = vmul.f32 0.6931472, %v3362_v33 }
 0x1d5   : > { %v735_v38 = vadd.f32 %v725_v23, %v671_v34  ;;  %v729_v40 = vmul.f32 0.6931472, %v3364_v35 }
 0x1d6   : > { %v736_v41 = vadd.f32 %v727_v37, %v672_v24 }
 0x1d7   : > { %3029 = vmatmul.mubr.msk.f32.gmra.mxu0 %vm753_vm2, %v733_v19  ;;  %v737_v25 = vadd.f32 %v729_v40, %v673_v39 }
 0x1d8   : > { %3031 = vmatprep.mubr.msk.f32.mxu0 %vm753_vm2, %v734_v36 }
 0x1db   : > { %3032 = vmatmul.mubr.msk.f32.gmra.mxu0 %vm753_vm2, %v735_v38 }
 0x1dc   : > { %3034 = vmatprep.mubr.msk.f32.mxu0 %vm753_vm2, %v736_v41 }
 0x1df   : > { %3035 = vmatmul.mubr.msk.f32.gmra.mxu0 %vm753_vm2, %v737_v25 }
 0x293   : > { %v3027_v51 = vpop.f32.mrf.mxu0 }
 0x294   : > { %v4217_v52 = vadd.f32 %v3027_v51, %v2833_v50 }
 0x295   : > { %v844_v53 = vpop.f32.mrf.mxu0 }
 0x296   : > { %v892_v54 = vand.u32 2147483647, %v4217_v52  ;;  %v4220_v55 = vadd.f32 %v2833_v50, %v844_v53  ;;  %v884_v49 = vmax.f32 %v4217_v52, 0.0 }
 0x297   : > { %v3030_v56 = vpop.f32.mrf.mxu0 }
 0x298   : > { %v900_v57 = vsub.f32 0.0, %v892_v54  ;;  %v891_v58 = vand.u32 2147483647, %v4220_v55  ;;  %v4223_v59 = vadd.f32 %v3030_v56, %v2833_v50  ;;  %v883_v46 = vmax.f32 %v4220_v55, 0.0 }
 0x299   : > { %v854_v60 = vpop.f32.mrf.mxu0 }
 0x29a   : > { %v909_v61 = vmul.f32 1.442695, %v900_v57  ;;  %v899_v62 = vsub.f32 0.0, %v891_v58  ;;  %v894_v63 = vand.u32 2147483647, %v4223_v59  ;;  %v4226_v0 = vadd.f32 %v2833_v50, %v854_v60 }
 0x29b   : > { %v3033_v1 = vpop.f32.mrf.mxu0  ;;  %v886_v60 = vmax.f32 %v4223_v59, 0.0 }
 0x29c   : > { %3365 = vpow2.f32 %v909_v61  ;;  %v907_v2 = vmul.f32 1.442695, %v899_v62  ;;  %v902_v3 = vsub.f32 0.0, %v894_v63  ;;  %v4228_v4 = vadd.f32 %v3033_v1, %v2833_v50 }
 0x29d   : > { %v893_v5 = vand.u32 2147483647, %v4226_v0  ;;  %v864_v6 = vpop.f32.mrf.mxu0  ;;  %v885_v57 = vmax.f32 %v4226_v0, 0.0 }
 0x29e   : > { %3367 = vpow2.f32 %v907_v2  ;;  %v913_v7 = vmul.f32 1.442695, %v902_v3  ;;  %v896_v8 = vand.u32 2147483647, %v4228_v4  ;;  %v4232_v10 = vadd.f32 %v2833_v50, %v864_v6 }
 0x29f   : > { %v901_v9 = vsub.f32 0.0, %v893_v5  ;;  %v3036_v11 = vpop.f32.mrf.mxu0  ;;  %v888_v3 = vmax.f32 %v4228_v4, 0.0 }
 0x2a0   : > { %3369 = vpow2.f32 %v913_v7  ;;  %v904_v12 = vsub.f32 0.0, %v896_v8  ;;  %v4234_v13 = vadd.f32 %v3036_v11, %v2833_v50  ;;  %v895_v15 = vand.u32 2147483647, %v4232_v10 }
 0x2a1   : > { %v911_v14 = vmul.f32 1.442695, %v901_v9  ;;  %v874_v16 = vpop.f32.mrf.mxu0  ;;  %v887_v52 = vmax.f32 %v4232_v10, 0.0 }
 0x2a2   : > { %v917_v20 = vmul.f32 1.442695, %v904_v12  ;;  %v898_v21 = vand.u32 2147483647, %v4234_v13  ;;  %v4238_v22 = vadd.f32 %v2833_v50, %v874_v16  ;;  %v903_v26 = vsub.f32 0.0, %v895_v15 }
 0x2a3   : > { %3371 = vpow2.f32 %v911_v14  ;;  %v890_v9 = vmax.f32 %v4234_v13, 0.0  ;;  %v2842_v12 = vld [vmem:[%s5114_s18] ss:$0 sm:$0xff] }
 0x2a4   : > { %3373 = vpow2.f32 %v917_v20  ;;  %v906_v27 = vsub.f32 0.0, %v898_v21  ;;  %v897_v28 = vand.u32 2147483647, %v4238_v22  ;;  %v915_v29 = vmul.f32 1.442695, %v903_v26 }
 0x2a5   : > { %v889_v59 = vmax.f32 %v4238_v22, 0.0 }
 0x2a6   : > { %v921_v30 = vmul.f32 1.442695, %v906_v27  ;;  %v905_v17 = vsub.f32 0.0, %v897_v28  ;;  %3375 = vpow2.f32 %v915_v29 }
 0x2a8   : > { %3377 = vpow2.f32 %v921_v30  ;;  %v919_v31 = vmul.f32 1.442695, %v905_v17 }
 0x2a9   : > { %v3366_v18 = vpop.eup %3365 }
 0x2aa   : > { %v924_v32 = vadd.f32 1.0, %v3366_v18  ;;  %3379 = vpow2.f32 %v919_v31 }
 0x2ab   : > { %v3368_v33 = vpop.eup %3367 }
 0x2ac   : > { %3381 = vlog2.f32 %v924_v32  ;;  %v923_v19 = vadd.f32 1.0, %v3368_v33 }
 0x2ad   : > { %v3370_v34 = vpop.eup %3369 }
 0x2ae   : > { %v926_v23 = vadd.f32 1.0, %v3370_v34  ;;  %3383 = vlog2.f32 %v923_v19 }
 0x2b0   : > { %v3372_v35 = vpop.eup %3371  ;;  %3385 = vlog2.f32 %v926_v23 }
 0x2b1   : > { %v3374_v36 = vpop.eup %3373  ;;  %v925_v24 = vadd.f32 1.0, %v3372_v35 }
 0x2b2   : > { %v928_v37 = vadd.f32 1.0, %v3374_v36 }
 0x2b3   : > { %3387 = vlog2.f32 %v925_v24  ;;  %v3376_v38 = vpop.eup %3375 }
 0x2b4   : > { %3389 = vlog2.f32 %v928_v37  ;;  %v927_v40 = vadd.f32 1.0, %v3376_v38 }
 0x2b5   : > { %v3378_v39 = vpop.eup %3377 }
 0x2b6   : > { %v930_v41 = vadd.f32 1.0, %v3378_v39  ;;  %3391 = vlog2.f32 %v927_v40 }
 0x2b7   : > { %v3380_v25 = vpop.eup %3379 }
 0x2b8   : > { %3393 = vlog2.f32 %v930_v41  ;;  %v929_v42 = vadd.f32 1.0, %v3380_v25 }
 0x2b9   : > { %v3382_v43 = vpop.eup %3381 }
 0x2ba   : > { %3395 = vlog2.f32 %v929_v42  ;;  %v934_v45 = vmul.f32 0.6931472, %v3382_v43 }
 0x2bb   : > { %v3384_v44 = vpop.eup %3383 }
 0x2bc   : > { %v932_v47 = vmul.f32 0.6931472, %v3384_v44  ;;  %v948_v51 = vadd.f32 %v934_v45, %v884_v49 }
 0x2bd   : > { %v3386_v48 = vpop.eup %3385 }
 0x2be   : > { %v947_v50 = vadd.f32 %v932_v47, %v883_v46  ;;  %v938_v54 = vmul.f32 0.6931472, %v3386_v48 }
 0x2c0   : > { %v3388_v53 = vpop.eup %3387  ;;  %3053 = vmatprep.mubr.msk.f32.mxu1 %vm753_vm2, %v947_v50  ;;  %v950_v62 = vadd.f32 %v938_v54, %v886_v60 }
 0x2c1   : > { %v3390_v56 = vpop.eup %3389  ;;  %v936_v58 = vmul.f32 0.6931472, %v3388_v53  ;;  %3054 = vmatmul.mubr.msk.f32.vlgmr.msra.gmra.mxu1 %vm753_vm2, %v948_v51 }
 0x2c2   : > { %v942_v63 = vmul.f32 0.6931472, %v3390_v56 }
 0x2c3   : > { %v949_v61 = vadd.f32 %v936_v58, %v885_v57  ;;  %v3392_v55 = vpop.eup %3391 }
 0x2c4   : > { %v940_v2 = vmul.f32 0.6931472, %v3392_v55  ;;  %v952_v6 = vadd.f32 %v942_v63, %v888_v3 }
 0x2c5   : > { %v3394_v1 = vpop.eup %3393  ;;  %3056 = vmatprep.mubr.msk.f32.mxu1 %vm753_vm2, %v949_v61 }
 0x2c6   : > { %3057 = vmatmul.mubr.msk.f32.gmra.mxu1 %vm753_vm2, %v950_v62  ;;  %v951_v5 = vadd.f32 %v940_v2, %v887_v52  ;;  %v946_v7 = vmul.f32 0.6931472, %v3394_v1 }
 0x2c7   : > { %v3396_v0 = vpop.eup %3395 }
 0x2c8   : > { %v944_v8 = vmul.f32 0.6931472, %v3396_v0  ;;  %3059 = vmatprep.mubr.msk.f32.mxu1 %vm753_vm2, %v951_v5  ;;  %v954_v10 = vadd.f32 %v946_v7, %v890_v9 }
 0x2ca   : > { %v953_v11 = vadd.f32 %v944_v8, %v889_v59  ;;  %3060 = vmatmul.mubr.msk.f32.gmra.mxu1 %vm753_vm2, %v952_v6 }
 0x2cc   : > { %3062 = vmatprep.mubr.msk.f32.mxu1 %vm753_vm2, %v953_v11 }
 0x2ce   : > { %3063 = vmatmul.mubr.msk.f32.gmra.mxu1 %vm753_vm2, %v954_v10 }
 0x381   : > { %v3055_v4 = vpop.f32.mrf.mxu1 }
 0x382   : > { %v1066_v16 = vadd.f32 %v3055_v4, %v2842_v12 }
 0x383   : > { %v1060_v14 = vpop.f32.mrf.mxu1 }
 0x384   : > { %v1061_v15 = vadd.f32 %v2842_v12, %v1060_v14  ;;  %v1101_v22 = vsel %vm1099_vm3, %v1066_v16, 0.0 }
 0x386   : > { %v3058_v20 = vpop.f32.mrf.mxu1  ;;  %v1100_v13 = vsel %vm1099_vm3, %v1061_v15, 0.0 }
 0x387   : > { %v1076_v26 = vadd.f32 %v3058_v20, %v2842_v12  ;;  %v1102_v28 = vadd.f32 %v1101_v22, %v1100_v13 }
 0x388   : > { %v1070_v21 = vpop.f32.mrf.mxu1 }
 0x389   : > { %v1071_v27 = vadd.f32 %v2842_v12, %v1070_v21  ;;  %v1105_v18 = vsel %vm1099_vm3, %v1076_v26, 0.0 }
 0x38a   : > { %v3061_v29 = vpop.f32.mrf.mxu1 }
 0x38b   : > { %v1103_v30 = vsel %vm1099_vm3, %v1071_v27, 0.0  ;;  %v1086_v32 = vadd.f32 %v3061_v29, %v2842_v12 }
 0x38c   : > { %v1104_v17 = vadd.f32 %v1103_v30, %v1102_v28  ;;  %v1080_v31 = vpop.f32.mrf.mxu1 }
 0x38d   : > { %v1081_v33 = vadd.f32 %v2842_v12, %v1080_v31  ;;  %v1109_v24 = vsel %vm1099_vm3, %v1086_v32, 0.0 }
 0x38e   : > { %v1106_v19 = vadd.f32 %v1105_v18, %v1104_v17  ;;  %v3064_v34 = vpop.f32.mrf.mxu1 }
 0x38f   : > { %v1107_v23 = vsel %vm1099_vm3, %v1081_v33, 0.0  ;;  %v1096_v37 = vadd.f32 %v3064_v34, %v2842_v12 }
 0x390   : > { %v1108_v35 = vadd.f32 %v1107_v23, %v1106_v19  ;;  %v1090_v36 = vpop.f32.mrf.mxu1 }
 0x391   : > { %v1091_v38 = vadd.f32 %v2842_v12, %v1090_v36  ;;  %v1113_v25 = vsel %vm1099_vm3, %v1096_v37, 0.0 }
 0x392   : > { %v1110_v39 = vadd.f32 %v1109_v24, %v1108_v35 }
 0x393   : > { %v1111_v40 = vsel %vm1099_vm3, %v1091_v38, 0.0 }
 0x394   : > { %v1112_v41 = vadd.f32 %v1111_v40, %v1110_v39 }
 0x396   : > { %v1114_v42 = vadd.f32 %v1113_v25, %v1112_v41 }
 0x398   : > { %v1115_v43 = vrot.slane %v1114_v42, 4 }
 0x39a   : > { %v1116_v44 = vadd.f32 %v1115_v43, %v1114_v42  ;;  %v1259_v42 = vlaneseq }
 0x39c   : > { %v1117_v45 = vrot.slane %v1116_v44, 2  ;;  %v4309_v43 = vand.u32 127, %v1259_v42 }
 0x39e   : > { %v1118_v46 = vadd.f32 %v1117_v45, %v1116_v44 }
 0x3a0   : > { %v1119_v47 = vrot.slane %v1118_v46, 1 }
 0x3a2   : > { %v1120_v48 = vadd.f32 %v1119_v47, %v1118_v46 }
 0x3a4   : > { %v1122_v49 = vmul.f32 0.015625, %v1120_v48 }
 0x3a6   : > { %v1123_v50 = vsub.f32 %v1061_v15, %v1122_v49  ;;  %v1124_v51 = vsub.f32 %v1066_v16, %v1122_v49  ;;  %v1125_v53 = vsub.f32 %v1071_v27, %v1122_v49  ;;  %v1126_v54 = vsub.f32 %v1076_v26, %v1122_v49 }
 0x3a7   : > { %v1127_v56 = vsub.f32 %v1081_v33, %v1122_v49  ;;  %v1128_v61 = vsub.f32 %v1086_v32, %v1122_v49  ;;  %v1129_v52 = vsub.f32 %v1091_v38, %v1122_v49  ;;  %v1130_v5 = vsub.f32 %v1096_v37, %v1122_v49 }
 0x3a8   : > { %v1131_v57 = vmul.f32 %v1123_v50, %v1123_v50  ;;  %v1132_v58 = vmul.f32 %v1124_v51, %v1124_v51  ;;  %v1133_v60 = vmul.f32 %v1125_v53, %v1125_v53  ;;  %v1134_v55 = vmul.f32 %v1126_v54, %v1126_v54 }
 0x3a9   : > { %v1135_v2 = vmul.f32 %v1127_v56, %v1127_v56  ;;  %v1136_v6 = vmul.f32 %v1128_v61, %v1128_v61  ;;  %v1137_v8 = vmul.f32 %v1129_v52, %v1129_v52  ;;  %v1138_v10 = vmul.f32 %v1130_v5, %v1130_v5 }
 0x3aa   : > { %v1139_v62 = vsel %vm1099_vm3, %v1131_v57, 0.0  ;;  %v1140_v63 = vsel %vm1099_vm3, %v1132_v58, 0.0  ;;  %v1142_v3 = vsel %vm1099_vm3, %v1133_v60, 0.0  ;;  %v1144_v7 = vsel %vm1099_vm3, %v1134_v55, 0.0 }
 0x3ab   : > { %v1141_v1 = vadd.f32 %v1140_v63, %v1139_v62  ;;  %v1146_v9 = vsel %vm1099_vm3, %v1135_v2, 0.0  ;;  %v1148_v4 = vsel %vm1099_vm3, %v1136_v6, 0.0  ;;  %v1150_v14 = vsel %vm1099_vm3, %v1137_v8, 0.0 }
 0x3ac   : > { %v1152_v16 = vsel %vm1099_vm3, %v1138_v10, 0.0 }
 0x3ad   : > { %v1143_v0 = vadd.f32 %v1142_v3, %v1141_v1 }
 0x3af   : > { %v1145_v59 = vadd.f32 %v1144_v7, %v1143_v0 }
 0x3b1   : > { %v1147_v11 = vadd.f32 %v1146_v9, %v1145_v59 }
 0x3b3   : > { %v1149_v12 = vadd.f32 %v1148_v4, %v1147_v11 }
 0x3b5   : > { %v1151_v15 = vadd.f32 %v1150_v14, %v1149_v12 }
 0x3b7   : > { %v1153_v20 = vadd.f32 %v1152_v16, %v1151_v15 }
 0x3b9   : > { %v1154_v13 = vrot.slane %v1153_v20, 4 }
 0x3bb   : > { %v1155_v21 = vadd.f32 %v1154_v13, %v1153_v20 }
 0x3bd   : > { %v1156_v22 = vrot.slane %v1155_v21, 2 }
 0x3bf   : > { %v1157_v26 = vadd.f32 %v1156_v22, %v1155_v21 }
 0x3c1   : > { %v1158_v27 = vrot.slane %v1157_v26, 1 }
 0x3c3   : > { %v1159_v28 = vadd.f32 %v1158_v27, %v1157_v26 }
 0x3c5   : > { %v1160_v29 = vmul.f32 0.015625, %v1159_v28 }
 0x3c7   : > { %v1161_v30 = vadd.f32 1e-05, %v1160_v29 }
 0x3c9   : > { %3397 = vrsqrt.f32 %v1161_v30 }
 0x3d6   : > { %v3398_v17 = vpop.eup %3397 }
 0x3d7   : > { %v4276_v31 = vmul.f32 %v3398_v17, %v1130_v5  ;;  %v4278_v18 = vmul.f32 %v3398_v17, %v1128_v61  ;;  %v4280_v32 = vmul.f32 %v3398_v17, %v1129_v52  ;;  %v4286_v34 = vmul.f32 %v3398_v17, %v1127_v56 }
 0x3d8   : > { %v4292_v36 = vmul.f32 %v3398_v17, %v1126_v54  ;;  %v4294_v24 = vmul.f32 %v3398_v17, %v1125_v53  ;;  %v4300_v39 = vmul.f32 %v3398_v17, %v1124_v51  ;;  %v4302_v40 = vmul.f32 %v3398_v17, %v1123_v50 }
 0x3d9   : > { %v1192_v33 = vsel %vm1099_vm3, %v4276_v31, -inf  ;;  %v1186_v19 = vsel %vm1099_vm3, %v4278_v18, -inf  ;;  %v1189_v23 = vsel %vm1099_vm3, %v4280_v32, -inf  ;;  %v1183_v35 = vsel %vm1099_vm3, %v4286_v34, -inf }
 0x3da   : > { %1193 = vmax.xlane.f32.xlu0 %v1192_v33  ;;  %1187 = vmax.xlane.f32.xlu1 %v1186_v19  ;;  %v1180_v37 = vsel %vm1099_vm3, %v4292_v36, -inf  ;;  %v1177_v38 = vsel %vm1099_vm3, %v4294_v24, -inf  ;;  %v1174_v41 = vsel %vm1099_vm3, %v4300_v39, -inf  ;;  %v1171_v25 = vsel %vm1099_vm3, %v4302_v40, -inf }
 0x3db   : > { %v1503_v22 = vmul.f32 %v4276_v31, %v4276_v31  ;;  %v1501_v28 = vmul.f32 %v4278_v18, %v4278_v18  ;;  %v1502_v29 = vmul.f32 %v4280_v32, %v4280_v32  ;;  %v1499_v33 = vmul.f32 %v4292_v36, %v4292_v36 }
 0x3dc   : > { %v1500_v19 = vmul.f32 %v4286_v34, %v4286_v34 }
 0x3dd   : > { %v1525_v27 = vsel %vm1099_vm3, %v1503_v22, 0.0  ;;  %v1519_v30 = vsel %vm1099_vm3, %v1501_v28, 0.0  ;;  %v1522_v17 = vsel %vm1099_vm3, %v1502_v29, 0.0 }
 0x3de   : > { %1190 = vmax.xlane.f32.xlu0 %v1189_v23  ;;  %1184 = vmax.xlane.f32.xlu1 %v1183_v35  ;;  %v1513_v23 = vsel %vm1099_vm3, %v1499_v33, 0.0  ;;  %v1516_v35 = vsel %vm1099_vm3, %v1500_v19, 0.0 }
 0x3e2   : > { %1181 = vmax.xlane.f32.xlu0 %v1180_v37  ;;  %1178 = vmax.xlane.f32.xlu1 %v1177_v38  ;;  %v1497_v37 = vmul.f32 %v4300_v39, %v4300_v39  ;;  %v1498_v38 = vmul.f32 %v4294_v24, %v4294_v24 }
 0x3e6   : > { %1175 = vmax.xlane.f32.xlu0 %v1174_v41  ;;  %1172 = vmax.xlane.f32.xlu1 %v1171_v25  ;;  %v1507_v41 = vsel %vm1099_vm3, %v1497_v37, 0.0  ;;  %v1510_v25 = vsel %vm1099_vm3, %v1498_v38, 0.0 }
 0x463   : > { %v4311_v44 = vpop.xlane.xlu0 %1193  ;;  %v4313_v45 = vpop.xlane.xlu1 %1187 }
 0x464   : > { %vm1268_vm4 = vcmp.eq.f32.partialorder %v4276_v31, %v4311_v44  ;;  %vm1266_vm5 = vcmp.eq.f32.partialorder %v4278_v18, %v4313_v45  ;;  %v1202_v28 = vsub.f32 %v4276_v31, %v4311_v44 }
 0x465   : > { %v1276_v46 = vsel %vm1268_vm4, %v4309_v43, 16  ;;  %v1274_v47 = vsel %vm1266_vm5, %v4309_v43, 16 }
 0x466   : > { %v4322_v48 = vsel %vm1099_vm3, %v1276_v46, 2147483647  ;;  %v4330_v53 = vsel %vm1099_vm3, %v1274_v47, 2147483647  ;;  %v1496_v46 = vmul.f32 %v4302_v40, %v4302_v40 }
 0x467   : > { %v4324_v49 = vpop.xlane.xlu0 %1190  ;;  %v4326_v50 = vpop.xlane.xlu1 %1184  ;;  %v1384_v51 = vshra.s32 %v4322_v48, 16  ;;  %v1354_v58 = vshra.s32 %v4330_v53, 16 }
 0x468   : > { %vm1267_vm6 = vcmp.eq.f32.partialorder %v4280_v32, %v4324_v49  ;;  %vm1265_vm7 = vcmp.eq.f32.partialorder %v4286_v34, %v4326_v50  ;;  %v1504_v47 = vsel %vm1099_vm3, %v1496_v46, 0.0 }
 0x469   : > { %v1275_v54 = vsel %vm1267_vm6, %v4309_v43, 16  ;;  %v4337_v56 = vcvt.s32.f32 %v1384_v51  ;;  %v1273_v57 = vsel %vm1265_vm7, %v4309_v43, 16  ;;  %v4354_v63 = vcvt.s32.f32 %v1354_v58 }
 0x46a   : > { %v4347_v55 = vsel %vm1099_vm3, %v1275_v54, 2147483647  ;;  %v4357_v1 = vsel %vm1099_vm3, %v1273_v57, 2147483647  ;;  %v1383_v51 = vand.u32 65535, %v4322_v48 }
 0x46b   : > { %v4341_v60 = vpop.xlane.xlu0 %1181  ;;  %v4343_v61 = vpop.xlane.xlu1 %1178  ;;  %1387 = vmin.xlane.f32.xlu0 %v4337_v56  ;;  %v1369_v2 = vshra.s32 %v4347_v55, 16  ;;  %v1339_v7 = vshra.s32 %v4357_v1, 16  ;;  %v1368_v48 = vand.u32 65535, %v4347_v55 }
 0x46c   : > { %vm1264_vm8 = vcmp.eq.f32.partialorder %v4292_v36, %v4341_v60  ;;  %vm1263_vm9 = vcmp.eq.f32.partialorder %v4294_v24, %v4343_v61  ;;  %v1197_v57 = vsub.f32 %v4294_v24, %v4343_v61 }
 0x46d   : > { %v1272_v62 = vsel %vm1264_vm8, %v4309_v43, 16  ;;  %v1271_v52 = vsel %vm1263_vm9, %v4309_v43, 16  ;;  %v4369_v6 = vcvt.s32.f32 %v1369_v2  ;;  %v4385_v12 = vcvt.s32.f32 %v1339_v7 }
 0x46e   : > { %v4365_v5 = vsel %vm1099_vm3, %v1272_v62, 2147483647  ;;  %v4375_v8 = vsel %vm1099_vm3, %v1271_v52, 2147483647  ;;  %v1385_v62 = vcvt.s32.f32 %v1383_v51  ;;  %v1353_v52 = vand.u32 65535, %v4330_v53 }
 0x46f   : > { %1357 = vmin.xlane.f32.xlu0 %v4354_v63  ;;  %v4362_v3 = vpop.xlane.xlu0 %1175  ;;  %v1173_v0 = vpop.xlane.xlu1 %1172  ;;  %1372 = vmin.xlane.f32.xlu1 %v4369_v6  ;;  %v1324_v11 = vshra.s32 %v4365_v5, 16  ;;  %v1309_v15 = vshra.s32 %v4375_v8, 16  ;;  %v1207_v61 = vmul.f32 1.442695, %v1197_v57  ;;  %v1198_v53 = vsub.f32 %v4292_v36, %v4341_v60 }
 0x470   : > { %vm1262_vm10 = vcmp.eq.f32.partialorder %v4300_v39, %v4362_v3  ;;  %vm1261_vm11 = vcmp.eq.f32.partialorder %v4302_v40, %v1173_v0  ;;  %v1195_v54 = vsub.f32 %v4302_v40, %v1173_v0  ;;  %v1196_v2 = vsub.f32 %v4300_v39, %v4362_v3 }
 0x471   : > { %v1270_v59 = vsel %vm1262_vm10, %v4309_v43, 16  ;;  %v1269_v9 = vsel %vm1261_vm11, %v4309_v43, 16  ;;  %v4383_v4 = vcvt.s32.f32 %v1324_v11  ;;  %v4396_v13 = vcvt.s32.f32 %v1309_v15 }
 0x472   : > { %v4381_v10 = vsel %vm1099_vm3, %v1270_v59, 2147483647  ;;  %v4390_v16 = vsel %vm1099_vm3, %v1269_v9, 2147483647  ;;  %v1203_v7 = vmul.f32 1.442695, %v1195_v54  ;;  %v1199_v0 = vsub.f32 %v4286_v34, %v4326_v50 }
 0x473   : > { %v1294_v14 = vshra.s32 %v4381_v10, 16  ;;  %1327 = vmin.xlane.f32.xlu0 %v4383_v4  ;;  %1342 = vmin.xlane.f32.xlu1 %v4385_v12  ;;  %v1279_v21 = vshra.s32 %v4390_v16, 16  ;;  %v1355_v11 = vcvt.s32.f32 %v1353_v52  ;;  %v1370_v55 = vcvt.s32.f32 %v1368_v48 }
 0x474   : > { %3399 = vpow2.f32 %v1203_v7  ;;  %v1323_v15 = vand.u32 65535, %v4365_v5  ;;  %v1338_v50 = vand.u32 65535, %v4357_v1  ;;  %v1211_v22 = vmul.f32 1.442695, %v1199_v0 }
 0x475   : > { %v4394_v20 = vcvt.s32.f32 %v1294_v14  ;;  %v4403_v26 = vcvt.s32.f32 %v1279_v21  ;;  %v1205_v14 = vmul.f32 1.442695, %v1196_v2  ;;  %v1200_v21 = vsub.f32 %v4278_v18, %v4313_v45 }
 0x476   : > { %3401 = vpow2.f32 %v1207_v61  ;;  %v1201_v60 = vsub.f32 %v4280_v32, %v4324_v49  ;;  %v1325_v45 = vcvt.s32.f32 %v1323_v15  ;;  %v1340_v29 = vcvt.s32.f32 %v1338_v50 }
 0x477   : > { %1297 = vmin.xlane.f32.xlu0 %v4394_v20  ;;  %1312 = vmin.xlane.f32.xlu1 %v4396_v13  ;;  %3403 = vpow2.f32 %v1205_v14 }
 0x478   : > { %3405 = vpow2.f32 %v1211_v22  ;;  %v1215_v44 = vmul.f32 1.442695, %v1201_v60 }
 0x47b   : > { %1526 = vadd.xlane.f32.xlu0 %v1525_v27  ;;  %1282 = vmin.xlane.f32.xlu1 %v4403_v26 }
 0x47f   : > { %1520 = vadd.xlane.f32.xlu0 %v1519_v30  ;;  %1523 = vadd.xlane.f32.xlu1 %v1522_v17  ;;  %v1293_v30 = vand.u32 65535, %v4381_v10  ;;  %v1213_v17 = vmul.f32 1.442695, %v1200_v21 }
 0x481   : > { %v1295_v10 = vcvt.s32.f32 %v1293_v30  ;;  %v4479_v38 = vpop.eup %3399 }
 0x483   : > { %1514 = vadd.xlane.f32.xlu0 %v1513_v23  ;;  %1517 = vadd.xlane.f32.xlu1 %v1516_v35  ;;  %v1278_v35 = vand.u32 65535, %v4390_v16 }
 0x485   : > { %v1280_v46 = vcvt.s32.f32 %v1278_v35 }
 0x487   : > { %1508 = vadd.xlane.f32.xlu0 %v1507_v41  ;;  %1511 = vadd.xlane.f32.xlu1 %v1510_v25 }
 0x48b   : > { %1505 = vadd.xlane.f32.xlu1 %v1504_v47 }
 0x4f4   : > { %v4432_v58 = vpop.xlane.xlu0 %1387 }
 0x4f5   : > { %vm1389_vm12 = vcmp.eq.f32.partialorder %v4337_v56, %v4432_v58 }
 0x4f6   : > { %v1390_v59 = vsel %vm1389_vm12, %v1385_v62, inf }
 0x4f7   : > { %1391 = vmin.xlane.f32.xlu0 %v1390_v59 }
 0x4f8   : > { %v4442_v9 = vpop.xlane.xlu0 %1357  ;;  %v4448_v3 = vpop.xlane.xlu1 %1372 }
 0x4f9   : > { %vm1359_vm13 = vcmp.eq.f32.partialorder %v4354_v63, %v4442_v9  ;;  %vm1374_vm14 = vcmp.eq.f32.partialorder %v4369_v6, %v4448_v3  ;;  %v1209_v63 = vmul.f32 1.442695, %v1198_v53  ;;  %v1308_v6 = vand.u32 65535, %v4375_v8 }
 0x4fa   : > { %v1360_v56 = vsel %vm1359_vm13, %v1355_v11, inf  ;;  %v1375_v27 = vsel %vm1374_vm14, %v1370_v55, inf  ;;  %vm1494_vm14 = vcmask 122880  }
 0x4fb   : > { %1361 = vmin.xlane.f32.xlu0 %v1360_v56  ;;  %1376 = vmin.xlane.f32.xlu1 %v1375_v27  ;;  %3407 = vpow2.f32 %v1209_v63  ;;  %v1310_v8 = vcvt.s32.f32 %v1308_v6 }
 0x4fc   : > { %v4460_v5 = vpop.xlane.xlu0 %1327  ;;  %v4462_v1 = vpop.xlane.xlu1 %1342  ;;  %3409 = vpow2.f32 %v1213_v17 }
 0x4fd   : > { %vm1329_vm15 = vcmp.eq.f32.partialorder %v4383_v4, %v4460_v5  ;;  %vm1344_vm0 = vcmp.eq.f32.partialorder %v4385_v12, %v4462_v1  ;;  %v1217_v4 = vmul.f32 1.442695, %v1202_v28  ;;  %3411 = vpow2.f32 %v1215_v44 }
 0x4fe   : > { %v1330_v49 = vsel %vm1329_vm15, %v1325_v45, inf  ;;  %v1345_v33 = vsel %vm1344_vm0, %v1340_v29, inf }
 0x4ff   : > { %1331 = vmin.xlane.f32.xlu0 %v1330_v49  ;;  %1346 = vmin.xlane.f32.xlu1 %v1345_v33  ;;  %3413 = vpow2.f32 %v1217_v4 }
 0x500   : > { %v4470_v19 = vpop.xlane.xlu0 %1297  ;;  %v4472_v23 = vpop.xlane.xlu1 %1312 }
 0x501   : > { %vm1299_vm1 = vcmp.eq.f32.partialorder %v4394_v20, %v4470_v19  ;;  %vm1314_vm4 = vcmp.eq.f32.partialorder %v4396_v13, %v4472_v23  ;;  %v4485_v20 = vpop.eup %3401  ;;  %v1219_v13 = vsel %vm1099_vm3, %v4479_v38, 0.0 }
 0x502   : > { %v1300_v12 = vsel %vm1299_vm1, %v1295_v10, inf  ;;  %v1315_v37 = vsel %vm1314_vm4, %v1310_v8, inf  ;;  %v4489_v51 = vpop.eup %3403 }
 0x503   : > { %1301 = vmin.xlane.f32.xlu0 %v1300_v12  ;;  %1316 = vmin.xlane.f32.xlu1 %v1315_v37  ;;  %v4491_v2 = vpop.eup %3405  ;;  %v1222_v7 = vsel %vm1099_vm3, %v4489_v51, 0.0 }
 0x504   : > { %v1527_v41 = vpop.xlane.xlu0 %1526  ;;  %v4481_v25 = vpop.xlane.xlu1 %1282  ;;  %v1231_v53 = vsel %vm1099_vm3, %v4491_v2, 0.0 }
 0x505   : > { %v1535_v16 = vmax.f32 %v1527_v41, 1e-24  ;;  %vm1284_vm5 = vcmp.eq.f32.partialorder %v4403_v26, %v4481_v25  ;;  %v1225_v26 = vsel %vm1099_vm3, %v4485_v20, 0.0 }
 0x506   : > { %v1285_v47 = vsel %vm1284_vm5, %v1280_v46, inf }
 0x507   : > { %3415 = vrsqrt.f32 %v1535_v16  ;;  %1220 = vadd.xlane.f32.xlu0 %v1219_v13  ;;  %1286 = vmin.xlane.f32.xlu1 %v1285_v47  ;;  %v1394_v47 = vcvt.f32.s32 %v4432_v58 }
 0x508   : > { %v1521_v54 = vpop.xlane.xlu0 %1520  ;;  %v1524_v57 = vpop.xlane.xlu1 %1523 }
 0x509   : > { %v1533_v62 = vmax.f32 %v1521_v54, 1e-24  ;;  %v1534_v52 = vmax.f32 %v1524_v57, 1e-24  ;;  %v4497_v59 = vpop.eup %3407  ;;  %v1395_v57 = vshll.u32 %v1394_v47, 16 }
 0x50a   : > { %v4499_v11 = vpop.eup %3409  ;;  %v1228_v14 = vsel %vm1099_vm3, %v4497_v59, 0.0 }
 0x50b   : > { %3417 = vrsqrt.f32 %v1533_v62  ;;  %1226 = vadd.xlane.f32.xlu0 %v1225_v26  ;;  %1223 = vadd.xlane.f32.xlu1 %v1222_v7  ;;  %v4505_v56 = vpop.eup %3411  ;;  %v1234_v50 = vsel %vm1099_vm3, %v4499_v11, 0.0  ;;  %v1364_v62 = vcvt.f32.s32 %v4442_v9  ;;  %v1379_v7 = vcvt.f32.s32 %v4448_v3 }
 0x50c   : > { %3419 = vrsqrt.f32 %v1534_v52  ;;  %v1518_v48 = vpop.xlane.xlu1 %1517  ;;  %v1515_v0 = vpop.xlane.xlu0 %1514  ;;  %v1237_v21 = vsel %vm1099_vm3, %v4505_v56, 0.0 }
 0x50d   : > { %v1532_v61 = vmax.f32 %v1518_v48, 1e-24  ;;  %v1531_v55 = vmax.f32 %v1515_v0, 1e-24  ;;  %v4511_v22 = vpop.eup %3413  ;;  %v1365_v0 = vshll.u32 %v1364_v62, 16  ;;  %v1380_v3 = vshll.u32 %v1379_v7, 16 }
 0x50e   : > { %v1240_v30 = vsel %vm1099_vm3, %v4511_v22, 0.0 }
 0x50f   : > { %1232 = vadd.xlane.f32.xlu0 %v1231_v53  ;;  %1229 = vadd.xlane.f32.xlu1 %v1228_v14  ;;  %3421 = vrsqrt.f32 %v1532_v61  ;;  %v3791_v53 = vmov 0.0  }
 0x510   : > { %v1512_v15 = vpop.xlane.xlu1 %1511  ;;  %3423 = vrsqrt.f32 %v1531_v55  ;;  %v1509_v28 = vpop.xlane.xlu0 %1508  ;;  %v1334_v55 = vcvt.f32.s32 %v4460_v5 }
 0x511   : > { %v1530_v63 = vmax.f32 %v1512_v15, 1e-24  ;;  %v1529_v17 = vmax.f32 %v1509_v28, 1e-24  ;;  %v1349_v15 = vcvt.f32.s32 %v4462_v1 }
 0x513   : > { %1235 = vadd.xlane.f32.xlu0 %v1234_v50  ;;  %1238 = vadd.xlane.f32.xlu1 %v1237_v21 }
 0x514   : > { %v3416_v60 = vpop.eup %3415  ;;  %v1506_v27 = vpop.xlane.xlu1 %1505 }
 0x515   : > { %v1528_v45 = vmax.f32 %v1506_v27, 1e-24  ;;  %v4514_v29 = vmul.f32 %v3416_v60, %v4276_v31  ;;  %v1335_v60 = vshll.u32 %v1334_v55, 16  ;;  %v1319_v27 = vcvt.f32.s32 %v4472_v23 }
 0x517   : > { %3425 = vrsqrt.f32 %v1528_v45  ;;  %3065 = vmatprep.subr.msk.mxu0 %vm1099_vm3, %v4514_v29  ;;  %1241 = vadd.xlane.f32.xlu1 %v1240_v30  ;;  %v1559_v13 = vmul.f32 2.0, %v4514_v29  ;;  %v1350_v45 = vshll.u32 %v1349_v15, 16 }
 0x518   : > { %v3418_v6 = vpop.eup %3417  ;;  %3427 = vrsqrt.f32 %v1530_v63  ;;  %3066 = vmatpush3.xpose.msk.msra.mxu0 %vm1099_vm3, %v4514_v29  ;;  %v1304_v63 = vcvt.f32.s32 %v4470_v19 }
 0x519   : > { %v3420_v44 = vpop.eup %3419  ;;  %3429 = vrsqrt.f32 %v1529_v17  ;;  %v1549_v31 = vmul.f32 %v3418_v6, %v4278_v18 }
 0x51a   : > { %v1550_v49 = vmul.f32 %v3420_v44, %v4280_v32  ;;  %v1305_v23 = vshll.u32 %v1304_v63, 16  ;;  %v1320_v44 = vshll.u32 %v1319_v27, 16 }
 0x51b   : > { %v1557_v46 = vmul.f32 2.0, %v1549_v31 }
 0x51c   : > { %3067 = vmatprep.subr.msk.mxu0 %vm1099_vm3, %v1550_v49  ;;  %v3422_v33 = vpop.eup %3421  ;;  %v1558_v16 = vmul.f32 2.0, %v1550_v49 }
 0x51d   : > { %3068 = vmatpush3.xpose.msk.msra.mxu0 %vm1099_vm3, %v1550_v49  ;;  %v1548_v10 = vmul.f32 %v3422_v33, %v4286_v34  ;;  %v3424_v8 = vpop.eup %3423 }
 0x51e   : > { %3069 = vmatprep.subr.msk.mxu0 %vm1099_vm3, %v1549_v31  ;;  %v1547_v32 = vmul.f32 %v3424_v8, %v4292_v36 }
 0x521   : > { %3070 = vmatpush3.xpose.msk.msra.mxu0 %vm1099_vm3, %v1549_v31 }
 0x522   : > { %3071 = vmatprep.subr.msk.mxu0 %vm1099_vm3, %v1548_v10 }
 0x524   : > { %v3426_v35 = vpop.eup %3425 }
 0x525   : > { %v3428_v4 = vpop.eup %3427  ;;  %v1544_v12 = vmul.f32 %v3426_v35, %v4302_v40  ;;  %3072 = vmatpush3.xpose.msk.msra.mxu0 %vm1099_vm3, %v1548_v10  ;;  %v1556_v40 = vmul.f32 2.0, %v1548_v10 }
 0x526   : > { %3073 = vmatprep.subr.msk.mxu0 %vm1099_vm3, %v1547_v32  ;;  %v1546_v37 = vmul.f32 %v3428_v4, %v4294_v24  ;;  %v3430_v41 = vpop.eup %3429 }
 0x527   : > { %v1552_v18 = vmul.f32 2.0, %v1544_v12  ;;  %v1545_v34 = vmul.f32 %v3430_v41, %v4300_v39  ;;  %v1555_v39 = vmul.f32 2.0, %v1547_v32 }
 0x528   : > { %v1554_v24 = vmul.f32 2.0, %v1546_v37 }
 0x529   : > { %3074 = vmatpush3.xpose.msk.msra.mxu0 %vm1099_vm3, %v1547_v32  ;;  %3081 = vmatprep.mubr.msk.f32.mxu0 %vm1099_vm3, %v1552_v18  ;;  %v1553_v36 = vmul.f32 2.0, %v1545_v34 }
 0x52a   : > { %3075 = vmatprep.subr.msk.mxu0 %vm1099_vm3, %v1546_v37 }
 0x52d   : > { %3076 = vmatpush3.xpose.msk.msra.mxu0 %vm1099_vm3, %v1546_v37 }
 0x52e   : > { %3077 = vmatprep.subr.msk.mxu0 %vm1099_vm3, %v1545_v34 }
 0x531   : > { %3078 = vmatpush3.xpose.msk.msra.mxu0 %vm1099_vm3, %v1545_v34 }
 0x532   : > { %3079 = vmatprep.subr.msk.mxu0 %vm1099_vm3, %v1544_v12 }
 0x535   : > { %3080 = vmatpush3.xpose.msk.msra.mxu0 %vm1099_vm3, %v1544_v12 }
 0x536   : > { %3109 = vmatprep.subr.msk.mxu0 %vm1099_vm3, %v4514_v29 }
 0x538   : > { %3082 = vmatmul.mubr.msk.f32.vlgmr.msra.gmra.mxu0 %vm1099_vm3, %v1553_v36 }
 0x539   : > { %3084 = vmatprep.mubr.msk.f32.mxu0 %vm1099_vm3, %v1554_v24  ;;  %3110 = vmatpush3.xpose.msk.msra.mxu0 %vm1099_vm3, %v4514_v29 }
 0x53a   : > { %3111 = vmatprep.subr.msk.mxu0 %vm1099_vm3, %v1550_v49 }
 0x53c   : > { %3085 = vmatmul.mubr.msk.f32.gmra.mxu0 %vm1099_vm3, %v1555_v39 }
 0x53d   : > { %3112 = vmatpush3.xpose.msk.msra.mxu0 %vm1099_vm3, %v1550_v49  ;;  %3125 = vmatprep.mubr.msk.f32.mxu0 %vm1099_vm3, %v1556_v40  ;;  %v1289_v49 = vcvt.f32.s32 %v4481_v25 }
 0x53e   : > { %3113 = vmatprep.subr.msk.mxu0 %vm1099_vm3, %v1549_v31 }
 0x541   : > { %3114 = vmatpush3.xpose.msk.msra.mxu0 %vm1099_vm3, %v1549_v31 }
 0x542   : > { %3115 = vmatprep.subr.msk.mxu0 %vm1099_vm3, %v1548_v10 }
 0x545   : > { %3116 = vmatpush3.xpose.msk.msra.mxu0 %vm1099_vm3, %v1548_v10 }
 0x546   : > { %3117 = vmatprep.subr.msk.mxu0 %vm1099_vm3, %v1547_v32 }
 0x549   : > { %3118 = vmatpush3.xpose.msk.msra.mxu0 %vm1099_vm3, %v1547_v32 }
 0x54a   : > { %3119 = vmatprep.subr.msk.mxu0 %vm1099_vm3, %v1546_v37 }
 0x54d   : > { %3120 = vmatpush3.xpose.msk.msra.mxu0 %vm1099_vm3, %v1546_v37 }
 0x54e   : > { %3121 = vmatprep.subr.msk.mxu0 %vm1099_vm3, %v1545_v34 }
 0x551   : > { %3122 = vmatpush3.xpose.msk.msra.mxu0 %vm1099_vm3, %v1545_v34 }
 0x552   : > { %3123 = vmatprep.subr.msk.mxu0 %vm1099_vm3, %v1544_v12 }
 0x555   : > { %3124 = vmatpush3.xpose.msk.msra.mxu0 %vm1099_vm3, %v1544_v12  ;;  %v1290_v12 = vshll.u32 %v1289_v49, 16 }
 0x558   : > { %3126 = vmatmul.mubr.msk.f32.vlgmr.msra.gmra.mxu0 %vm1099_vm3, %v1557_v46 }
 0x559   : > { %3128 = vmatprep.mubr.msk.f32.mxu0 %vm1099_vm3, %v1558_v16 }
 0x55c   : > { %3129 = vmatmul.mubr.msk.f32.gmra.mxu0 %vm1099_vm3, %v1559_v13 }
 0x580   : > { %v1392_v54 = vpop.xlane.xlu0 %1391 }
 0x581   : > { %v1393_v52 = vcvt.f32.s32 %v1392_v54 }
 0x583   : > { %v1396_v26 = vadd.s32 %v1395_v57, %v1393_v52 }
 0x584   : > { %v1362_v48 = vpop.xlane.xlu0 %1361  ;;  %v1377_v9 = vpop.xlane.xlu1 %1376 }
 0x585   : > { %vm1404_vm6 = vcmp.eq.s32.totalorder %v4309_v43, %v1396_v26  ;;  %v1363_v61 = vcvt.f32.s32 %v1362_v48  ;;  %v1378_v50 = vcvt.f32.s32 %v1377_v9 }
 0x586   : > { %v4575_v14 = vsel %vm1404_vm6, 1.0, %v3791_v53 }
 0x587   : > { %1472 = vst.msk [vmem:[#allocation3 + $0x38] sm:$0xff] %vm1099_vm3, %v4575_v14  ;;  %v1366_v58 = vadd.s32 %v1365_v0, %v1363_v61  ;;  %3087 = vmatprep.subr.msk.mxu1 %vm1099_vm3, %v4575_v14  ;;  %v1381_v5 = vadd.s32 %v1380_v3, %v1378_v50 }
 0x588   : > { %3088 = vmatpush3.xpose.msk.msra.mxu1 %vm1099_vm3, %v4575_v14  ;;  %v1332_v28 = vpop.xlane.xlu0 %1331  ;;  %v1347_v1 = vpop.xlane.xlu1 %1346 }
 0x589   : > { %vm1402_vm7 = vcmp.eq.s32.totalorder %v4309_v43, %v1366_v58  ;;  %vm1403_vm8 = vcmp.eq.s32.totalorder %v4309_v43, %v1381_v5  ;;  %v1333_v29 = vcvt.f32.s32 %v1332_v28  ;;  %v1348_v30 = vcvt.f32.s32 %v1347_v1 }
 0x58a   : > { %v4587_v21 = vsel %vm1402_vm7, 1.0, %v3791_v53  ;;  %v4595_v6 = vsel %vm1403_vm8, 1.0, %v3791_v53  ;;  %v1486_v28 = vsel %vm1099_vm3, %v4575_v14, 0.0 }
 0x58b   : > { %1470 = vst.msk [vmem:[#allocation3 + $0x28] sm:$0xff] %vm1099_vm3, %v4587_v21  ;;  %1471 = vst.msk [vmem:[#allocation3 + $0x30] sm:$0xff] %vm1099_vm3, %v4595_v6  ;;  %v1336_v17 = vadd.s32 %v1335_v60, %v1333_v29  ;;  %v1351_v19 = vadd.s32 %v1350_v45, %v1348_v30  ;;  %3089 = vmatprep.subr.msk.mxu1 %vm1099_vm3, %v4595_v6  ;;  %v1482_v9 = vsel %vm1099_vm3, %v4587_v21, 0.0  ;;  %v1484_v50 = vsel %vm1099_vm3, %v4595_v6, 0.0 }
 0x58c   : > { %v1302_v31 = vpop.xlane.xlu0 %1301  ;;  %3090 = vmatpush3.xpose.msk.msra.mxu1 %vm1099_vm3, %v4595_v6  ;;  %v1317_v33 = vpop.xlane.xlu1 %1316 }
 0x58d   : > { %vm1400_vm9 = vcmp.eq.s32.totalorder %v4309_v43, %v1336_v17  ;;  %vm1401_vm10 = vcmp.eq.s32.totalorder %v4309_v43, %v1351_v19  ;;  %v1303_v10 = vcvt.f32.s32 %v1302_v31  ;;  %v1318_v8 = vcvt.f32.s32 %v1317_v33  ;;  %3091 = vmatprep.subr.msk.mxu1 %vm1099_vm3, %v4587_v21 }
 0x58e   : > { %v4609_v35 = vsel %vm1400_vm9, 1.0, %v3791_v53  ;;  %v4612_v32 = vsel %vm1401_vm10, 1.0, %v3791_v53  ;;  %vm1891_vm9 = vcmask 7168  }
 0x58f   : > { %1468 = vst.msk [vmem:[#allocation3 + $0x18] sm:$0xff] %vm1099_vm3, %v4609_v35  ;;  %1469 = vst.msk [vmem:[#allocation3 + $0x20] sm:$0xff] %vm1099_vm3, %v4612_v32  ;;  %v1306_v25 = vadd.s32 %v1305_v23, %v1303_v10  ;;  %v1321_v4 = vadd.s32 %v1320_v44, %v1318_v8  ;;  %v1478_v26 = vsel %vm1099_vm3, %v4609_v35, 0.0  ;;  %v1480_v61 = vsel %vm1099_vm3, %v4612_v32, 0.0 }
 0x590   : > { %v1221_v18 = vpop.xlane.xlu0 %1220  ;;  %3092 = vmatpush3.xpose.msk.msra.mxu1 %vm1099_vm3, %v4587_v21  ;;  %v1287_v37 = vpop.xlane.xlu1 %1286  ;;  %2217 = vst.msk [vmem:[#allocation6] sm:$0xff] %vm1891_vm9, %v3791_v53  ;;  %2218 = vst.msk [vmem:[#allocation6 + $0x8] sm:$0xff] %vm1891_vm9, %v3791_v53 }
 0x591   : > { %vm1398_vm11 = vcmp.eq.s32.totalorder %v4309_v43, %v1306_v25  ;;  %vm1399_vm12 = vcmp.eq.s32.totalorder %v4309_v43, %v1321_v4  ;;  %3431 = vrcp.f32 %v1221_v18  ;;  %v1288_v41 = vcvt.f32.s32 %v1287_v37  ;;  %3093 = vmatprep.subr.msk.mxu1 %vm1099_vm3, %v4612_v32  ;;  %2219 = vst.msk [vmem:[#allocation7] sm:$0xff] %vm1891_vm9, %v3791_v53  ;;  %2220 = vst.msk [vmem:[#allocation7 + $0x8] sm:$0xff] %vm1891_vm9, %v3791_v53 }
 0x592   : > { %v4625_v34 = vsel %vm1398_vm11, 1.0, %v3791_v53  ;;  %v4628_v36 = vsel %vm1399_vm12, 1.0, %v3791_v53 }
 0x593   : > { %1466 = vst.msk [vmem:[#allocation3 + $0x8] sm:$0xff] %vm1099_vm3, %v4625_v34  ;;  %1467 = vst.msk [vmem:[#allocation3 + $0x10] sm:$0xff] %vm1099_vm3, %v4628_v36  ;;  %v1291_v24 = vadd.s32 %v1290_v12, %v1288_v41  ;;  %v1474_v16 = vsel %vm1099_vm3, %v4625_v34, 0.0  ;;  %v1476_v62 = vsel %vm1099_vm3, %v4628_v36, 0.0 }
 0x594   : > { %v1227_v39 = vpop.xlane.xlu0 %1226  ;;  %3094 = vmatpush3.xpose.msk.msra.mxu1 %vm1099_vm3, %v4612_v32  ;;  %v1224_v40 = vpop.xlane.xlu1 %1223 }
 0x595   : > { %vm1397_vm13 = vcmp.eq.s32.totalorder %v4309_v43, %v1291_v24  ;;  %3433 = vrcp.f32 %v1227_v39  ;;  %3095 = vmatprep.subr.msk.mxu1 %vm1099_vm3, %v4609_v35 }
 0x596   : > { %v4640_v46 = vsel %vm1397_vm13, 1.0, %v3791_v53  ;;  %3435 = vrcp.f32 %v1224_v40 }
 0x597   : > { %1465 = vst.msk [vmem:[#allocation3] sm:$0xff] %vm1099_vm3, %v4640_v46  ;;  %v1473_v13 = vsel %vm1099_vm3, %v4640_v46, 0.0  ;;  %3103 = vmatprep.mubr.msk.f32.mxu1 %vm1099_vm3, %v4640_v46 }
 0x598   : > { %v1475_v47 = vadd.f32 %v1474_v16, %v1473_v13  ;;  %v1233_v54 = vpop.xlane.xlu0 %1232  ;;  %3096 = vmatpush3.xpose.msk.msra.mxu1 %vm1099_vm3, %v4609_v35  ;;  %v1230_v57 = vpop.xlane.xlu1 %1229 }
 0x599   : > { %3437 = vrcp.f32 %v1233_v54  ;;  %3097 = vmatprep.subr.msk.mxu1 %vm1099_vm3, %v4628_v36 }
 0x59a   : > { %v1477_v52 = vadd.f32 %v1476_v62, %v1475_v47  ;;  %3439 = vrcp.f32 %v1230_v57 }
 0x59c   : > { %v1479_v7 = vadd.f32 %v1478_v26, %v1477_v52  ;;  %v1236_v48 = vpop.xlane.xlu0 %1235  ;;  %3098 = vmatpush3.xpose.msk.msra.mxu1 %vm1099_vm3, %v4628_v36  ;;  %v1239_v0 = vpop.xlane.xlu1 %1238 }
 0x59d   : > { %3441 = vrcp.f32 %v1236_v48  ;;  %3099 = vmatprep.subr.msk.mxu1 %vm1099_vm3, %v4625_v34 }
 0x59e   : > { %v3432_v55 = vpop.eup %3431  ;;  %v1481_v58 = vadd.f32 %v1480_v61, %v1479_v7  ;;  %3443 = vrcp.f32 %v1239_v0 }
 0x59f   : > { %v1244_v3 = vmul.f32 %v3432_v55, %v4479_v38 }
 0x5a0   : > { %v1483_v15 = vadd.f32 %v1482_v9, %v1481_v58  ;;  %3100 = vmatpush3.xpose.msk.msra.mxu1 %vm1099_vm3, %v4625_v34 }
 0x5a1   : > { %3101 = vmatprep.subr.msk.mxu1 %vm1099_vm3, %v4640_v46  ;;  %v1421_v63 = vsub.f32 %v4640_v46, %v1244_v3 }
 0x5a2   : > { %v3434_v5 = vpop.eup %3433  ;;  %v1485_v60 = vadd.f32 %v1484_v50, %v1483_v15 }
 0x5a3   : > { %v3436_v27 = vpop.eup %3435  ;;  %v1248_v38 = vmul.f32 %v3434_v5, %v4485_v20  ;;  %v1429_v23 = vmul.f32 %v1421_v63, %v1421_v63  ;;  %v4757_v5 = vshrl.u32 %v1259_v42, 7 }
 0x5a4   : > { %v1487_v1 = vadd.f32 %v1486_v28, %v1485_v60  ;;  %v1246_v45 = vmul.f32 %v3436_v27, %v4489_v51  ;;  %3102 = vmatpush3.xpose.msk.msra.mxu1 %vm1099_vm3, %v4640_v46 }
 0x5a5   : > { %3131 = vmatprep.subr.msk.mxu1 %vm1099_vm3, %v4575_v14  ;;  %v1423_v29 = vsub.f32 %v4628_v36, %v1248_v38  ;;  %v1437_v4 = vsel %vm1099_vm3, %v1429_v23, 0.0  ;;  %v4761_v63 = vadd.s32 8, %v4757_v5  ;;  %v4766_v27 = vadd.s32 24, %v4757_v5 }
 0x5a6   : > { %v3438_v30 = vpop.eup %3437  ;;  %v1488_v17 = vrot.slane %v1487_v1, 4  ;;  %v1422_v19 = vsub.f32 %v4625_v34, %v1246_v45  ;;  %vm1690_vm0 = vcmp.ne.s32.totalorder %v4757_v5, %v4309_v43  ;;  %v4771_v42 = vadd.s32 16, %v4757_v5 }
 0x5a7   : > { %v3440_v44 = vpop.eup %3439  ;;  %3104 = vmatmul.mubr.msk.f32.vlgmr.msra.gmra.mxu1 %vm1099_vm3, %v4625_v34  ;;  %v1252_v20 = vmul.f32 %v3438_v30, %v4491_v2  ;;  %v1431_v51 = vmul.f32 %v1423_v29, %v1423_v29  ;;  %vm1691_vm15 = vcmp.ne.s32.totalorder %v4761_v63, %v4309_v43  ;;  %vm1693_vm1 = vcmp.ne.s32.totalorder %v4766_v27, %v4309_v43 }
 0x5a8   : > { %v1489_v49 = vadd.f32 %v1488_v17, %v1487_v1  ;;  %v1250_v31 = vmul.f32 %v3440_v44, %v4497_v59  ;;  %3106 = vmatprep.mubr.msk.f32.mxu1 %vm1099_vm3, %v4628_v36  ;;  %3132 = vmatpush3.xpose.msk.msra.mxu1 %vm1099_vm3, %v4575_v14  ;;  %v1430_v33 = vmul.f32 %v1422_v19, %v1422_v19 }
 0x5a9   : > { %3133 = vmatprep.subr.msk.mxu1 %vm1099_vm3, %v4595_v6  ;;  %v1425_v10 = vsub.f32 %v4612_v32, %v1252_v20  ;;  %v1440_v40 = vsel %vm1099_vm3, %v1431_v51, 0.0  ;;  %vm1692_vm4 = vcmp.ne.s32.totalorder %v4771_v42, %v4309_v43 }
 0x5aa   : > { %v3442_v8 = vpop.eup %3441  ;;  %v1490_v25 = vrot.slane %v1489_v49, 2  ;;  %v1424_v2 = vsub.f32 %v4609_v35, %v1250_v31  ;;  %v1438_v59 = vsel %vm1099_vm3, %v1430_v33, 0.0 }
 0x5ab   : > { %v3444_v12 = vpop.eup %3443  ;;  %3107 = vmatmul.mubr.msk.f32.gmra.mxu1 %vm1099_vm3, %v4609_v35  ;;  %v1254_v18 = vmul.f32 %v3442_v8, %v4499_v11  ;;  %v1439_v37 = vadd.f32 %v1438_v59, %v1437_v4  ;;  %v1433_v13 = vmul.f32 %v1425_v10, %v1425_v10 }
 0x5ac   : > { %v1491_v41 = vadd.f32 %v1490_v25, %v1489_v49  ;;  %3134 = vmatpush3.xpose.msk.msra.mxu1 %vm1099_vm3, %v4595_v6  ;;  %3147 = vmatprep.mubr.msk.f32.mxu1 %vm1099_vm3, %v4612_v32  ;;  %v1256_v24 = vmul.f32 %v3444_v12, %v4505_v56  ;;  %v1432_v39 = vmul.f32 %v1424_v2, %v1424_v2 }
 0x5ad   : > { %3135 = vmatprep.subr.msk.mxu1 %vm1099_vm3, %v4587_v21  ;;  %v1426_v16 = vsub.f32 %v4587_v21, %v1254_v18  ;;  %v1441_v11 = vadd.f32 %v1440_v40, %v1439_v37  ;;  %v1444_v7 = vsel %vm1099_vm3, %v1433_v13, 0.0 }
 0x5ae   : > { %v1492_v47 = vrot.slane %v1491_v41, 1  ;;  %v1427_v54 = vsub.f32 %v4595_v6, %v1256_v24  ;;  %v1442_v57 = vsel %vm1099_vm3, %v1432_v39, 0.0  ;;  %v2011_v24 = vadd.s32 32, %v4757_v5 }
 0x5af   : > { %v1434_v62 = vmul.f32 %v1426_v16, %v1426_v16  ;;  %v1443_v56 = vadd.f32 %v1442_v57, %v1441_v11  ;;  %v2014_v39 = vadd.s32 32, %v4766_v27 }
 0x5b0   : > { %v1493_v52 = vadd.f32 %v1492_v47, %v1491_v41  ;;  %3136 = vmatpush3.xpose.msk.msra.mxu1 %vm1099_vm3, %v4587_v21  ;;  %v1435_v26 = vmul.f32 %v1427_v54, %v1427_v54  ;;  %v2012_v41 = vadd.s32 32, %v4761_v63  ;;  %vm2015_vm6 = vcmp.ne.s32.totalorder %v2011_v24, %v4309_v43  ;;  %v1242_v63 = vpop.xlane.xlu1 %1241 }
 0x5b1   : > { %3137 = vmatprep.subr.msk.mxu1 %vm1099_vm3, %v4612_v32  ;;  %v1446_v48 = vsel %vm1099_vm3, %v1434_v62, 0.0  ;;  %v1445_v0 = vadd.f32 %v1444_v7, %v1443_v56  ;;  %vm2018_vm7 = vcmp.ne.s32.totalorder %v2014_v39, %v4309_v43  ;;  %v2013_v47 = vadd.s32 32, %v4771_v42 }
 0x5b2   : > { %1495 = vst.msk [vmem:[#allocation4] sm:$0x1] %vm1494_vm14, %v1493_v52  ;;  %v1448_v55 = vsel %vm1099_vm3, %v1435_v26, 0.0  ;;  %vm2016_vm5 = vcmp.ne.s32.totalorder %v2012_v41, %v4309_v43 }
 0x5b3   : > { %v1447_v61 = vadd.f32 %v1446_v48, %v1445_v0  ;;  %vm2017_vm8 = vcmp.ne.s32.totalorder %v2013_v47, %v4309_v43 }
 0x5b4   : > { %3138 = vmatpush3.xpose.msk.msra.mxu1 %vm1099_vm3, %v4612_v32 }
 0x5b5   : > { %3139 = vmatprep.subr.msk.mxu1 %vm1099_vm3, %v4609_v35  ;;  %v4723_v58 = vadd.f32 %v1448_v55, %v1447_v61 }
 0x5b8   : > { %3140 = vmatpush3.xpose.msk.msra.mxu1 %vm1099_vm3, %v4609_v35 }
 0x5b9   : > { %3141 = vmatprep.subr.msk.mxu1 %vm1099_vm3, %v4628_v36 }
 0x5bc   : > { %3142 = vmatpush3.xpose.msk.msra.mxu1 %vm1099_vm3, %v4628_v36 }
 0x5bd   : > { %3143 = vmatprep.subr.msk.mxu1 %vm1099_vm3, %v4625_v34 }
 0x5c0   : > { %3144 = vmatpush3.xpose.msk.msra.mxu1 %vm1099_vm3, %v4625_v34 }
 0x5c1   : > { %3145 = vmatprep.subr.msk.mxu1 %vm1099_vm3, %v4640_v46 }
 0x5c4   : > { %3146 = vmatpush3.xpose.msk.msra.mxu1 %vm1099_vm3, %v4640_v46 }
 0x5c7   : > { %3148 = vmatmul.mubr.msk.f32.vlgmr.msra.gmra.mxu1 %vm1099_vm3, %v4587_v21 }
 0x5c8   : > { %3150 = vmatprep.mubr.msk.f32.mxu1 %vm1099_vm3, %v4595_v6 }
 0x5cb   : > { %3151 = vmatmul.mubr.msk.f32.gmra.mxu1 %vm1099_vm3, %v4575_v14 }
 0x5f8   : > { %v3083_v35 = vpop.f32.mrf.mxu0 }
 0x5f9   : > { %v4745_v32 = vadd.f32 -2.0, %v3083_v35 }
 0x5fa   : > { %v1662_v36 = vpop.f32.mrf.mxu0 }
 0x5fb   : > { %v1809_v34 = vmul.f32 1.442695, %v4745_v32  ;;  %v4748_v9 = vadd.f32 -2.0, %v1662_v36 }
 0x5fc   : > { %v3086_v3 = vpop.f32.mrf.mxu0 }
 0x5fd   : > { %3445 = vpow2.f32 %v1809_v34  ;;  %v1807_v46 = vmul.f32 1.442695, %v4748_v9  ;;  %v4751_v15 = vadd.f32 -2.0, %v3086_v3 }
 0x5fe   : > { %v1672_v21 = vpop.f32.mrf.mxu0 }
 0x5ff   : > { %3447 = vpow2.f32 %v1807_v46  ;;  %v1813_v6 = vmul.f32 1.442695, %v4751_v15  ;;  %v4754_v50 = vadd.f32 -2.0, %v1672_v21 }
 0x601   : > { %3449 = vpow2.f32 %v1813_v6  ;;  %v1811_v60 = vmul.f32 1.442695, %v4754_v50 }
 0x603   : > { %3451 = vpow2.f32 %v1811_v60 }
 0x60a   : > { %v3446_v28 = vpop.eup %3445 }
 0x60b   : > { %v1816_v38 = vsel %vm1691_vm15, %v3446_v28, 0.0 }
 0x60c   : > { %v3448_v1 = vpop.eup %3447  ;;  %v1822_v45 = vsel %vm753_vm2, %v1816_v38, 0.0 }
 0x60d   : > { %1823 = vadd.xlane.f32.xlu1 %v1822_v45  ;;  %v1815_v29 = vsel %vm1690_vm0, %v3448_v1, 0.0 }
 0x60e   : > { %v3450_v30 = vpop.eup %3449  ;;  %v1819_v17 = vsel %vm753_vm2, %v1815_v29, 0.0 }
 0x60f   : > { %1820 = vadd.xlane.f32.xlu0 %v1819_v17  ;;  %v1818_v19 = vsel %vm1693_vm1, %v3450_v30, 0.0 }
 0x610   : > { %v3452_v23 = vpop.eup %3451  ;;  %v1828_v44 = vsel %vm753_vm2, %v1818_v19, 0.0 }
 0x611   : > { %1829 = vadd.xlane.f32.xlu1 %v1828_v44  ;;  %v1817_v20 = vsel %vm1692_vm4, %v3452_v23, 0.0 }
 0x612   : > { %v1825_v51 = vsel %vm753_vm2, %v1817_v20, 0.0 }
 0x615   : > { %1826 = vadd.xlane.f32.xlu1 %v1825_v51 }
 0x618   : > { %v3127_v49 = vpop.f32.mrf.mxu0 }
 0x619   : > { %v4793_v31 = vadd.f32 -2.0, %v3127_v49 }
 0x61a   : > { %v1988_v33 = vpop.f32.mrf.mxu0 }
 0x61b   : > { %v2110_v10 = vmul.f32 1.442695, %v4793_v31  ;;  %v4796_v8 = vadd.f32 -2.0, %v1988_v33 }
 0x61c   : > { %v3130_v25 = vpop.f32.mrf.mxu0 }
 0x61d   : > { %3453 = vpow2.f32 %v2110_v10  ;;  %v2108_v2 = vmul.f32 1.442695, %v4796_v8  ;;  %v4799_v4 = vadd.f32 -2.0, %v3130_v25 }
 0x61e   : > { %v1998_v59 = vpop.f32.mrf.mxu0 }
 0x61f   : > { %3455 = vpow2.f32 %v2108_v2  ;;  %v2114_v12 = vmul.f32 1.442695, %v4799_v4  ;;  %v4802_v18 = vadd.f32 -2.0, %v1998_v59 }
 0x621   : > { %3457 = vpow2.f32 %v2114_v12  ;;  %v2112_v37 = vmul.f32 1.442695, %v4802_v18 }
 0x623   : > { %3459 = vpow2.f32 %v2112_v37 }
 0x624   : > { %3461 = vrcp.f32 %v1242_v63 }
 0x62a   : > { %v3454_v40 = vpop.eup %3453 }
 0x62b   : > { %v2117_v16 = vsel %vm2016_vm5, %v3454_v40, 0.0 }
 0x62c   : > { %v3456_v13 = vpop.eup %3455  ;;  %v2123_v11 = vsel %vm753_vm2, %v2117_v16, 0.0 }
 0x62d   : > { %2124 = vadd.xlane.f32.xlu1 %v2123_v11  ;;  %v2116_v54 = vsel %vm2015_vm6, %v3456_v13, 0.0 }
 0x62e   : > { %v3458_v57 = vpop.eup %3457  ;;  %v2120_v62 = vsel %vm753_vm2, %v2116_v54, 0.0 }
 0x62f   : > { %2121 = vadd.xlane.f32.xlu0 %v2120_v62  ;;  %v2119_v52 = vsel %vm2018_vm7, %v3458_v57, 0.0 }
 0x630   : > { %v3460_v56 = vpop.eup %3459  ;;  %v2129_v26 = vsel %vm753_vm2, %v2119_v52, 0.0 }
 0x631   : > { %v2118_v7 = vsel %vm2017_vm8, %v3460_v56, 0.0  ;;  %v3462_v23 = vpop.eup %3461 }
 0x632   : > { %v2126_v48 = vsel %vm753_vm2, %v2118_v7, 0.0  ;;  %v1258_v33 = vmul.f32 %v3462_v23, %v4511_v22 }
 0x633   : > { %2130 = vadd.xlane.f32.xlu0 %v2129_v26 }
 0x637   : > { %2127 = vadd.xlane.f32.xlu0 %v2126_v48 }
 0x667   : > { %v3105_v0 = vpop.f32.mrf.mxu1 }
 0x668   : > { %v1804_v61 = vsel %vm1691_vm15, %v3105_v0, 0.0 }
 0x669   : > { %v1784_v55 = vpop.f32.mrf.mxu1  ;;  %v1846_v35 = vsel %vm753_vm2, %v1804_v61, 0.0  ;;  %v1856_v44 = vmul.f32 %v4745_v32, %v1804_v61  ;;  %v1428_v32 = vsub.f32 %v4575_v14, %v1258_v33  ;;  %v3792_v14 = vmov -inf  }
 0x66a   : > { %v1803_v36 = vsel %vm1690_vm0, %v1784_v55, 0.0  ;;  %1847 = vadd.xlane.f32.xlu1 %v1846_v35  ;;  %2215 = vst.msk [vmem:[#allocation5] sm:$0xff] %vm1891_vm9, %v3792_v14  ;;  %2216 = vst.msk [vmem:[#allocation5 + $0x8] sm:$0xff] %vm1891_vm9, %v3792_v14 }
 0x66b   : > { %v3108_v34 = vpop.f32.mrf.mxu1  ;;  %v1843_v3 = vsel %vm753_vm2, %v1803_v36, 0.0  ;;  %v1855_v20 = vmul.f32 %v4748_v9, %v1803_v36  ;;  %v1862_v43 = vsel %vm753_vm2, %v1856_v44, 0.0 }
 0x66c   : > { %v1806_v46 = vsel %vm1693_vm1, %v3108_v34, 0.0  ;;  %1844 = vadd.xlane.f32.xlu0 %v1843_v3 }
 0x66d   : > { %v1794_v21 = vpop.f32.mrf.mxu1  ;;  %v1852_v6 = vsel %vm753_vm2, %v1806_v46, 0.0  ;;  %v1859_v2 = vsel %vm753_vm2, %v1855_v20, 0.0  ;;  %v1858_v9 = vmul.f32 %v4751_v15, %v1806_v46 }
 0x66e   : > { %v1805_v60 = vsel %vm1692_vm4, %v1794_v21, 0.0  ;;  %1853 = vadd.xlane.f32.xlu1 %v1852_v6 }
 0x66f   : > { %v1849_v5 = vsel %vm753_vm2, %v1805_v60, 0.0  ;;  %v1857_v10 = vmul.f32 %v4754_v50, %v1805_v60  ;;  %v1436_v50 = vmul.f32 %v1428_v32, %v1428_v32  ;;  %v1868_v41 = vsel %vm753_vm2, %v1858_v9, 0.0 }
 0x670   : > { %1850 = vadd.xlane.f32.xlu0 %v1849_v5 }
 0x671   : > { %v1865_v22 = vsel %vm753_vm2, %v1857_v10, 0.0 }
 0x687   : > { %v3149_v28 = vpop.f32.mrf.mxu1 }
 0x688   : > { %v2105_v38 = vsel %vm2016_vm5, %v3149_v28, 0.0 }
 0x689   : > { %v2085_v27 = vpop.f32.mrf.mxu1  ;;  %v2147_v1 = vsel %vm753_vm2, %v2105_v38, 0.0  ;;  %v2157_v59 = vmul.f32 %v4793_v31, %v2105_v38 }
 0x68a   : > { %v2104_v45 = vsel %vm2015_vm6, %v2085_v27, 0.0  ;;  %2148 = vadd.xlane.f32.xlu0 %v2147_v1 }
 0x68b   : > { %v3152_v29 = vpop.f32.mrf.mxu1  ;;  %v2144_v42 = vsel %vm753_vm2, %v2104_v45, 0.0  ;;  %v2156_v25 = vmul.f32 %v4796_v8, %v2104_v45  ;;  %v2163_v24 = vsel %vm753_vm2, %v2157_v59, 0.0 }
 0x68c   : > { %v2107_v30 = vsel %vm2018_vm7, %v3152_v29, 0.0  ;;  %2145 = vadd.xlane.f32.xlu1 %v2144_v42 }
 0x68d   : > { %v2095_v17 = vpop.f32.mrf.mxu1  ;;  %v2153_v51 = vsel %vm753_vm2, %v2107_v30, 0.0  ;;  %v2160_v12 = vsel %vm753_vm2, %v2156_v25, 0.0  ;;  %v2159_v8 = vmul.f32 %v4799_v4, %v2107_v30  ;;  %v1450_v4 = vsel %vm1099_vm3, %v1436_v50, 0.0 }
 0x68e   : > { %v2106_v19 = vsel %vm2017_vm8, %v2095_v17, 0.0 }
 0x68f   : > { %v2150_v49 = vsel %vm753_vm2, %v2106_v19, 0.0  ;;  %v2158_v37 = vmul.f32 %v4802_v18, %v2106_v19  ;;  %v2169_v15 = vsel %vm753_vm2, %v2159_v8, 0.0  ;;  %v1451_v18 = vadd.f32 %v1450_v4, %v4723_v58 }
 0x690   : > { %2154 = vadd.xlane.f32.xlu1 %v2153_v51  ;;  %2151 = vadd.xlane.f32.xlu0 %v2150_v49 }
 0x691   : > { %v2166_v31 = vsel %vm753_vm2, %v2158_v37, 0.0  ;;  %vm2212_vm2 = vcmask 0  }
 0x692   : > { %2221 = vst.msk [vmem:[#allocation8] sm:$0x1] %vm2212_vm2, %v3791_v53 }
 0x694   : > { %1863 = vadd.xlane.f32.xlu1 %v1862_v43  ;;  %1860 = vadd.xlane.f32.xlu0 %v1859_v2 }
 0x696   : > { %v1824_v40 = vpop.xlane.xlu1 %1823 }
 0x697   : > { %v1832_v54 = vmax.f32 %v1824_v40, 1e-30 }
 0x698   : > { %2161 = vadd.xlane.f32.xlu1 %v2160_v12  ;;  %1866 = vadd.xlane.f32.xlu0 %v1865_v22  ;;  %v1821_v39 = vpop.xlane.xlu0 %1820 }
 0x699   : > { %v1831_v62 = vmax.f32 %v1821_v39, 1e-30  ;;  %3463 = vlog2.f32 %v1832_v54 }
 0x69a   : > { %v1830_v13 = vpop.xlane.xlu1 %1829 }
 0x69b   : > { %v1834_v56 = vmax.f32 %v1830_v13, 1e-30  ;;  %3465 = vlog2.f32 %v1831_v62 }
 0x69c   : > { %1869 = vadd.xlane.f32.xlu1 %v1868_v41  ;;  %2164 = vadd.xlane.f32.xlu0 %v2163_v24 }
 0x69d   : > { %3467 = vlog2.f32 %v1834_v56 }
 0x69e   : > { %v1827_v47 = vpop.xlane.xlu1 %1826 }
 0x69f   : > { %v1833_v7 = vmax.f32 %v1827_v47, 1e-30 }
 0x6a0   : > { %2170 = vadd.xlane.f32.xlu1 %v2169_v15  ;;  %2167 = vadd.xlane.f32.xlu0 %v2166_v31 }
 0x6a1   : > { %3469 = vlog2.f32 %v1833_v7 }
 0x6a4   : > { %1452 = vadd.xlane.f32.xlu0 %v1451_v18 }
 0x6a6   : > { %v3464_v5 = vpop.eup %3463 }
 0x6a7   : > { %v1838_v27 = vmul.f32 0.6931472, %v3464_v5 }
 0x6a8   : > { %v3466_v38 = vpop.eup %3465 }
 0x6a9   : > { %v1836_v42 = vmul.f32 0.6931472, %v3466_v38 }
 0x6aa   : > { %v3468_v29 = vpop.eup %3467 }
 0x6ab   : > { %v1842_v50 = vmul.f32 0.6931472, %v3468_v29 }
 0x6ae   : > { %v3470_v19 = vpop.eup %3469 }
 0x6af   : > { %v1840_v25 = vmul.f32 0.6931472, %v3470_v19 }
 0x6b6   : > { %v2125_v52 = vpop.xlane.xlu1 %2124 }
 0x6b7   : > { %v2133_v0 = vmax.f32 %v2125_v52, 1e-30 }
 0x6b8   : > { %v2122_v16 = vpop.xlane.xlu0 %2121 }
 0x6b9   : > { %v2132_v61 = vmax.f32 %v2122_v16, 1e-30  ;;  %3471 = vlog2.f32 %v2133_v0 }
 0x6bb   : > { %3473 = vlog2.f32 %v2132_v61 }
 0x6bc   : > { %v2131_v11 = vpop.xlane.xlu0 %2130 }
 0x6bd   : > { %v2135_v36 = vmax.f32 %v2131_v11, 1e-30 }
 0x6c0   : > { %v2128_v57 = vpop.xlane.xlu0 %2127 }
 0x6c1   : > { %v2134_v34 = vmax.f32 %v2128_v57, 1e-30 }
 0x6c6   : > { %v3472_v23 = vpop.eup %3471 }
 0x6c7   : > { %v2139_v8 = vmul.f32 0.6931472, %v3472_v23 }
 0x6c8   : > { %v3474_v51 = vpop.eup %3473 }
 0x6c9   : > { %v2137_v14 = vmul.f32 0.6931472, %v3474_v51 }
 0x6f3   : > { %v1848_v48 = vpop.xlane.xlu1 %1847 }
 0x6f4   : > { %v1880_v58 = vmax.f32 %v1848_v48, 1.0  ;;  %v1872_v44 = vmul.f32 %v1848_v48, %v1838_v27 }
 0x6f5   : > { %v1845_v26 = vpop.xlane.xlu0 %1844 }
 0x6f6   : > { %v1879_v55 = vmax.f32 %v1845_v26, 1.0  ;;  %3475 = vrcp.f32 %v1880_v58  ;;  %v1871_v20 = vmul.f32 %v1845_v26, %v1836_v42 }
 0x6f7   : > { %v1854_v3 = vpop.xlane.xlu1 %1853 }
 0x6f8   : > { %3477 = vrcp.f32 %v1879_v55  ;;  %v1882_v6 = vmax.f32 %v1854_v3, 1.0  ;;  %v1874_v4 = vmul.f32 %v1854_v3, %v1842_v50 }
 0x6f9   : > { %v1851_v35 = vpop.xlane.xlu0 %1850  ;;  %3479 = vlog2.f32 %v2135_v36 }
 0x6fa   : > { %v1881_v46 = vmax.f32 %v1851_v35, 1.0  ;;  %3481 = vlog2.f32 %v2134_v34  ;;  %v1873_v9 = vmul.f32 %v1851_v35, %v1840_v25 }
 0x6fc   : > { %3483 = vrcp.f32 %v1881_v46 }
 0x703   : > { %v3476_v10 = vpop.eup %3475 }
 0x705   : > { %v3478_v32 = vpop.eup %3477 }
 0x706   : > { %v3480_v22 = vpop.eup %3479 }
 0x707   : > { %v3482_v24 = vpop.eup %3481  ;;  %v2143_v54 = vmul.f32 0.6931472, %v3480_v22 }
 0x708   : > { %v2141_v47 = vmul.f32 0.6931472, %v3482_v24 }
 0x709   : > { %v3484_v31 = vpop.eup %3483 }
 0x713   : > { %v2149_v21 = vpop.xlane.xlu0 %2148 }
 0x714   : > { %v2181_v63 = vmax.f32 %v2149_v21, 1.0  ;;  %v2173_v18 = vmul.f32 %v2149_v21, %v2139_v8 }
 0x715   : > { %v2146_v60 = vpop.xlane.xlu1 %2145 }
 0x716   : > { %v2180_v28 = vmax.f32 %v2146_v60, 1.0  ;;  %v2172_v39 = vmul.f32 %v2146_v60, %v2137_v14 }
 0x718   : > { %3485 = vrcp.f32 %v2180_v28 }
 0x719   : > { %3487 = vrcp.f32 %v1882_v6  ;;  %v2152_v1 = vpop.xlane.xlu0 %2151  ;;  %v2155_v45 = vpop.xlane.xlu1 %2154 }
 0x71a   : > { %3489 = vrcp.f32 %v2181_v63  ;;  %v2182_v30 = vmax.f32 %v2152_v1, 1.0  ;;  %v2183_v17 = vmax.f32 %v2155_v45, 1.0  ;;  %v2174_v61 = vmul.f32 %v2152_v1, %v2141_v47 }
 0x71b   : > { %v2175_v55 = vmul.f32 %v2155_v45, %v2143_v54 }
 0x71c   : > { %3491 = vrcp.f32 %v2182_v30 }
 0x71d   : > { %v1861_v49 = vpop.xlane.xlu0 %1860  ;;  %v1864_v33 = vpop.xlane.xlu1 %1863  ;;  %3493 = vrcp.f32 %v2183_v17 }
 0x71e   : > { %v1875_v43 = vsub.f32 %v1861_v49, %v1871_v20  ;;  %v1876_v2 = vsub.f32 %v1864_v33, %v1872_v44 }
 0x720   : > { %v1884_v59 = vmul.f32 %v3478_v32, %v1875_v43  ;;  %v1886_v12 = vmul.f32 %v3476_v10, %v1876_v2 }
 0x721   : > { %v1867_v37 = vpop.xlane.xlu0 %1866  ;;  %v2162_v41 = vpop.xlane.xlu1 %2161 }
 0x722   : > { %v1877_v15 = vsub.f32 %v1867_v37, %v1873_v9  ;;  %v1892_v40 = vsel %vm1891_vm9, %v1884_v59, 0.0  ;;  %v1893_v16 = vsel %vm1891_vm9, %v1886_v12, 0.0  ;;  %v2176_v56 = vsub.f32 %v2162_v41, %v2172_v39 }
 0x723   : > { %v1894_v58 = vadd.f32 %v1893_v16, %v1892_v40 }
 0x724   : > { %v1888_v13 = vmul.f32 %v3484_v31, %v1877_v15 }
 0x725   : > { %v3486_v11 = vpop.eup %3485  ;;  %v2165_v57 = vpop.xlane.xlu0 %2164 }
 0x726   : > { %v1870_v62 = vpop.xlane.xlu1 %1869  ;;  %v3488_v52 = vpop.eup %3487  ;;  %v2177_v26 = vsub.f32 %v2165_v57, %v2173_v18  ;;  %v1895_v48 = vsel %vm1891_vm9, %v1888_v13, 0.0  ;;  %v2185_v35 = vmul.f32 %v3486_v11, %v2176_v56 }
 0x727   : > { %v1878_v7 = vsub.f32 %v1870_v62, %v1874_v4  ;;  %v3490_v0 = vpop.eup %3489  ;;  %v1896_v21 = vadd.f32 %v1895_v48, %v1894_v58 }
 0x728   : > { %v2187_v36 = vmul.f32 %v3490_v0, %v2177_v26  ;;  %v2192_v29 = vsel %vm1891_vm9, %v2185_v35, 0.0 }
 0x729   : > { %v1890_v34 = vmul.f32 %v3488_v52, %v1878_v7  ;;  %v2168_v3 = vpop.xlane.xlu0 %2167  ;;  %v3492_v6 = vpop.eup %3491 }
 0x72a   : > { %v2171_v46 = vpop.xlane.xlu1 %2170  ;;  %v2193_v60 = vsel %vm1891_vm9, %v2187_v36, 0.0  ;;  %v2178_v5 = vsub.f32 %v2168_v3, %v2174_v61  ;;  %v3494_v38 = vpop.eup %3493 }
 0x72b   : > { %v2179_v63 = vsub.f32 %v2171_v46, %v2175_v55  ;;  %v1897_v28 = vsel %vm1891_vm9, %v1890_v34, 0.0  ;;  %v2194_v30 = vadd.f32 %v2193_v60, %v2192_v29 }
 0x72c   : > { %v1898_v27 = vadd.f32 %v1897_v28, %v1896_v21  ;;  %v2189_v1 = vmul.f32 %v3492_v6, %v2178_v5 }
 0x72d   : > { %v2191_v42 = vmul.f32 %v3494_v38, %v2179_v63  ;;  %v1453_v45 = vpop.xlane.xlu0 %1452 }
 0x72e   : > { %1899 = vadd.xlane.f32.xlu1 %v1898_v27  ;;  %v1454_v17 = vrot.slane %v1453_v45, 4  ;;  %v2195_v19 = vsel %vm1891_vm9, %v2189_v1, 0.0 }
 0x72f   : > { %v2196_v23 = vadd.f32 %v2195_v19, %v2194_v30  ;;  %v2197_v20 = vsel %vm1891_vm9, %v2191_v42, 0.0 }
 0x730   : > { %v1455_v44 = vadd.f32 %v1454_v17, %v1453_v45 }
 0x731   : > { %v2198_v51 = vadd.f32 %v2197_v20, %v2196_v23 }
 0x732   : > { %v1456_v49 = vrot.slane %v1455_v44, 2 }
 0x733   : > { %2199 = vadd.xlane.f32.xlu0 %v2198_v51 }
 0x734   : > { %v1457_v33 = vadd.f32 %v1456_v49, %v1455_v44 }
 0x736   : > { %v1458_v10 = vrot.slane %v1457_v33, 1 }
 0x738   : > { %v1459_v25 = vadd.f32 %v1458_v10, %v1457_v33 }
 0x73a   : > { %3169 = vpush %v1459_v25 }
 0x76b   : > { %s3170_s29 = spop %3169 }
 0x76c   : > { %v1461_v31 = vstv %s3170_s29 }
 0x76d   : > { %v1462_v4 = vmul.f32 1.25, %v1461_v31 }
 0x76f   : > { %v1464_v16 = vmul.f32 0.0009765625, %v1462_v4 }
 0x7b7   : > { %v1900_v43 = vpop.xlane.xlu1 %1899 }
 0x7b8   : > { %v1901_v2 = vrot.slane %v1900_v43, 4 }
 0x7ba   : > { %v1902_v32 = vadd.f32 %v1901_v2, %v1900_v43 }
 0x7bc   : > { %v1903_v9 = vrot.slane %v1902_v32, 2  ;;  %v2200_v59 = vpop.xlane.xlu0 %2199 }
 0x7bd   : > { %v2201_v22 = vrot.slane %v2200_v59, 4 }
 0x7be   : > { %v1904_v12 = vadd.f32 %v1903_v9, %v1902_v32 }
 0x7bf   : > { %v2202_v50 = vadd.f32 %v2201_v22, %v2200_v59 }
 0x7c0   : > { %v1905_v8 = vrot.slane %v1904_v12, 1 }
 0x7c1   : > { %v2203_v37 = vrot.slane %v2202_v50, 2 }
 0x7c2   : > { %v1906_v41 = vadd.f32 %v1905_v8, %v1904_v12 }
 0x7c3   : > { %v2204_v24 = vadd.f32 %v2203_v37, %v2202_v50 }
 0x7c4   : > { %3171 = vpush %v1906_v41 }
 0x7c5   : > { %v2205_v14 = vrot.slane %v2204_v24, 1 }
 0x7c7   : > { %v2206_v15 = vadd.f32 %v2205_v14, %v2204_v24 }
 0x7c9   : > { %3173 = vpush %v2206_v15 }
 0x7f5   : > { %s3172_s10 = spop %3171 }
 0x7f6   : > { %v1908_v53 = vstv %s3172_s10 }
 0x7f7   : > { %v1909_v18 = vsub.f32 0.0, %v1908_v53 }
 0x7fa   : > { %s3174_s2 = spop %3173 }
 0x7fb   : > { %v2208_v39 = vstv %s3174_s2 }
 0x7fc   : > { %v2209_v40 = vsub.f32 %v1909_v18, %v2208_v39 }
 0x7fe   : > { %v2210_v13 = vmul.f32 0.015625, %v2209_v40 }
 0x800   : > { %v2211_v11 = vadd.f32 %v2210_v13, %v1464_v16  ;;  %2214 = vst.msk [vmem:[#allocation10] sm:$0x1] %vm2212_vm2, %v2210_v13 }
 0x802   : > { %2213 = vst.msk [vmem:[#allocation9] sm:$0x1] %vm2212_vm2, %v2211_v11 }
 0x803 PF: > { %s5115_s5 = sld [smem:[#allocation29_spill]] }
 0x809   : > { %p2915_p1 = scmp.ne.s32.totalorder %s5115_s5, 1 }
 0x80b   : > { %2224 = sbr.rel (%p2915_p1) target bundleno = 2923 (0xb6b), region = 80 }
 0x810   : > { %v4898_v47 = vld [vmem:[%s402_s4 + $0x8] sm:$0xff]  ;;  %v4902_v54 = vld [vmem:[%s402_s4] sm:$0xff]  ;;  %v3793_v26 = vmov 0.0   ;;  %vm2249_vm3 = vcmask 130048   ;;  %vm2465_vm10 = vcmask 523264   ;;  %v2324_v20 = vlaneseq }
 0x811   : > { %v2247_v57 = vld [vmem:[#allocation4] sm:$0x1]  ;;  %v2246_v62 = vunpack.c.h.bf16 %v4898_v47  ;;  %v2245_v52 = vunpack.c.l.bf16 %v4898_v47  ;;  %v2244_v56 = vunpack.c.h.bf16 %v4902_v54  ;;  %2317 = vmatprep.mubr.f32.mxu1 %v3793_v26  ;;  %2536 = vmatprep.mubr.f32.mxu0 %v3793_v26  ;;  %v2243_v48 = vunpack.c.l.bf16 %v4902_v54  ;;  %v2426_v61 = vld [vmem:[#allocation3 + $0x8] sm:$0xff]  ;;  %v2427_v58 = vld [vmem:[#allocation3 + $0x10] sm:$0xff] }
 0x812   : > { %v2425_v7 = vld [vmem:[#allocation3] sm:$0xff]  ;;  %v4912_v0 = vmul.f32 0.015625, %v2247_v57  ;;  %v2428_v55 = vld [vmem:[#allocation3 + $0x18] sm:$0xff]  ;;  %v2430_v36 = vld [vmem:[#allocation3 + $0x28] sm:$0xff]  ;;  %v2325_v51 = vshrl.u32 %v2324_v20, 7  ;;  %v3794_v47 = vmov 0  }
 0x813   : > { %2433 = vxpose.xlu0.b32.start [1/8] (short) (narrow) %v2425_v7, 16  ;;  %2281 = vmatprep.subr.mxu1 %v2246_v62  ;;  %v2429_v35 = vld [vmem:[#allocation3 + $0x20] sm:$0xff]  ;;  %v2431_v34 = vld [vmem:[#allocation3 + $0x30] sm:$0xff]  ;;  %v2432_v3 = vld [vmem:[#allocation3 + $0x38] sm:$0xff]  ;;  %vm2580_vm11 = vcmask 7168   ;;  %vm2568_vm12 = vcmask 0  }
 0x814   : > { %2282 = vmatpush1.msra.mxu1 %v2245_v52  ;;  %v2240_v46 = vld [vmem:[%s4059_s28 + $0x78] sm:$0xff]  ;;  %v2239_v21 = vld [vmem:[%s4059_s28 + $0x70] sm:$0xff]  ;;  %v2238_v6 = vld [vmem:[%s4059_s28 + $0x68] sm:$0xff]  ;;  %v2326_v49 = vsub.s32 0, %v2325_v51  ;;  %3495 = vset.pattern.permute.xlu1 %v3794_v47 }
 0x815   : > { %2283 = vmatprep.subr.mxu1 %v2244_v56  ;;  %2488 = vmatprep.subr.mxu0 %v2240_v46  ;;  %v2237_v60 = vld [vmem:[%s4059_s28 + $0x60] sm:$0xff]  ;;  %v2236_v5 = vld [vmem:[%s4059_s28 + $0x58] sm:$0xff]  ;;  %v2235_v63 = vld [vmem:[%s4059_s28 + $0x50] sm:$0xff] }
 0x816   : > { %2284 = vmatpush1.msra.mxu1 %v2243_v48  ;;  %2489 = vmatpush1.msra.mxu0 %v2239_v21  ;;  %v2234_v28 = vld [vmem:[%s4059_s28 + $0x48] sm:$0xff]  ;;  %v2233_v38 = vld [vmem:[%s4059_s28 + $0x40] sm:$0xff]  ;;  %v2232_v27 = vld [vmem:[%s4059_s28 + $0x38] sm:$0xff] }
 0x817   : > { %2434 = vxpose.xlu0.b32.cont [2/8] (short) (narrow) %v2426_v61, 16  ;;  %2916 = vmatmul.mubr.msk.f32.vlgmr.msra.gmra.mxu1 %vm2249_vm3, %v4912_v0  ;;  %v2231_v29 = vld [vmem:[%s4059_s28 + $0x30] sm:$0xff]  ;;  %v2230_v1 = vld [vmem:[%s4059_s28 + $0x28] sm:$0xff]  ;;  %v2229_v42 = vld [vmem:[%s4059_s28 + $0x20] sm:$0xff] }
 0x818   : > { %2404 = vmatprep.mubr.f32.mxu1 %v3793_v26  ;;  %2490 = vmatprep.subr.mxu0 %v2238_v6  ;;  %v2228_v45 = vld [vmem:[%s4059_s28 + $0x18] sm:$0xff]  ;;  %v2227_v30 = vld [vmem:[%s4059_s28 + $0x10] sm:$0xff]  ;;  %v2226_v17 = vld [vmem:[%s4059_s28 + $0x8] sm:$0xff] }
 0x819   : > { %2491 = vmatpush1.msra.mxu0 %v2237_v60  ;;  %v2225_v19 = vld [vmem:[%s4059_s28] sm:$0xff]  ;;  %v4955_v7 = vld [vmem:[#allocation5 + $0x8] sm:$0xff] }
 0x81a   : > { %2492 = vmatprep.subr.mxu0 %v2236_v5 }
 0x81b   : > { %2435 = vxpose.xlu0.b32.cont [3/8] (short) (narrow) %v2427_v58, 16  ;;  %2493 = vmatpush1.msra.mxu0 %v2235_v63  ;;  %v2570_v63 = vld [vmem:[#allocation7] sm:$0xff] }
 0x81c   : > { %2494 = vmatprep.subr.mxu0 %v2234_v28 }
 0x81d   : > { %2495 = vmatpush1.msra.mxu0 %v2233_v38 }
 0x81e   : > { %2496 = vmatprep.subr.mxu0 %v2232_v27 }
 0x81f   : > { %2436 = vxpose.xlu0.b32.cont [4/8] (short) (narrow) %v2428_v55, 16  ;;  %2497 = vmatpush1.msra.mxu0 %v2231_v29 }
 0x820   : > { %2498 = vmatprep.subr.mxu0 %v2230_v1 }
 0x821   : > { %2499 = vmatpush1.msra.mxu0 %v2229_v42 }
 0x822   : > { %2500 = vmatprep.subr.mxu0 %v2228_v45 }
 0x823   : > { %2437 = vxpose.xlu0.b32.cont [5/8] (short) (narrow) %v2429_v35, 16  ;;  %2501 = vmatpush1.msra.mxu0 %v2227_v30 }
 0x824   : > { %2502 = vmatprep.subr.mxu0 %v2226_v17 }
 0x825   : > { %2503 = vmatpush1.msra.mxu0 %v2225_v19 }
 0x827   : > { %2438 = vxpose.xlu0.b32.cont [6/8] (short) (narrow) %v2430_v36, 16 }
 0x82b   : > { %2439 = vxpose.xlu0.b32.cont [7/8] (short) (narrow) %v2431_v34, 16 }
 0x82f   : > { %2440 = vxpose.xlu0.b32.end [8/8] (short) (narrow) %v2432_v3, 16 }
 0x858   : > { %3496 = vset.pattern.permute.xlu0 %v3794_v47 }
 0x88f   : > { %v2449_v23 = vpop.trf.xlu0 }
 0x890   : > { %2918 = vmatmul.mubr.msk.f32.vlgmr.msra.gmra.mxu0 %vm2465_vm10, %v2449_v23 }
 0x891   : > { %2542 = vmatprep.mubr.f32.mxu0 %v3793_v26 }
 0x893   : > { %v2450_v44 = vpop.trf.xlu0 }
 0x894   : > { %2919 = vmatmul.mubr.msk.f32.gmra.mxu0 %vm2465_vm10, %v2450_v44 }
 0x8d7   : > { %v2319_v33 = vpop.f32.mrf.mxu1 }
 0x8d8   : > { %v2327_v10 = vrot.slane %v2319_v33, %v2326_v49 }
 0x8d9   : > { %v2321_v25 = vpop.f32.mrf.mxu1 }
 0x8da   : > { %v2331_v43 = vrot.slane %v2321_v25, %v2326_v49  ;;  %v2334_v2 = vsub.f32 %v2245_v52, %v2327_v10  ;;  %v2332_v59 = vsub.f32 %v2243_v48, %v2327_v10  ;;  %v4950_v52 = vld [vmem:[#allocation5] sm:$0xff] }
 0x8dc   : > { %v2333_v32 = vsub.f32 %v2244_v56, %v2331_v43  ;;  %v2335_v9 = vsub.f32 %v2246_v62, %v2331_v43  ;;  %v2338_v22 = vmul.f32 %v2334_v2, %v2334_v2  ;;  %v2336_v8 = vmul.f32 %v2332_v59, %v2332_v59 }
 0x8de   : > { %v2339_v12 = vmul.f32 %v2335_v9, %v2335_v9  ;;  %v2337_v50 = vmul.f32 %v2333_v32, %v2333_v32 }
 0x8e0   : > { %2368 = vmatprep.subr.mxu1 %v2339_v12 }
 0x8e1   : > { %2369 = vmatpush1.msra.mxu1 %v2338_v22 }
 0x8e2   : > { %2370 = vmatprep.subr.mxu1 %v2337_v50 }
 0x8e3   : > { %2371 = vmatpush1.msra.mxu1 %v2336_v8 }
 0x8e4   : > { %2917 = vmatmul.mubr.msk.f32.vlgmr.msra.gmra.mxu1 %vm2249_vm3, %v4912_v0 }
 0x950   : > { %v2538_v54 = vpop.f32.mrf.mxu0 }
 0x952   : > { %v2540_v57 = vpop.f32.mrf.mxu0 }
 0x953   : > { %v2572_v62 = vadd.f32 %v2540_v57, %v2538_v54 }
 0x954   : > { %v2544_v36 = vpop.f32.mrf.mxu0 }
 0x955   : > { %2573 = vadd.xlane.f32.xlu0 %v2572_v62 }
 0x956   : > { %v2546_v46 = vpop.f32.mrf.mxu0 }
 0x957   : > { %v2575_v5 = vadd.f32 %v2546_v46, %v2544_v36 }
 0x9a4   : > { %v2406_v37 = vpop.f32.mrf.mxu1 }
 0x9a5   : > { %v2407_v41 = vadd.f32 1e-05, %v2406_v37 }
 0x9a6   : > { %v2408_v24 = vpop.f32.mrf.mxu1 }
 0x9a7   : > { %3497 = vrsqrt.f32 %v2407_v41  ;;  %v2409_v14 = vadd.f32 1e-05, %v2408_v24  ;;  %v2549_v41 = vld [vmem:[#allocation8] sm:$0x1] }
 0x9a9   : > { %3499 = vrsqrt.f32 %v2409_v14 }
 0x9b4   : > { %v3498_v15 = vpop.eup %3497 }
 0x9b5   : > { %v2416_v31 = vrot.slane %v3498_v15, %v2326_v49 }
 0x9b6   : > { %v3500_v53 = vpop.eup %3499 }
 0x9b7   : > { %v2420_v4 = vrot.slane %v3500_v53, %v2326_v49  ;;  %v2421_v18 = vmul.f32 %v2416_v31, %v2332_v59  ;;  %v2423_v13 = vmul.f32 %v2416_v31, %v2334_v2 }
 0x9b9   : > { %v2422_v39 = vmul.f32 %v2420_v4, %v2333_v32  ;;  %v2424_v40 = vmul.f32 %v2420_v4, %v2335_v9  ;;  %v2550_v35 = vmul.f32 %v2538_v54, %v2421_v18  ;;  %v2552_v3 = vmul.f32 %v2544_v36, %v2423_v13  ;;  %v2571_v32 = vld [vmem:[#allocation7 + $0x8] sm:$0xff]  ;;  %v2593_v4 = vld [vmem:[#allocation6] sm:$0xff] }
 0x9bb   : > { %v2583_v16 = vmax.f32 %v2421_v18, %v2422_v39  ;;  %v2586_v11 = vmax.f32 %v2423_v13, %v2424_v40  ;;  %v2551_v55 = vmul.f32 %v2540_v57, %v2422_v39  ;;  %v2553_v6 = vmul.f32 %v2546_v46, %v2424_v40 }
 0x9bd   : > { %2584 = vmax.xlane.f32.xlu1 %v2583_v16  ;;  %v2554_v34 = vadd.f32 %v2551_v55, %v2550_v35  ;;  %v2594_v16 = vld [vmem:[#allocation6 + $0x8] sm:$0xff] }
 0x9bf   : > { %v2555_v21 = vadd.f32 %v2554_v34, %v2552_v3 }
 0x9c1   : > { %2587 = vmax.xlane.f32.xlu1 %v2586_v11  ;;  %v2556_v60 = vadd.f32 %v2555_v21, %v2553_v6 }
 0x9de   : > { %v2574_v28 = vpop.xlane.xlu0 %2573 }
 0x9df   : > { %v2578_v38 = vadd.f32 %v2574_v28, %v2570_v63 }
 0x9e1   : > { %2581 = vst.msk [vmem:[#allocation7] sm:$0xff] %vm2580_vm11, %v2578_v38 }
 0xa46   : > { %v2585_v56 = vpop.xlane.xlu1 %2584 }
 0xa47   : > { %v4953_v26 = vmax.f32 %v4950_v52, %v2585_v56 }
 0xa49   : > { %v2595_v48 = vsub.f32 %v4950_v52, %v4953_v26  ;;  %2635 = vst.msk [vmem:[#allocation5] sm:$0xff] %vm2580_vm11, %v4953_v26  ;;  %2605 = vperm.xlu1 %3495, %v4953_v26  }
 0xa4a   : > { %v2588_v0 = vpop.xlane.xlu1 %2587 }
 0xa4b   : > { %v2592_v61 = vmax.f32 %v4955_v7, %v2588_v0  ;;  %v2597_v15 = vmul.f32 1.442695, %v2595_v48 }
 0xa4d   : > { %v2596_v58 = vsub.f32 %v4955_v7, %v2592_v61  ;;  %2636 = vst.msk [vmem:[#allocation5 + $0x8] sm:$0xff] %vm2580_vm11, %v2592_v61  ;;  %2610 = vperm.xlu1 %3495, %v2592_v61  }
 0xa4f   : > { %v2599_v31 = vmul.f32 1.442695, %v2596_v58 }
 0xa71   : > { %2557 = vadd.xlane.f32.xlu1 %v2556_v60 }
 0xa75   : > { %2576 = vadd.xlane.f32.xlu1 %v2575_v5 }
 0xac4   : > { %v2606_v27 = vpop.permute.xlu1 %2605 }
 0xac5   : > { %v2613_v29 = vsub.f32 %v2421_v18, %v2606_v27  ;;  %v2614_v1 = vsub.f32 %v2422_v39, %v2606_v27 }
 0xac7   : > { %v2617_v42 = vmul.f32 1.442695, %v2613_v29  ;;  %v2619_v45 = vmul.f32 1.442695, %v2614_v1 }
 0xac8   : > { %v2611_v30 = vpop.permute.xlu1 %2610 }
 0xac9   : > { %3501 = vpow2.f32 %v2617_v42  ;;  %v2615_v17 = vsub.f32 %v2423_v13, %v2611_v30  ;;  %v2616_v19 = vsub.f32 %v2424_v40, %v2611_v30 }
 0xaca   : > { %3503 = vpow2.f32 %v2619_v45 }
 0xacb   : > { %v2621_v23 = vmul.f32 1.442695, %v2615_v17  ;;  %v2623_v44 = vmul.f32 1.442695, %v2616_v19 }
 0xacd   : > { %3505 = vpow2.f32 %v2621_v23 }
 0xace   : > { %3507 = vpow2.f32 %v2623_v44 }
 0xacf   : > { %3509 = vpow2.f32 %v2597_v15 }
 0xad0   : > { %3511 = vpow2.f32 %v2599_v31 }
 0xad6   : > { %v3502_v20 = vpop.eup %3501 }
 0xad7   : > { %v3504_v51 = vpop.eup %3503 }
 0xad8   : > { %v2625_v49 = vadd.f32 %v3504_v51, %v3502_v20 }
 0xada   : > { %v3506_v33 = vpop.eup %3505  ;;  %2626 = vadd.xlane.f32.xlu1 %v2625_v49 }
 0xadb   : > { %v3508_v10 = vpop.eup %3507 }
 0xadc   : > { %v2628_v25 = vadd.f32 %v3508_v10, %v3506_v33  ;;  %v3510_v53 = vpop.eup %3509 }
 0xadd   : > { %v2601_v18 = vmul.f32 %v3510_v53, %v2593_v4  ;;  %v3512_v39 = vpop.eup %3511 }
 0xade   : > { %2629 = vadd.xlane.f32.xlu1 %v2628_v25  ;;  %v2602_v11 = vmul.f32 %v3512_v39, %v2594_v16 }
 0xafa   : > { %v2558_v43 = vpop.xlane.xlu1 %2557 }
 0xafb   : > { %v2559_v2 = vrot.slane %v2558_v43, 4 }
 0xafd   : > { %v2560_v9 = vadd.f32 %v2559_v2, %v2558_v43 }
 0xafe   : > { %v2577_v59 = vpop.xlane.xlu1 %2576 }
 0xaff   : > { %v2561_v12 = vrot.slane %v2560_v9, 2  ;;  %v2579_v22 = vadd.f32 %v2577_v59, %v2571_v32 }
 0xb01   : > { %v2562_v50 = vadd.f32 %v2561_v12, %v2560_v9  ;;  %2582 = vst.msk [vmem:[#allocation7 + $0x8] sm:$0xff] %vm2580_vm11, %v2579_v22 }
 0xb03   : > { %v2563_v8 = vrot.slane %v2562_v50, 1 }
 0xb05   : > { %v2564_v37 = vadd.f32 %v2563_v8, %v2562_v50 }
 0xb07   : > { %3175 = vpush %v2564_v37 }
 0xb38   : > { %s3176_s28 = spop %3175 }
 0xb39   : > { %v2566_v24 = vstv %s3176_s28 }
 0xb3a   : > { %v2567_v14 = vadd.f32 %v2566_v24, %v2549_v41 }
 0xb3c   : > { %2569 = vst.msk [vmem:[#allocation8] sm:$0x1] %vm2568_vm12, %v2567_v14 }
 0xb63   : > { %v2627_v40 = vpop.xlane.xlu1 %2626 }
 0xb64   : > { %v2631_v13 = vadd.f32 %v2627_v40, %v2601_v18 }
 0xb66   : > { %2633 = vst.msk [vmem:[#allocation6] sm:$0xff] %vm2580_vm11, %v2631_v13 }
 0xb67   : > { %v2630_v47 = vpop.xlane.xlu1 %2629 }
 0xb68   : > { %v2632_v54 = vadd.f32 %v2630_v47, %v2602_v11 }
 0xb6a   : > { %2634 = vst.msk [vmem:[#allocation6 + $0x8] sm:$0xff] %vm2580_vm11, %v2632_v54 }
 0xb6b PF: > { %s5116_s0 = sld [smem:[#allocation28_spill]] }
 0xb71   : > { %p2637_p3 = scmp.eq.s32.totalorder %s5116_s0, 3 }
 0xb73   : > { %p2638_p4 = pnand %p2637_p3, %p638_p0 }
 0xb75   : > { %2641 = sbr.rel (%p2638_p4) target bundleno = 3171 (0xc63), region = 84 }
 0xb7a   : > { %v2644_v57 = vld [vmem:[#allocation6] sm:$0xff]  ;;  %v2645_v62 = vld [vmem:[#allocation6 + $0x8] sm:$0xff]  ;;  %v2642_v56 = vld [vmem:[#allocation5] sm:$0xff]  ;;  %vm2656_vm13 = vcmask 7168   ;;  %vm2675_vm14 = vcmask 0  }
 0xb7b   : > { %3513 = vlog2.f32 %v2644_v57  ;;  %v2643_v7 = vld [vmem:[#allocation5 + $0x8] sm:$0xff]  ;;  %v2652_v61 = vld [vmem:[#allocation7] sm:$0xff]  ;;  %v2677_v6 = vld [vmem:[#allocation10] sm:$0x1] }
 0xb7c   : > { %3515 = vlog2.f32 %v2645_v62  ;;  %v2653_v55 = vld [vmem:[#allocation7 + $0x8] sm:$0xff]  ;;  %2678 = vst.msk [vmem:[#allocation18] sm:$0x1] %vm2675_vm14, %v2677_v6  ;;  %v2670_v1 = vld [vmem:[#allocation8] sm:$0x1] }
 0xb7d   : > { %v2673_v30 = vld [vmem:[#allocation9] sm:$0x1] }
 0xb88   : > { %v3514_v52 = vpop.eup %3513 }
 0xb89   : > { %v3516_v26 = vpop.eup %3515  ;;  %v2647_v48 = vmul.f32 0.6931472, %v3514_v52 }
 0xb8a   : > { %v2649_v0 = vmul.f32 0.6931472, %v3516_v26 }
 0xb8b   : > { %v2650_v58 = vadd.f32 %v2647_v48, %v2642_v56 }
 0xb8c   : > { %v2651_v35 = vadd.f32 %v2649_v0, %v2643_v7 }
 0xb8d   : > { %v2654_v36 = vmul.f32 %v2652_v61, %v2650_v58 }
 0xb8e   : > { %v2655_v34 = vmul.f32 %v2653_v55, %v2651_v35 }
 0xb8f   : > { %v2657_v3 = vsel %vm2656_vm13, %v2654_v36, 0.0 }
 0xb90   : > { %v2658_v46 = vsel %vm2656_vm13, %v2655_v34, 0.0 }
 0xb91   : > { %v2659_v21 = vadd.f32 %v2658_v46, %v2657_v3 }
 0xb93   : > { %2660 = vadd.xlane.f32.xlu0 %v2659_v21 }
 0xc1c   : > { %v2661_v60 = vpop.xlane.xlu0 %2660 }
 0xc1d   : > { %v2662_v5 = vrot.slane %v2661_v60, 4 }
 0xc1f   : > { %v2663_v63 = vadd.f32 %v2662_v5, %v2661_v60 }
 0xc21   : > { %v2664_v28 = vrot.slane %v2663_v63, 2 }
 0xc23   : > { %v2665_v38 = vadd.f32 %v2664_v28, %v2663_v63 }
 0xc25   : > { %v2666_v27 = vrot.slane %v2665_v38, 1 }
 0xc27   : > { %v2667_v29 = vadd.f32 %v2666_v27, %v2665_v38 }
 0xc29   : > { %3177 = vpush %v2667_v29 }
 0xc5a   : > { %s3178_s17 = spop %3177 }
 0xc5b   : > { %v2669_v42 = vstv %s3178_s17 }
 0xc5c   : > { %v2671_v45 = vsub.f32 %v2669_v42, %v2670_v1 }
 0xc5e   : > { %v2672_v17 = vmul.f32 0.015625, %v2671_v45 }
 0xc60   : > { %v2674_v19 = vadd.f32 %v2673_v30, %v2672_v17 }
 0xc62   : > { %2676 = vst.msk [vmem:[#allocation17] sm:$0x1] %vm2675_vm14, %v2674_v19 }
 0xc63 PF: > { %p3204_p2 = scmp.eq.s32.totalorder %s3918_s23, 7  ;;  %s3795_s27 = smov [#allocation17]  }
 0xc64   : > { %s2686_s12 = sshll.u32 %s3795_s27, 4  ;;  %s3796_s8 = smov [#allocation18]   ;;  %s2687_s12 = int_to_ptr.vmem [resolvable:$true] %s2686_s12 }
 0xc65   : > { %s2697_s15 = sshll.u32 %s3796_s8, 4  ;;  %s3601_s1 = scalar_lea.vmem %s2687_s12, 16  ;;  %s2698_s15 = int_to_ptr.vmem [resolvable:$true] %s2697_s15 }
 0xc66   : > { %p3602_p6 = scmp.ne.s32.totalorder %s2687_s12, %s3601_s1  ;;  %s3607_s9 = scalar_lea.vmem %s2687_s12, 32 }
 0xc67   : > { %p3608_p7 = scmp.lt.s32.totalorder %s2687_s12, %s2687_s12  ;;  %p3609_p12 = scmp.lt.s32.totalorder %s3607_s9, %s3601_s1 }
 0xc68   : > { %p3603_p9 = pnand %p3602_p6, %p3204_p2 }
 0xc69   : > { %p3610_p5 = por %p3609_p12, %p3608_p7 }
 0xc6a   : > { %p3604_p13 = pneg %p3603_p9 }
 0xc6c   : > { %p3611_p11 = pnand %p3610_p5, %p3604_p13 }
 0xc6e   : > { %3614 = shalt.err (!%p3611_p11)
}
 0xc6f   : > { %s5118_s30 = sld [smem:[#allocation40_spill]]  ;;  %s3625_s18 = scalar_lea.vmem %s2698_s15, 16 }
 0xc70   : > { %p3626_p8 = scmp.ne.s32.totalorder %s2698_s15, %s3625_s18  ;;  %s3631_s29 = scalar_lea.vmem %s2698_s15, 32 }
 0xc71   : > { %p3632_p1 = scmp.lt.s32.totalorder %s2698_s15, %s2698_s15  ;;  %p3633_p3 = scmp.lt.s32.totalorder %s3631_s29, %s3625_s18 }
 0xc72   : > { %p3627_p0 = pnand %p3626_p8, %p3204_p2 }
 0xc73   : > { %p3634_p4 = por %p3633_p3, %p3632_p1 }
 0xc74   : > { %p3628_p10 = pneg %p3627_p0 }
 0xc75   : > { %3186 = dma.vmem_to_hbm [thread:$0]  (%p3204_p2), %s2687_s12, 16, %s5118_s30, [#allocation13]  }
 0xc76   : > { %p3635_p6 = pnand %p3634_p4, %p3628_p10 }
 0xc78   : > { %3638 = shalt.err (!%p3635_p6)
}
 0xc79   : > { %s5119_s5 = sld [smem:[#allocation41_spill]] }
 0xc7f   : > { %3188 = dma.vmem_to_hbm [thread:$0]  (%p3204_p2), %s2698_s15, 16, %s5119_s5, [#allocation19]  }
 0xc80   : > { %3718 = dma.done.wait (%p3204_p2), [#allocation13], 16  }
 0xc81   : > { %3720 = vsyncadd (%p3204_p2), [#allocation13], 4294967280 }
 0xc82   : > { %3722 = dma.done.wait (%p3204_p2), [#allocation19], 16  }
 0xc83   : > { %3724 = vsyncadd (%p3204_p2), [#allocation19], 4294967280 }
 0xc84 PF: > { %s28_s22 = sadd.s32 1, %s3779_s22   ;;  %s5121_s30 = sld [smem:[#allocation26_spill]] }
 0xc85   : > { %p5001_p9 = scmp.ge.s32.totalorder %s28_s22, 10   ;;  %s5122_s0 = sld [smem:[#allocation30_spill]] }
 0xc86   : > { %s5123_s4 = sld [smem:[#allocation27_spill]]  ;;  %s5125_s10 = smov %s3735_s11 }
 0xc87   : > { %s5124_s17 = sld [smem:[#allocation31_spill]]  ;;  %s5126_s11 = smov %s4037_s19 }
 0xc88   : > { %s5127_s12 = smov %s3743_s13  ;;  %s5128_s13 = smov %s3747_s14 }
 0xc89   : > { %s5130_s15 = smov %s3755_s16  ;;  %s5132_s18 = smov %s3771_s20 }
 0xc8a   : > { %s5133_s19 = smov %s3775_s21  ;;  %s5134_s20 = smov %s5137_s24 }
 0xc8b   : > { %s5129_s14 = smov %s5122_s0  ;;  %s5135_s21 = smov %s5141_s25 }
 0xc8c   : > { %s5131_s16 = smov %s5123_s4  ;;  %27 = sbr.rel (!%p5001_p9) target bundleno = 23 (0x17), region = 141 }
 0xc91   :  { %2714 = vsyncpa [#allocation12], 1 }
 0xc92   :  { %2716 = vsyncpa [#allocation12 + $0x1], 1 }
 0xc93   :  { %2717 = vsyncpa [#allocation15], 1 }
 0xc94   :  { %2719 = vsyncpa [#allocation15 + $0x1], 1 }
 0xc95   :  { %2720 = vsyncpa [#allocation13], 1 }
 0xc96   :  { %2722 = vsyncpa [#allocation13 + $0x1], 1 }
 0xc97   :  { %2723 = vsyncpa [#allocation19], 1 }

</bundles_post_ra>
